<compile_context>
chip_gen: v6e
topology: v6e:2x2x1
jax: 0.10.0
libtpu: 0.0.40
codegen_flags: <defaults>
</compile_context>

<pallas_src>
import functools

import jax
import jax.numpy as jnp
from jax.experimental import pallas as pl
from jax.experimental.pallas import tpu as pltpu

LANE = 128                 # TPU lane width; all channel dims padded to a multiple
CDTYPE = jnp.bfloat16      # MXU-native input dtype (accumulation stays f32)


def _round_up(v, m):
    return ((v + m - 1) // m) * m


# ---------------------------------------------------------------------------
# Pallas kernel: tiled matmul with fused (shift, skip-add, ReLU) epilogue
# ---------------------------------------------------------------------------
def _mm_kernel(x_ref, w_ref, shift_ref, *rest, relu, has_add, nk):
    rest = list(rest)
    add_ref = rest.pop(0) if has_add else None
    o_ref = rest.pop(0)
    acc_ref = rest.pop(0) if nk > 1 else None

    def epilogue(acc):
        y = acc + shift_ref[...]
        if has_add:
            y = y + add_ref[...].astype(jnp.float32)
        if relu:
            y = jnp.maximum(y, 0.0)
        o_ref[...] = y.astype(o_ref.dtype)

    if nk == 1:
        epilogue(jnp.dot(x_ref[...], w_ref[...],
                         preferred_element_type=jnp.float32))
    else:
        @pl.when(pl.program_id(1) == 0)
        def _():
            acc_ref[...] = jnp.zeros_like(acc_ref)

        acc_ref[...] += jnp.dot(x_ref[...], w_ref[...],
                                preferred_element_type=jnp.float32)

        @pl.when(pl.program_id(1) == nk - 1)
        def _():
            epilogue(acc_ref[...])


def matmul_fused(x, w, shift, add=None, *, relu=False, out_dtype=CDTYPE,
                 m_cap=512, k_cap=512):
    """out = [relu]((M,K)@(K,N) + shift[N] [+ add[M,N]]).  N must be 128-dense."""
    M, K = x.shape
    Kw, N = w.shape
    assert K == Kw and N % LANE == 0, (K, Kw, N)

    # M tiling: few, large blocks (grid >= 2 on the big 32x32 layers).
    nm = max(1, -(-M // m_cap))
    tm = _round_up(-(-M // nm), 8)
    Mp = tm * nm

    # K tiling: largest 128-multiple divisor of K not above k_cap (pad otherwise).
    if K <= k_cap:
        tk = K
    else:
        tk = next((c for c in (512, 384, 256, 128) if K % c == 0), k_cap)
    nk = -(-K // tk)
    Kp = tk * nk

    x = x.astype(CDTYPE)
    w = w.astype(CDTYPE)
    if Mp != M:
        x = jnp.pad(x, ((0, Mp - M), (0, 0)))
    if Kp != K:
        x = jnp.pad(x, ((0, 0), (0, Kp - K)))
        w = jnp.pad(w, ((0, Kp - K), (0, 0)))
    shift2 = shift.reshape(1, N).astype(jnp.float32)

    in_specs = [
        pl.BlockSpec((tm, tk), lambda i, k: (i, k)),
        pl.BlockSpec((tk, N), lambda i, k: (k, 0)),
        pl.BlockSpec((1, N), lambda i, k: (0, 0)),
    ]
    args = [x, w, shift2]
    if add is not None:
        a = add.astype(CDTYPE)
        if Mp != M:
            a = jnp.pad(a, ((0, Mp - M), (0, 0)))
        in_specs.append(pl.BlockSpec((tm, N), lambda i, k: (i, 0)))
        args.append(a)

    out = pl.pallas_call(
        functools.partial(_mm_kernel, relu=relu, has_add=add is not None, nk=nk),
        out_shape=jax.ShapeDtypeStruct((Mp, N), out_dtype),
        grid_spec=pltpu.PrefetchScalarGridSpec(
            num_scalar_prefetch=0,
            grid=(nm, nk),
            in_specs=in_specs,
            out_specs=pl.BlockSpec((tm, N), lambda i, k: (i, 0)),
            scratch_shapes=([pltpu.VMEM((tm, N), jnp.float32)] if nk > 1 else []),
        ),
        compiler_params=pltpu.CompilerParams(
            dimension_semantics=("parallel", "arbitrary")),
    )(*args)
    return out[:M] if Mp != M else out


# ---------------------------------------------------------------------------
# Conv layers (NHWC, channel-padded to 128); weights are folded host-side.
# ---------------------------------------------------------------------------
def bn_scale_shift(bn, eps=1e-5):
    scale = bn['gamma'] / jnp.sqrt(bn['var'] + eps)
    shift = bn['beta'] - bn['mean'] * scale
    return scale, shift


def conv1x1(x, w_oihw, scale, shift, *, relu, add=None, out_dtype=CDTYPE):
    """1x1 conv; BN scale folded into weights; optional fused skip-add/ReLU."""
    B, H, W, Cin_p = x.shape
    Cout, Cin = w_oihw.shape[:2]
    Cout_p = _round_up(Cout, LANE)
    wmat = (w_oihw[:, :, 0, 0] * scale[:, None]).T            # (Cin, Cout)
    wmat = jnp.pad(wmat, ((0, Cin_p - Cin), (0, Cout_p - Cout)))
    shift_p = jnp.pad(shift, (0, Cout_p - Cout))
    x2 = x.reshape(B * H * W, Cin_p)
    add2 = None if add is None else add.reshape(B * H * W, Cin_p)
    y = matmul_fused(x2, wmat, shift_p, add2, relu=relu, out_dtype=out_dtype)
    return y.reshape(B, H, W, Cout_p)


def conv3x3(x, w_oihw, scale, shift, *, relu):
    """3x3 / stride 1 / pad 1 conv via im2col + single fused matmul."""
    B, H, W, Cin_p = x.shape
    Cout, Cin = w_oihw.shape[:2]
    Cout_p = _round_up(Cout, LANE)
    wf = w_oihw * scale[:, None, None, None]                  # fold BN gamma/var
    wmat = jnp.transpose(wf, (2, 3, 1, 0))                    # (kh, kw, Cin, Cout)
    wmat = jnp.pad(wmat, ((0, 0), (0, 0), (0, Cin_p - Cin), (0, Cout_p - Cout)))
    wmat = wmat.reshape(9 * Cin_p, Cout_p)
    shift_p = jnp.pad(shift, (0, Cout_p - Cout))

    xp = jnp.pad(x, ((0, 0), (1, 1), (1, 1), (0, 0)))
    cols = jnp.concatenate(
        [xp[:, i:i + H, j:j + W, :] for i in range(3) for j in range(3)], axis=-1)
    y = matmul_fused(cols.reshape(B * H * W, 9 * Cin_p), wmat, shift_p, relu=relu)
    return y.reshape(B, H, W, Cout_p)


def conv_transpose4x4_s2(x, w_iohw, scale, shift, *, relu):
    """ConvTranspose2d(k=4, s=2, p=1) via sub-pixel (output-phase) decomposition.

    y[2i+1+lr, 2j+1+lc] = sum_{dh,dw} x[i+dh, j+dw] * W[:, :, 2+lr-2dh, 2+lc-2dw]
    -> single 2x2-window im2col matmul to N = 4*Cout, then depth-to-space + crop.
    """
    B, H, W, Cin_p = x.shape
    Cin, Cout = w_iohw.shape[:2]
    Cout_p = _round_up(Cout, LANE)
    wf = w_iohw * scale[None, :, None, None]                  # fold BN gamma/var
    w_r = jnp.transpose(wf, (2, 3, 0, 1))                     # (kh, kw, Cin, Cout)
    w_r = jnp.pad(w_r, ((0, 0), (0, 0), (0, Cin_p - Cin), (0, Cout_p - Cout)))
    taps = []
    for dh in (0, 1):
        for dw in (0, 1):
            blk = w_r[2 - 2 * dh:4 - 2 * dh, 2 - 2 * dw:4 - 2 * dw]  # (lr,lc,ci,co)
            taps.append(jnp.transpose(blk, (2, 0, 1, 3)).reshape(Cin_p, 4 * Cout_p))
    wmat = jnp.concatenate(taps, axis=0)                      # (4*Cin_p, 4*Cout_p)
    shift_p = jnp.tile(jnp.pad(shift, (0, Cout_p - Cout)), 4)  # N order (lr,lc,co)

    xp = jnp.pad(x, ((0, 0), (1, 1), (1, 1), (0, 0)))
    Hw, Ww = H + 1, W + 1
    cols = jnp.concatenate(
        [xp[:, dh:dh + Hw, dw:dw + Ww, :] for dh in (0, 1) for dw in (0, 1)],
        axis=-1)
    y = matmul_fused(cols.reshape(B * Hw * Ww, 4 * Cin_p), wmat, shift_p, relu=relu)

    # depth-to-space: (lr, lc, co) phase blocks -> spatial interleave, then crop
    y = y.reshape(B, Hw, Ww, 2, 2, Cout_p)
    y = jnp.transpose(y, (0, 1, 3, 2, 4, 5)).reshape(B, 2 * Hw, 2 * Ww, Cout_p)
    return y[:, 1:2 * H + 1, 1:2 * W + 1, :]


# ---------------------------------------------------------------------------
# Parameter init (deterministic, in-script; PyTorch-like layouts)
# ---------------------------------------------------------------------------
def init_params(key, channels, latent_channels, out_channels):
    keys = iter(jax.random.split(key, 64))

    def conv_w(cout, cin, k):
        fan_in = cin * k * k
        return jax.random.normal(next(keys), (cout, cin, k, k),
                                 jnp.float32) / jnp.sqrt(fan_in)

    def convT_w(cin, cout, k):
        fan_in = cin * k * k
        return jax.random.normal(next(keys), (cin, cout, k, k),
                                 jnp.float32) / jnp.sqrt(fan_in)

    def bn(c):
        return dict(
            gamma=1.0 + 0.1 * jax.random.normal(next(keys), (c,), jnp.float32),
            beta=0.1 * jax.random.normal(next(keys), (c,), jnp.float32),
            mean=0.1 * jax.random.normal(next(keys), (c,), jnp.float32),
            var=1.0 + jnp.abs(jax.random.normal(next(keys), (c,), jnp.float32)),
        )

    def residual(c):
        return dict(w3=conv_w(c, c, 3), bn1=bn(c),
                    w1=conv_w(c, c, 1), bn2=bn(c))

    return dict(
        w_in=conv_w(channels, latent_channels, 1),
        bn_in=bn(channels),
        res1=residual(channels),
        res2=residual(channels),
        wt1=convT_w(channels, channels, 4),
        bn_t1=bn(channels),
        wt2=convT_w(channels, channels, 4),
        bn_t2=bn(channels),
        w_out=conv_w(out_channels, channels, 1),
        b_out=0.1 * jax.random.normal(next(keys), (out_channels,), jnp.float32),
    )


# ---------------------------------------------------------------------------
# Forward pass
# ---------------------------------------------------------------------------
def residual_forward(h, p, *, relu_out):
    """`h` is already relu(x) (the block's leading inplace ReLU is folded into
    the producer kernel).  Skip path also uses relu(x), as in PyTorch with
    nn.ReLU(inplace=True).  If relu_out, the next block's leading ReLU is
    folded into this block's last kernel."""
    s1, b1 = bn_scale_shift(p['bn1'])
    y = conv3x3(h, p['w3'], s1, b1, relu=True)                 # conv3x3 + BN + ReLU
    s2, b2 = bn_scale_shift(p['bn2'])
    return conv1x1(y, p['w1'], s2, b2, relu=relu_out, add=h)   # conv1x1 + BN + skip


def fc_decoder_forward(z, params, *, latent_channels):
    B = z.shape[0]
    x = z.reshape(B, latent_channels, 8, 8)                    # z.view(B, -1, 8, 8)
    x = jnp.transpose(x, (0, 2, 3, 1))                         # NHWC
    x = jnp.pad(x, ((0, 0), (0, 0), (0, 0),
                    (0, _round_up(latent_channels, LANE) - latent_channels)))

    # conv1x1 + BN; res1's leading inplace ReLU folded into this epilogue
    s, b = bn_scale_shift(params['bn_in'])
    x = conv1x1(x, params['w_in'], s, b, relu=True)

    x = residual_forward(x, params['res1'], relu_out=True)     # relu folded for res2
    x = residual_forward(x, params['res2'], relu_out=False)

    s, b = bn_scale_shift(params['bn_t1'])
    x = conv_transpose4x4_s2(x, params['wt1'], s, b, relu=True)   # 8x8  -> 16x16
    s, b = bn_scale_shift(params['bn_t2'])
    x = conv_transpose4x4_s2(x, params['wt2'], s, b, relu=True)   # 16x16 -> 32x32

    out_channels = params['w_out'].shape[0]
    ones = jnp.ones((out_channels,), jnp.float32)
    x = conv1x1(x, params['w_out'], ones, params['b_out'], relu=False,
                out_dtype=jnp.float32)                          # 1x1 conv + bias
    x = x[..., :out_channels]                                   # drop lane padding
    return jnp.transpose(x, (0, 3, 1, 2))                       # NCHW


# ---------------------------------------------------------------------------
if __name__ == "__main__":
    # Small shapes consistent with the module: spatial fixed at 8x8 by
    # z.view(B, -1, 8, 8); shrink channel counts for the demo.
    B = 2
    channels = 32
    latent_channels = 16
    out_channels = 8

    key = jax.random.PRNGKey(0)
    kp, kz = jax.random.split(key)
    params = init_params(kp, channels, latent_channels, out_channels)
    z = jax.random.normal(kz, (B, latent_channels * 8 * 8), jnp.float32)

    fwd = jax.jit(functools.partial(fc_decoder_forward,
                                    latent_channels=latent_channels))
    out = fwd(z, params)
    jax.block_until_ready(out)
    assert out.shape == (B, out_channels, 32, 32), out.shape
    print("KERNEL_OK")
</pallas_src>

<mosaic_0001>
module attributes {stable_mosaic.version = 11 : i64} {
  func.func @_mm_kernel(%arg0: i32, %arg1: i32, %arg2: memref<128x128xbf16, #tpu.memory_space<vmem>>, %arg3: memref<128x128xbf16, #tpu.memory_space<vmem>>, %arg4: memref<1x128xf32, #tpu.memory_space<vmem>>, %arg5: memref<128x128xbf16, #tpu.memory_space<vmem>>) attributes {dimension_semantics = [#tpu.dimension_semantics<parallel>, #tpu.dimension_semantics<arbitrary>], iteration_bounds = array<i64: 1, 1>, scalar_prefetch = 0 : i64, scratch_operands = 0 : i64, tpu.core_type = #tpu.core_type<tc>, window_params = [{transform_indices = @transform_0, window_bounds = array<i64: 128, 128>}, {transform_indices = @transform_1, window_bounds = array<i64: 128, 128>}, {pipeline_mode = #tpu.pipeline_mode<synchronous>, transform_indices = @transform_2, window_bounds = array<i64: 1, 128>}, {transform_indices = @transform_3, window_bounds = array<i64: 128, 128>}]} {
    %c0 = arith.constant 0 : index
    %c0_0 = arith.constant 0 : index
    %0 = vector.load %arg2[%c0, %c0_0] : memref<128x128xbf16, #tpu.memory_space<vmem>>, vector<128x128xbf16>
    %c0_1 = arith.constant 0 : index
    %c0_2 = arith.constant 0 : index
    %1 = vector.load %arg3[%c0_1, %c0_2] : memref<128x128xbf16, #tpu.memory_space<vmem>>, vector<128x128xbf16>
    %cst = arith.constant dense<0.000000e+00> : vector<128x128xf32>
    %2 = tpu.matmul %0, %1, %cst {dimension_numbers = #tpu.dot_dimension_numbers<[1], [0], [0], [1], [0, 0, 1, 1], [], []>} : vector<128x128xbf16>, vector<128x128xbf16>, vector<128x128xf32> -> vector<128x128xf32>
    %c0_3 = arith.constant 0 : index
    %c0_4 = arith.constant 0 : index
    %3 = vector.load %arg4[%c0_3, %c0_4] : memref<1x128xf32, #tpu.memory_space<vmem>>, vector<1x128xf32>
    %4 = vector.broadcast %3 : vector<1x128xf32> to vector<128x128xf32>
    %5 = arith.addf %2, %4 : vector<128x128xf32>
    %cst_5 = arith.constant 0.000000e+00 : f32
    %6 = vector.broadcast %cst_5 : f32 to vector<128x128xf32>
    %7 = arith.maximumf %5, %6 : vector<128x128xf32>
    %8 = arith.truncf %7 : vector<128x128xf32> to vector<128x128xbf16>
    %c0_6 = arith.constant 0 : index
    %c0_7 = arith.constant 0 : index
    %9 = vector.load %arg5[%c0_6, %c0_7] : memref<128x128xbf16, #tpu.memory_space<vmem>>, vector<128x128xbf16>
    tpu.vector_store %arg5[%c0_6, %c0_7], %8 {strides = array<i32>} : memref<128x128xbf16, #tpu.memory_space<vmem>>, vector<128x128xbf16>,
    return
  }
  func.func @transform_0(%arg0: i32, %arg1: i32) -> (i32, i32) {
    %c0_i32 = arith.constant 0 : i32
    return %arg0, %arg1 : i32, i32
  }
  func.func @transform_1(%arg0: i32, %arg1: i32) -> (i32, i32) {
    %c0_i32 = arith.constant 0 : i32
    %c0_i32_0 = arith.constant 0 : i32
    return %arg1, %c0_i32 : i32, i32
  }
  func.func @transform_2(%arg0: i32, %arg1: i32) -> (i32, i32) {
    %c0_i32 = arith.constant 0 : i32
    %c0_i32_0 = arith.constant 0 : i32
    %c0_i32_1 = arith.constant 0 : i32
    return %c0_i32, %c0_i32_0 : i32, i32
  }
  func.func @transform_3(%arg0: i32, %arg1: i32) -> (i32, i32) {
    %c0_i32 = arith.constant 0 : i32
    %c0_i32_0 = arith.constant 0 : i32
    return %arg0, %c0_i32 : i32, i32
  }
}

module attributes {stable_mosaic.version = 11 : i64} {
  func.func @_mm_kernel(%arg0: i32, %arg1: i32, %arg2: memref<128x384xbf16, #tpu.memory_space<vmem>>, %arg3: memref<384x128xbf16, #tpu.memory_space<vmem>>, %arg4: memref<1x128xf32, #tpu.memory_space<vmem>>, %arg5: memref<128x128xbf16, #tpu.memory_space<vmem>>, %arg6: memref<128x128xf32, #tpu.memory_space<vmem>>) attributes {dimension_semantics = [#tpu.dimension_semantics<parallel>, #tpu.dimension_semantics<arbitrary>], iteration_bounds = array<i64: 1, 3>, scalar_prefetch = 0 : i64, scratch_operands = 1 : i64, tpu.core_type = #tpu.core_type<tc>, window_params = [{transform_indices = @transform_0, window_bounds = array<i64: 128, 384>}, {transform_indices = @transform_1, window_bounds = array<i64: 384, 128>}, {pipeline_mode = #tpu.pipeline_mode<synchronous>, transform_indices = @transform_2, window_bounds = array<i64: 1, 128>}, {transform_indices = @transform_3, window_bounds = array<i64: 128, 128>}]} {
    %c0_i32 = arith.constant 0 : i32
    %0 = arith.cmpi eq, %arg1, %c0_i32 : i32
    %1 = arith.extui %0 : i1 to i32
    %c0_i32_0 = arith.constant 0 : i32
    %2 = arith.cmpi ne, %1, %c0_i32_0 : i32
    scf.if %2 {
      %cst_9 = arith.constant 0.000000e+00 : f32
      %12 = vector.broadcast %cst_9 : f32 to vector<128x128xf32>
      %c0_10 = arith.constant 0 : index
      %c0_11 = arith.constant 0 : index
      %13 = vector.load %arg6[%c0_10, %c0_11] : memref<128x128xf32, #tpu.memory_space<vmem>>, vector<128x128xf32>
      tpu.vector_store %arg6[%c0_10, %c0_11], %12 {strides = array<i32>} : memref<128x128xf32, #tpu.memory_space<vmem>>, vector<128x128xf32>,
    } else {
    }
    %c0 = arith.constant 0 : index
    %c0_1 = arith.constant 0 : index
    %3 = vector.load %arg6[%c0, %c0_1] : memref<128x128xf32, #tpu.memory_space<vmem>>, vector<128x128xf32>
    %c0_2 = arith.constant 0 : index
    %c0_3 = arith.constant 0 : index
    %4 = vector.load %arg2[%c0_2, %c0_3] : memref<128x384xbf16, #tpu.memory_space<vmem>>, vector<128x384xbf16>
    %c0_4 = arith.constant 0 : index
    %c0_5 = arith.constant 0 : index
    %5 = vector.load %arg3[%c0_4, %c0_5] : memref<384x128xbf16, #tpu.memory_space<vmem>>, vector<384x128xbf16>
    %cst = arith.constant dense<0.000000e+00> : vector<128x128xf32>
    %6 = tpu.matmul %4, %5, %cst {dimension_numbers = #tpu.dot_dimension_numbers<[1], [0], [0], [1], [0, 0, 1, 1], [], []>} : vector<128x384xbf16>, vector<384x128xbf16>, vector<128x128xf32> -> vector<128x128xf32>
    %7 = arith.addf %3, %6 : vector<128x128xf32>
    %c0_6 = arith.constant 0 : index
    %c0_7 = arith.constant 0 : index
    %8 = vector.load %arg6[%c0_6, %c0_7] : memref<128x128xf32, #tpu.memory_space<vmem>>, vector<128x128xf32>
    tpu.vector_store %arg6[%c0_6, %c0_7], %7 {strides = array<i32>} : memref<128x128xf32, #tpu.memory_space<vmem>>, vector<128x128xf32>,
    %c2_i32 = arith.constant 2 : i32
    %9 = arith.cmpi eq, %arg1, %c2_i32 : i32
    %10 = arith.extui %9 : i1 to i32
    %c0_i32_8 = arith.constant 0 : i32
    %11 = arith.cmpi ne, %10, %c0_i32_8 : i32
    scf.if %11 {
      %c0_9 = arith.constant 0 : index
      %c0_10 = arith.constant 0 : index
      %12 = vector.load %arg6[%c0_9, %c0_10] : memref<128x128xf32, #tpu.memory_space<vmem>>, vector<128x128xf32>
      %c0_11 = arith.constant 0 : index
      %c0_12 = arith.constant 0 : index
      %13 = vector.load %arg4[%c0_11, %c0_12] : memref<1x128xf32, #tpu.memory_space<vmem>>, vector<1x128xf32>
      %14 = vector.broadcast %13 : vector<1x128xf32> to vector<128x128xf32>
      %15 = arith.addf %12, %14 : vector<128x128xf32>
      %cst_13 = arith.constant 0.000000e+00 : f32
      %16 = vector.broadcast %cst_13 : f32 to vector<128x128xf32>
      %17 = arith.maximumf %15, %16 : vector<128x128xf32>
      %18 = arith.truncf %17 : vector<128x128xf32> to vector<128x128xbf16>
      %c0_14 = arith.constant 0 : index
      %c0_15 = arith.constant 0 : index
      %19 = vector.load %arg5[%c0_14, %c0_15] : memref<128x128xbf16, #tpu.memory_space<vmem>>, vector<128x128xbf16>
      tpu.vector_store %arg5[%c0_14, %c0_15], %18 {strides = array<i32>} : memref<128x128xbf16, #tpu.memory_space<vmem>>, vector<128x128xbf16>,
    } else {
    }
    return
  }
  func.func @transform_0(%arg0: i32, %arg1: i32) -> (i32, i32) {
    %c0_i32 = arith.constant 0 : i32
    return %arg0, %arg1 : i32, i32
  }
  func.func @transform_1(%arg0: i32, %arg1: i32) -> (i32, i32) {
    %c0_i32 = arith.constant 0 : i32
    %c0_i32_0 = arith.constant 0 : i32
    return %arg1, %c0_i32 : i32, i32
  }
  func.func @transform_2(%arg0: i32, %arg1: i32) -> (i32, i32) {
    %c0_i32 = arith.constant 0 : i32
    %c0_i32_0 = arith.constant 0 : i32
    %c0_i32_1 = arith.constant 0 : i32
    return %c0_i32, %c0_i32_0 : i32, i32
  }
  func.func @transform_3(%arg0: i32, %arg1: i32) -> (i32, i32) {
    %c0_i32 = arith.constant 0 : i32
    %c0_i32_0 = arith.constant 0 : i32
    return %arg0, %c0_i32 : i32, i32
  }
}

module attributes {stable_mosaic.version = 11 : i64} {
  func.func @_mm_kernel(%arg0: i32, %arg1: i32, %arg2: memref<128x128xbf16, #tpu.memory_space<vmem>>, %arg3: memref<128x128xbf16, #tpu.memory_space<vmem>>, %arg4: memref<1x128xf32, #tpu.memory_space<vmem>>, %arg5: memref<128x128xbf16, #tpu.memory_space<vmem>>, %arg6: memref<128x128xbf16, #tpu.memory_space<vmem>>) attributes {dimension_semantics = [#tpu.dimension_semantics<parallel>, #tpu.dimension_semantics<arbitrary>], iteration_bounds = array<i64: 1, 1>, scalar_prefetch = 0 : i64, scratch_operands = 0 : i64, tpu.core_type = #tpu.core_type<tc>, window_params = [{transform_indices = @transform_0, window_bounds = array<i64: 128, 128>}, {transform_indices = @transform_1, window_bounds = array<i64: 128, 128>}, {pipeline_mode = #tpu.pipeline_mode<synchronous>, transform_indices = @transform_2, window_bounds = array<i64: 1, 128>}, {transform_indices = @transform_3, window_bounds = array<i64: 128, 128>}, {transform_indices = @transform_4, window_bounds = array<i64: 128, 128>}]} {
    %c0 = arith.constant 0 : index
    %c0_0 = arith.constant 0 : index
    %0 = vector.load %arg2[%c0, %c0_0] : memref<128x128xbf16, #tpu.memory_space<vmem>>, vector<128x128xbf16>
    %c0_1 = arith.constant 0 : index
    %c0_2 = arith.constant 0 : index
    %1 = vector.load %arg3[%c0_1, %c0_2] : memref<128x128xbf16, #tpu.memory_space<vmem>>, vector<128x128xbf16>
    %cst = arith.constant dense<0.000000e+00> : vector<128x128xf32>
    %2 = tpu.matmul %0, %1, %cst {dimension_numbers = #tpu.dot_dimension_numbers<[1], [0], [0], [1], [0, 0, 1, 1], [], []>} : vector<128x128xbf16>, vector<128x128xbf16>, vector<128x128xf32> -> vector<128x128xf32>
    %c0_3 = arith.constant 0 : index
    %c0_4 = arith.constant 0 : index
    %3 = vector.load %arg4[%c0_3, %c0_4] : memref<1x128xf32, #tpu.memory_space<vmem>>, vector<1x128xf32>
    %4 = vector.broadcast %3 : vector<1x128xf32> to vector<128x128xf32>
    %5 = arith.addf %2, %4 : vector<128x128xf32>
    %c0_5 = arith.constant 0 : index
    %c0_6 = arith.constant 0 : index
    %6 = vector.load %arg5[%c0_5, %c0_6] : memref<128x128xbf16, #tpu.memory_space<vmem>>, vector<128x128xbf16>
    %7 = arith.extf %6 : vector<128x128xbf16> to vector<128x128xf32>
    %8 = arith.addf %5, %7 : vector<128x128xf32>
    %9 = arith.truncf %8 : vector<128x128xf32> to vector<128x128xbf16>
    %c0_7 = arith.constant 0 : index
    %c0_8 = arith.constant 0 : index
    %10 = vector.load %arg6[%c0_7, %c0_8] : memref<128x128xbf16, #tpu.memory_space<vmem>>, vector<128x128xbf16>
    tpu.vector_store %arg6[%c0_7, %c0_8], %9 {strides = array<i32>} : memref<128x128xbf16, #tpu.memory_space<vmem>>, vector<128x128xbf16>,
    return
  }
  func.func @transform_0(%arg0: i32, %arg1: i32) -> (i32, i32) {
    %c0_i32 = arith.constant 0 : i32
    return %arg0, %arg1 : i32, i32
  }
  func.func @transform_1(%arg0: i32, %arg1: i32) -> (i32, i32) {
    %c0_i32 = arith.constant 0 : i32
    %c0_i32_0 = arith.constant 0 : i32
    return %arg1, %c0_i32 : i32, i32
  }
  func.func @transform_2(%arg0: i32, %arg1: i32) -> (i32, i32) {
    %c0_i32 = arith.constant 0 : i32
    %c0_i32_0 = arith.constant 0 : i32
    %c0_i32_1 = arith.constant 0 : i32
    return %c0_i32, %c0_i32_0 : i32, i32
  }
  func.func @transform_3(%arg0: i32, %arg1: i32) -> (i32, i32) {
    %c0_i32 = arith.constant 0 : i32
    %c0_i32_0 = arith.constant 0 : i32
    return %arg0, %c0_i32 : i32, i32
  }
  func.func @transform_4(%arg0: i32, %arg1: i32) -> (i32, i32) {
    %c0_i32 = arith.constant 0 : i32
    %c0_i32_0 = arith.constant 0 : i32
    return %arg0, %c0_i32 : i32, i32
  }
}

module attributes {stable_mosaic.version = 11 : i64} {
  func.func @_mm_kernel(%arg0: i32, %arg1: i32, %arg2: memref<128x128xbf16, #tpu.memory_space<vmem>>, %arg3: memref<128x128xbf16, #tpu.memory_space<vmem>>, %arg4: memref<1x128xf32, #tpu.memory_space<vmem>>, %arg5: memref<128x128xbf16, #tpu.memory_space<vmem>>, %arg6: memref<128x128xbf16, #tpu.memory_space<vmem>>) attributes {dimension_semantics = [#tpu.dimension_semantics<parallel>, #tpu.dimension_semantics<arbitrary>], iteration_bounds = array<i64: 1, 1>, scalar_prefetch = 0 : i64, scratch_operands = 0 : i64, tpu.core_type = #tpu.core_type<tc>, window_params = [{transform_indices = @transform_0, window_bounds = array<i64: 128, 128>}, {transform_indices = @transform_1, window_bounds = array<i64: 128, 128>}, {pipeline_mode = #tpu.pipeline_mode<synchronous>, transform_indices = @transform_2, window_bounds = array<i64: 1, 128>}, {transform_indices = @transform_3, window_bounds = array<i64: 128, 128>}, {transform_indices = @transform_4, window_bounds = array<i64: 128, 128>}]} {
    %c0 = arith.constant 0 : index
    %c0_0 = arith.constant 0 : index
    %0 = vector.load %arg2[%c0, %c0_0] : memref<128x128xbf16, #tpu.memory_space<vmem>>, vector<128x128xbf16>
    %c0_1 = arith.constant 0 : index
    %c0_2 = arith.constant 0 : index
    %1 = vector.load %arg3[%c0_1, %c0_2] : memref<128x128xbf16, #tpu.memory_space<vmem>>, vector<128x128xbf16>
    %cst = arith.constant dense<0.000000e+00> : vector<128x128xf32>
    %2 = tpu.matmul %0, %1, %cst {dimension_numbers = #tpu.dot_dimension_numbers<[1], [0], [0], [1], [0, 0, 1, 1], [], []>} : vector<128x128xbf16>, vector<128x128xbf16>, vector<128x128xf32> -> vector<128x128xf32>
    %c0_3 = arith.constant 0 : index
    %c0_4 = arith.constant 0 : index
    %3 = vector.load %arg4[%c0_3, %c0_4] : memref<1x128xf32, #tpu.memory_space<vmem>>, vector<1x128xf32>
    %4 = vector.broadcast %3 : vector<1x128xf32> to vector<128x128xf32>
    %5 = arith.addf %2, %4 : vector<128x128xf32>
    %c0_5 = arith.constant 0 : index
    %c0_6 = arith.constant 0 : index
    %6 = vector.load %arg5[%c0_5, %c0_6] : memref<128x128xbf16, #tpu.memory_space<vmem>>, vector<128x128xbf16>
    %7 = arith.extf %6 : vector<128x128xbf16> to vector<128x128xf32>
    %8 = arith.addf %5, %7 : vector<128x128xf32>
    %cst_7 = arith.constant 0.000000e+00 : f32
    %9 = vector.broadcast %cst_7 : f32 to vector<128x128xf32>
    %10 = arith.maximumf %8, %9 : vector<128x128xf32>
    %11 = arith.truncf %10 : vector<128x128xf32> to vector<128x128xbf16>
    %c0_8 = arith.constant 0 : index
    %c0_9 = arith.constant 0 : index
    %12 = vector.load %arg6[%c0_8, %c0_9] : memref<128x128xbf16, #tpu.memory_space<vmem>>, vector<128x128xbf16>
    tpu.vector_store %arg6[%c0_8, %c0_9], %11 {strides = array<i32>} : memref<128x128xbf16, #tpu.memory_space<vmem>>, vector<128x128xbf16>,
    return
  }
  func.func @transform_0(%arg0: i32, %arg1: i32) -> (i32, i32) {
    %c0_i32 = arith.constant 0 : i32
    return %arg0, %arg1 : i32, i32
  }
  func.func @transform_1(%arg0: i32, %arg1: i32) -> (i32, i32) {
    %c0_i32 = arith.constant 0 : i32
    %c0_i32_0 = arith.constant 0 : i32
    return %arg1, %c0_i32 : i32, i32
  }
  func.func @transform_2(%arg0: i32, %arg1: i32) -> (i32, i32) {
    %c0_i32 = arith.constant 0 : i32
    %c0_i32_0 = arith.constant 0 : i32
    %c0_i32_1 = arith.constant 0 : i32
    return %c0_i32, %c0_i32_0 : i32, i32
  }
  func.func @transform_3(%arg0: i32, %arg1: i32) -> (i32, i32) {
    %c0_i32 = arith.constant 0 : i32
    %c0_i32_0 = arith.constant 0 : i32
    return %arg0, %c0_i32 : i32, i32
  }
  func.func @transform_4(%arg0: i32, %arg1: i32) -> (i32, i32) {
    %c0_i32 = arith.constant 0 : i32
    %c0_i32_0 = arith.constant 0 : i32
    return %arg0, %c0_i32 : i32, i32
  }
}

module attributes {stable_mosaic.version = 11 : i64} {
  func.func @_mm_kernel(%arg0: i32, %arg1: i32, %arg2: memref<168x512xbf16, #tpu.memory_space<vmem>>, %arg3: memref<512x512xbf16, #tpu.memory_space<vmem>>, %arg4: memref<1x512xf32, #tpu.memory_space<vmem>>, %arg5: memref<168x512xbf16, #tpu.memory_space<vmem>>) attributes {dimension_semantics = [#tpu.dimension_semantics<parallel>, #tpu.dimension_semantics<arbitrary>], iteration_bounds = array<i64: 1, 1>, scalar_prefetch = 0 : i64, scratch_operands = 0 : i64, tpu.core_type = #tpu.core_type<tc>, window_params = [{transform_indices = @transform_0, window_bounds = array<i64: 168, 512>}, {transform_indices = @transform_1, window_bounds = array<i64: 512, 512>}, {pipeline_mode = #tpu.pipeline_mode<synchronous>, transform_indices = @transform_2, window_bounds = array<i64: 1, 512>}, {transform_indices = @transform_3, window_bounds = array<i64: 168, 512>}]} {
    %c0 = arith.constant 0 : index
    %c0_0 = arith.constant 0 : index
    %0 = vector.load %arg2[%c0, %c0_0] : memref<168x512xbf16, #tpu.memory_space<vmem>>, vector<168x512xbf16>
    %c0_1 = arith.constant 0 : index
    %c0_2 = arith.constant 0 : index
    %1 = vector.load %arg3[%c0_1, %c0_2] : memref<512x512xbf16, #tpu.memory_space<vmem>>, vector<512x512xbf16>
    %cst = arith.constant dense<0.000000e+00> : vector<168x512xf32>
    %2 = tpu.matmul %0, %1, %cst {dimension_numbers = #tpu.dot_dimension_numbers<[1], [0], [0], [1], [0, 0, 1, 1], [], []>} : vector<168x512xbf16>, vector<512x512xbf16>, vector<168x512xf32> -> vector<168x512xf32>
    %c0_3 = arith.constant 0 : index
    %c0_4 = arith.constant 0 : index
    %3 = vector.load %arg4[%c0_3, %c0_4] : memref<1x512xf32, #tpu.memory_space<vmem>>, vector<1x512xf32>
    %4 = vector.broadcast %3 : vector<1x512xf32> to vector<168x512xf32>
    %5 = arith.addf %2, %4 : vector<168x512xf32>
    %cst_5 = arith.constant 0.000000e+00 : f32
    %6 = vector.broadcast %cst_5 : f32 to vector<168x512xf32>
    %7 = arith.maximumf %5, %6 : vector<168x512xf32>
    %8 = arith.truncf %7 : vector<168x512xf32> to vector<168x512xbf16>
    %c0_6 = arith.constant 0 : index
    %c0_7 = arith.constant 0 : index
    %9 = vector.load %arg5[%c0_6, %c0_7] : memref<168x512xbf16, #tpu.memory_space<vmem>>, vector<168x512xbf16>
    tpu.vector_store %arg5[%c0_6, %c0_7], %8 {strides = array<i32>} : memref<168x512xbf16, #tpu.memory_space<vmem>>, vector<168x512xbf16>,
    return
  }
  func.func @transform_0(%arg0: i32, %arg1: i32) -> (i32, i32) {
    %c0_i32 = arith.constant 0 : i32
    return %arg0, %arg1 : i32, i32
  }
  func.func @transform_1(%arg0: i32, %arg1: i32) -> (i32, i32) {
    %c0_i32 = arith.constant 0 : i32
    %c0_i32_0 = arith.constant 0 : i32
    return %arg1, %c0_i32 : i32, i32
  }
  func.func @transform_2(%arg0: i32, %arg1: i32) -> (i32, i32) {
    %c0_i32 = arith.constant 0 : i32
    %c0_i32_0 = arith.constant 0 : i32
    %c0_i32_1 = arith.constant 0 : i32
    return %c0_i32, %c0_i32_0 : i32, i32
  }
  func.func @transform_3(%arg0: i32, %arg1: i32) -> (i32, i32) {
    %c0_i32 = arith.constant 0 : i32
    %c0_i32_0 = arith.constant 0 : i32
    return %arg0, %c0_i32 : i32, i32
  }
}

module attributes {stable_mosaic.version = 11 : i64} {
  func.func @_mm_kernel(%arg0: i32, %arg1: i32, %arg2: memref<296x512xbf16, #tpu.memory_space<vmem>>, %arg3: memref<512x512xbf16, #tpu.memory_space<vmem>>, %arg4: memref<1x512xf32, #tpu.memory_space<vmem>>, %arg5: memref<296x512xbf16, #tpu.memory_space<vmem>>) attributes {dimension_semantics = [#tpu.dimension_semantics<parallel>, #tpu.dimension_semantics<arbitrary>], iteration_bounds = array<i64: 2, 1>, scalar_prefetch = 0 : i64, scratch_operands = 0 : i64, tpu.core_type = #tpu.core_type<tc>, window_params = [{transform_indices = @transform_0, window_bounds = array<i64: 296, 512>}, {transform_indices = @transform_1, window_bounds = array<i64: 512, 512>}, {pipeline_mode = #tpu.pipeline_mode<synchronous>, transform_indices = @transform_2, window_bounds = array<i64: 1, 512>}, {transform_indices = @transform_3, window_bounds = array<i64: 296, 512>}]} {
    %c0 = arith.constant 0 : index
    %c0_0 = arith.constant 0 : index
    %0 = vector.load %arg2[%c0, %c0_0] : memref<296x512xbf16, #tpu.memory_space<vmem>>, vector<296x512xbf16>
    %c0_1 = arith.constant 0 : index
    %c0_2 = arith.constant 0 : index
    %1 = vector.load %arg3[%c0_1, %c0_2] : memref<512x512xbf16, #tpu.memory_space<vmem>>, vector<512x512xbf16>
    %cst = arith.constant dense<0.000000e+00> : vector<296x512xf32>
    %2 = tpu.matmul %0, %1, %cst {dimension_numbers = #tpu.dot_dimension_numbers<[1], [0], [0], [1], [0, 0, 1, 1], [], []>} : vector<296x512xbf16>, vector<512x512xbf16>, vector<296x512xf32> -> vector<296x512xf32>
    %c0_3 = arith.constant 0 : index
    %c0_4 = arith.constant 0 : index
    %3 = vector.load %arg4[%c0_3, %c0_4] : memref<1x512xf32, #tpu.memory_space<vmem>>, vector<1x512xf32>
    %4 = vector.broadcast %3 : vector<1x512xf32> to vector<296x512xf32>
    %5 = arith.addf %2, %4 : vector<296x512xf32>
    %cst_5 = arith.constant 0.000000e+00 : f32
    %6 = vector.broadcast %cst_5 : f32 to vector<296x512xf32>
    %7 = arith.maximumf %5, %6 : vector<296x512xf32>
    %8 = arith.truncf %7 : vector<296x512xf32> to vector<296x512xbf16>
    %c0_6 = arith.constant 0 : index
    %c0_7 = arith.constant 0 : index
    %9 = vector.load %arg5[%c0_6, %c0_7] : memref<296x512xbf16, #tpu.memory_space<vmem>>, vector<296x512xbf16>
    tpu.vector_store %arg5[%c0_6, %c0_7], %8 {strides = array<i32>} : memref<296x512xbf16, #tpu.memory_space<vmem>>, vector<296x512xbf16>,
    return
  }
  func.func @transform_0(%arg0: i32, %arg1: i32) -> (i32, i32) {
    %c0_i32 = arith.constant 0 : i32
    return %arg0, %arg1 : i32, i32
  }
  func.func @transform_1(%arg0: i32, %arg1: i32) -> (i32, i32) {
    %c0_i32 = arith.constant 0 : i32
    %c0_i32_0 = arith.constant 0 : i32
    return %arg1, %c0_i32 : i32, i32
  }
  func.func @transform_2(%arg0: i32, %arg1: i32) -> (i32, i32) {
    %c0_i32 = arith.constant 0 : i32
    %c0_i32_0 = arith.constant 0 : i32
    %c0_i32_1 = arith.constant 0 : i32
    return %c0_i32, %c0_i32_0 : i32, i32
  }
  func.func @transform_3(%arg0: i32, %arg1: i32) -> (i32, i32) {
    %c0_i32 = arith.constant 0 : i32
    %c0_i32_0 = arith.constant 0 : i32
    return %arg0, %c0_i32 : i32, i32
  }
}

module attributes {stable_mosaic.version = 11 : i64} {
  func.func @_mm_kernel(%arg0: i32, %arg1: i32, %arg2: memref<512x128xbf16, #tpu.memory_space<vmem>>, %arg3: memref<128x128xbf16, #tpu.memory_space<vmem>>, %arg4: memref<1x128xf32, #tpu.memory_space<vmem>>, %arg5: memref<512x128xf32, #tpu.memory_space<vmem>>) attributes {dimension_semantics = [#tpu.dimension_semantics<parallel>, #tpu.dimension_semantics<arbitrary>], iteration_bounds = array<i64: 4, 1>, scalar_prefetch = 0 : i64, scratch_operands = 0 : i64, tpu.core_type = #tpu.core_type<tc>, window_params = [{transform_indices = @transform_0, window_bounds = array<i64: 512, 128>}, {transform_indices = @transform_1, window_bounds = array<i64: 128, 128>}, {pipeline_mode = #tpu.pipeline_mode<synchronous>, transform_indices = @transform_2, window_bounds = array<i64: 1, 128>}, {transform_indices = @transform_3, window_bounds = array<i64: 512, 128>}]} {
    %c0 = arith.constant 0 : index
    %c0_0 = arith.constant 0 : index
    %0 = vector.load %arg2[%c0, %c0_0] : memref<512x128xbf16, #tpu.memory_space<vmem>>, vector<512x128xbf16>
    %c0_1 = arith.constant 0 : index
    %c0_2 = arith.constant 0 : index
    %1 = vector.load %arg3[%c0_1, %c0_2] : memref<128x128xbf16, #tpu.memory_space<vmem>>, vector<128x128xbf16>
    %cst = arith.constant dense<0.000000e+00> : vector<512x128xf32>
    %2 = tpu.matmul %0, %1, %cst {dimension_numbers = #tpu.dot_dimension_numbers<[1], [0], [0], [1], [0, 0, 1, 1], [], []>} : vector<512x128xbf16>, vector<128x128xbf16>, vector<512x128xf32> -> vector<512x128xf32>
    %c0_3 = arith.constant 0 : index
    %c0_4 = arith.constant 0 : index
    %3 = vector.load %arg4[%c0_3, %c0_4] : memref<1x128xf32, #tpu.memory_space<vmem>>, vector<1x128xf32>
    %4 = vector.broadcast %3 : vector<1x128xf32> to vector<512x128xf32>
    %5 = arith.addf %2, %4 : vector<512x128xf32>
    %c0_5 = arith.constant 0 : index
    %c0_6 = arith.constant 0 : index
    %6 = vector.load %arg5[%c0_5, %c0_6] : memref<512x128xf32, #tpu.memory_space<vmem>>, vector<512x128xf32>
    tpu.vector_store %arg5[%c0_5, %c0_6], %5 {strides = array<i32>} : memref<512x128xf32, #tpu.memory_space<vmem>>, vector<512x128xf32>,
    return
  }
  func.func @transform_0(%arg0: i32, %arg1: i32) -> (i32, i32) {
    %c0_i32 = arith.constant 0 : i32
    return %arg0, %arg1 : i32, i32
  }
  func.func @transform_1(%arg0: i32, %arg1: i32) -> (i32, i32) {
    %c0_i32 = arith.constant 0 : i32
    %c0_i32_0 = arith.constant 0 : i32
    return %arg1, %c0_i32 : i32, i32
  }
  func.func @transform_2(%arg0: i32, %arg1: i32) -> (i32, i32) {
    %c0_i32 = arith.constant 0 : i32
    %c0_i32_0 = arith.constant 0 : i32
    %c0_i32_1 = arith.constant 0 : i32
    return %c0_i32, %c0_i32_0 : i32, i32
  }
  func.func @transform_3(%arg0: i32, %arg1: i32) -> (i32, i32) {
    %c0_i32 = arith.constant 0 : i32
    %c0_i32_0 = arith.constant 0 : i32
    return %arg0, %c0_i32 : i32, i32
  }
}

</mosaic_0001>

<bundles_post_ra>
// kernel: fc_decoder_forward.8
= control target key start
LH: loop header
LB: loop body
LE: loop exit
PB: predicated region body
PF: predicated region fallthrough
CT: control target
= control target key end

     0   :  { %s618_s1 = inlined_call_operand.vmem [shape: bf16[128,128], index: 1, kind: input, shape index: {}]   ;;  %s619_s0 = inlined_call_operand.vmem [shape: bf16[128,128], index: 0, kind: input, shape index: {}]   ;;  %s620_s2 = inlined_call_operand.vmem [shape: f32[1,128], index: 2, kind: input, shape index: {}]   ;;  %s621_s3 = inlined_call_operand.vmem [shape: bf16[128,128], index: 3, kind: output, shape index: {}]  }
   0x1   :  { %v507_v0 = vld [vmem:[%s618_s1 + $0x38] sm:$0xff]   ;;  %v508_v1 = vld [vmem:[%s618_s1 + $0x30] sm:$0xff]   ;;  %v509_v2 = vld [vmem:[%s618_s1 + $0x28] sm:$0xff]  }
   0x2   :  { %459 = vmatprep.subr.bf16.mxu0 %v507_v0  ;;  %491 = vmatprep.subr.bf16.mxu1 %v507_v0  ;;  %v510_v3 = vld [vmem:[%s618_s1 + $0x20] sm:$0xff]   ;;  %v511_v6 = vld [vmem:[%s618_s1 + $0x18] sm:$0xff]   ;;  %v512_v7 = vld [vmem:[%s618_s1 + $0x10] sm:$0xff]  }
   0x3   :  { %460 = vmatpush3.bf16.msra.mxu0 %v507_v0  ;;  %499 = vmatpush3.bf16.msra.mxu1 %v507_v0  ;;  %v515_v4 = vld [vmem:[%s619_s0] sm:$0xff]   ;;  %v513_v8 = vld [vmem:[%s618_s1 + $0x8] sm:$0xff]   ;;  %v519_v12 = vld [vmem:[%s619_s0 + $0x10] sm:$0xff]  }
   0x4   :  { %461 = vmatprep.subr.bf16.mxu0 %v508_v1  ;;  %492 = vmatprep.subr.bf16.mxu1 %v508_v1  ;;  %v516_v5 = vld [vmem:[%s619_s0 + $0x20] sm:$0xff]   ;;  %v517_v10 = vld [vmem:[%s619_s0 + $0x8] sm:$0xff]   ;;  %v520_v13 = vld [vmem:[%s619_s0 + $0x30] sm:$0xff]  }
   0x5   :  { %475 = vmatprep.mubr.bf16.mxu0 %v515_v4  ;;  %483 = vmatprep.mubr.bf16.mxu1 %v516_v5  ;;  %v514_v9 = vld [vmem:[%s618_s1] sm:$0xff]   ;;  %v518_v11 = vld [vmem:[%s619_s0 + $0x28] sm:$0xff]   ;;  %v521_v14 = vld [vmem:[%s619_s0 + $0x18] sm:$0xff]  }
   0x6   :  { %v522_v15 = vld [vmem:[%s619_s0 + $0x38] sm:$0xff]   ;;  %v347_v16 = vld [vmem:[%s620_s2] ss:$0 sm:$0xff] }
   0x7   :  { %462 = vmatpush3.bf16.msra.mxu0 %v508_v1  ;;  %500 = vmatpush3.bf16.msra.mxu1 %v508_v1 }
   0x8   :  { %463 = vmatprep.subr.bf16.mxu0 %v509_v2  ;;  %493 = vmatprep.subr.bf16.mxu1 %v509_v2 }
   0xb   :  { %464 = vmatpush3.bf16.msra.mxu0 %v509_v2  ;;  %501 = vmatpush3.bf16.msra.mxu1 %v509_v2 }
   0xc   :  { %465 = vmatprep.subr.bf16.mxu0 %v510_v3  ;;  %494 = vmatprep.subr.bf16.mxu1 %v510_v3 }
   0xf   :  { %466 = vmatpush3.bf16.msra.mxu0 %v510_v3  ;;  %502 = vmatpush3.bf16.msra.mxu1 %v510_v3 }
  0x10   :  { %467 = vmatprep.subr.bf16.mxu0 %v511_v6  ;;  %495 = vmatprep.subr.bf16.mxu1 %v511_v6 }
  0x13   :  { %468 = vmatpush3.bf16.msra.mxu0 %v511_v6  ;;  %503 = vmatpush3.bf16.msra.mxu1 %v511_v6 }
  0x14   :  { %469 = vmatprep.subr.bf16.mxu0 %v512_v7  ;;  %496 = vmatprep.subr.bf16.mxu1 %v512_v7 }
  0x17   :  { %470 = vmatpush3.bf16.msra.mxu0 %v512_v7  ;;  %504 = vmatpush3.bf16.msra.mxu1 %v512_v7 }
  0x18   :  { %471 = vmatprep.subr.bf16.mxu0 %v513_v8  ;;  %497 = vmatprep.subr.bf16.mxu1 %v513_v8 }
  0x1b   :  { %472 = vmatpush3.bf16.msra.mxu0 %v513_v8  ;;  %505 = vmatpush3.bf16.msra.mxu1 %v513_v8 }
  0x1c   :  { %473 = vmatprep.subr.bf16.mxu0 %v514_v9  ;;  %498 = vmatprep.subr.bf16.mxu1 %v514_v9 }
  0x1f   :  { %474 = vmatpush3.bf16.msra.mxu0 %v514_v9  ;;  %506 = vmatpush3.bf16.msra.mxu1 %v514_v9 }
  0x22   :  { %476 = vmatmul.mubr.bf16.vlgmr.msra.gmra.mxu0 %v517_v10  ;;  %484 = vmatmul.mubr.bf16.vlgmr.msra.gmra.mxu1 %v518_v11 }
  0x23   :  { %479 = vmatprep.mubr.bf16.mxu0 %v519_v12  ;;  %487 = vmatprep.mubr.bf16.mxu1 %v520_v13 }
  0x2a   :  { %480 = vmatmul.mubr.bf16.gmra.mxu0 %v521_v14  ;;  %488 = vmatmul.mubr.bf16.gmra.mxu1 %v522_v15 }
  0xe2   :  { %v477_v17 = vpop.f32.mrf.mxu0  ;;  %v485_v18 = vpop.f32.mrf.mxu1 }
  0xe3   :  { %v193_v19 = vadd.f32 %v477_v17, %v347_v16  ;;  %v225_v20 = vadd.f32 %v485_v18, %v347_v16 }
  0xe4   :  { %v184_v21 = vpop.f32.mrf.mxu0  ;;  %v216_v22 = vpop.f32.mrf.mxu1 }
  0xe5   :  { %v185_v23 = vadd.f32 %v347_v16, %v184_v21  ;;  %v217_v24 = vadd.f32 %v347_v16, %v216_v22  ;;  %v249_v29 = vmax.f32 %v193_v19, 0.0  ;;  %v257_v30 = vmax.f32 %v225_v20, 0.0 }
  0xe6   :  { %v478_v25 = vpop.f32.mrf.mxu0  ;;  %v486_v26 = vpop.f32.mrf.mxu1 }
  0xe7   :  { %v196_v27 = vadd.f32 %v478_v25, %v347_v16  ;;  %v228_v28 = vadd.f32 %v486_v26, %v347_v16  ;;  %v247_v37 = vmax.f32 %v185_v23, 0.0  ;;  %v255_v38 = vmax.f32 %v217_v24, 0.0 }
  0xe8   :  { %v187_v31 = vpop.f32.mrf.mxu0  ;;  %v219_v32 = vpop.f32.mrf.mxu1 }
  0xe9   :  { %v250_v33 = vmax.f32 %v196_v27, 0.0  ;;  %v258_v34 = vmax.f32 %v228_v28, 0.0  ;;  %v188_v35 = vadd.f32 %v347_v16, %v187_v31  ;;  %v220_v36 = vadd.f32 %v347_v16, %v219_v32 }
  0xea   :  { %v481_v39 = vpop.f32.mrf.mxu0  ;;  %v489_v40 = vpop.f32.mrf.mxu1 }
  0xeb   :  { %v404_v41 = vpack.c.bf16 %v250_v33, %v249_v29  ;;  %v424_v42 = vpack.c.bf16 %v258_v34, %v257_v30  ;;  %v248_v43 = vmax.f32 %v188_v35, 0.0  ;;  %v256_v44 = vmax.f32 %v220_v36, 0.0 }
  0xec   :  { %v209_v45 = vadd.f32 %v481_v39, %v347_v16  ;;  %v241_v46 = vadd.f32 %v489_v40, %v347_v16  ;;  %v200_v47 = vpop.f32.mrf.mxu0  ;;  %v232_v48 = vpop.f32.mrf.mxu1 }
  0xed   :  { %436 = vst [vmem:[%s621_s3 + $0x8] sm:$0xff] %v404_v41   ;;  %440 = vst [vmem:[%s621_s3 + $0x28] sm:$0xff] %v424_v42   ;;  %v399_v49 = vpack.c.bf16 %v248_v43, %v247_v37  ;;  %v419_v50 = vpack.c.bf16 %v256_v44, %v255_v38  ;;  %v201_v51 = vadd.f32 %v347_v16, %v200_v47 }
  0xee   :  { %v233_v52 = vadd.f32 %v347_v16, %v232_v48  ;;  %v482_v53 = vpop.f32.mrf.mxu0  ;;  %v490_v54 = vpop.f32.mrf.mxu1  ;;  %v253_v57 = vmax.f32 %v209_v45, 0.0  ;;  %v261_v58 = vmax.f32 %v241_v46, 0.0 }
  0xef   :  { %400 = vst [vmem:[%s621_s3] sm:$0xff] %v399_v49   ;;  %439 = vst [vmem:[%s621_s3 + $0x20] sm:$0xff] %v419_v50   ;;  %v212_v55 = vadd.f32 %v482_v53, %v347_v16  ;;  %v244_v56 = vadd.f32 %v490_v54, %v347_v16  ;;  %v251_v1 = vmax.f32 %v201_v51, 0.0 }
  0xf0   :  { %v203_v59 = vpop.f32.mrf.mxu0  ;;  %v235_v60 = vpop.f32.mrf.mxu1  ;;  %v259_v2 = vmax.f32 %v233_v52, 0.0 }
  0xf1   :  { %v254_v61 = vmax.f32 %v212_v55, 0.0  ;;  %v262_v62 = vmax.f32 %v244_v56, 0.0  ;;  %v204_v63 = vadd.f32 %v347_v16, %v203_v59  ;;  %v236_v0 = vadd.f32 %v347_v16, %v235_v60 }
  0xf3   :  { %v414_v3 = vpack.c.bf16 %v254_v61, %v253_v57  ;;  %v434_v4 = vpack.c.bf16 %v262_v62, %v261_v58  ;;  %v252_v5 = vmax.f32 %v204_v63, 0.0  ;;  %v260_v6 = vmax.f32 %v236_v0, 0.0 }
  0xf5   :  { %438 = vst [vmem:[%s621_s3 + $0x18] sm:$0xff] %v414_v3   ;;  %442 = vst [vmem:[%s621_s3 + $0x38] sm:$0xff] %v434_v4   ;;  %v409_v7 = vpack.c.bf16 %v252_v5, %v251_v1  ;;  %v429_v8 = vpack.c.bf16 %v260_v6, %v259_v2 }
  0xf7   :  { %437 = vst [vmem:[%s621_s3 + $0x10] sm:$0xff] %v409_v7   ;;  %441 = vst [vmem:[%s621_s3 + $0x30] sm:$0xff] %v429_v8  }

// kernel: fc_decoder_forward.12
= control target key start
LH: loop header
LB: loop body
LE: loop exit
PB: predicated region body
PF: predicated region fallthrough
CT: control target
= control target key end

     0   :  { %s739_s1 = inlined_call_operand.vmem [shape: bf16[128,128], index: 1, kind: input, shape index: {}]   ;;  %s740_s0 = inlined_call_operand.vmem [shape: bf16[128,128], index: 0, kind: input, shape index: {}]   ;;  %s741_s2 = inlined_call_operand.vmem [shape: f32[1,128], index: 2, kind: input, shape index: {}]   ;;  %s742_s3 = inlined_call_operand.vmem [shape: bf16[128,128], index: 3, kind: input, shape index: {}]   ;;  %s743_s4 = inlined_call_operand.vmem [shape: bf16[128,128], index: 4, kind: output, shape index: {}]  }
   0x1   :  { %v581_v0 = vld [vmem:[%s739_s1 + $0x38] sm:$0xff]   ;;  %v582_v1 = vld [vmem:[%s739_s1 + $0x30] sm:$0xff]   ;;  %v583_v2 = vld [vmem:[%s739_s1 + $0x28] sm:$0xff]  }
   0x2   :  { %533 = vmatprep.subr.bf16.mxu0 %v581_v0  ;;  %565 = vmatprep.subr.bf16.mxu1 %v581_v0  ;;  %v584_v3 = vld [vmem:[%s739_s1 + $0x20] sm:$0xff]   ;;  %v585_v6 = vld [vmem:[%s739_s1 + $0x18] sm:$0xff]   ;;  %v586_v7 = vld [vmem:[%s739_s1 + $0x10] sm:$0xff]  }
   0x3   :  { %534 = vmatpush3.bf16.msra.mxu0 %v581_v0  ;;  %573 = vmatpush3.bf16.msra.mxu1 %v581_v0  ;;  %v589_v4 = vld [vmem:[%s740_s0] sm:$0xff]   ;;  %v587_v8 = vld [vmem:[%s739_s1 + $0x8] sm:$0xff]   ;;  %v593_v12 = vld [vmem:[%s740_s0 + $0x10] sm:$0xff]  }
   0x4   :  { %535 = vmatprep.subr.bf16.mxu0 %v582_v1  ;;  %566 = vmatprep.subr.bf16.mxu1 %v582_v1  ;;  %v590_v5 = vld [vmem:[%s740_s0 + $0x20] sm:$0xff]   ;;  %v591_v10 = vld [vmem:[%s740_s0 + $0x8] sm:$0xff]   ;;  %v594_v13 = vld [vmem:[%s740_s0 + $0x30] sm:$0xff]  }
   0x5   :  { %549 = vmatprep.mubr.bf16.mxu0 %v589_v4  ;;  %557 = vmatprep.mubr.bf16.mxu1 %v590_v5  ;;  %v588_v9 = vld [vmem:[%s739_s1] sm:$0xff]   ;;  %v592_v11 = vld [vmem:[%s740_s0 + $0x28] sm:$0xff]   ;;  %v595_v14 = vld [vmem:[%s740_s0 + $0x18] sm:$0xff]  }
   0x6   :  { %v596_v15 = vld [vmem:[%s740_s0 + $0x38] sm:$0xff]   ;;  %v673_v16 = vld [vmem:[%s741_s2] ss:$0 sm:$0xff]  ;;  %v503_v17 = vld [vmem:[%s742_s3 + $0x8] sm:$0xff]  }
   0x7   :  { %536 = vmatpush3.bf16.msra.mxu0 %v582_v1  ;;  %574 = vmatpush3.bf16.msra.mxu1 %v582_v1  ;;  %v507_v18 = vld [vmem:[%s742_s3 + $0x28] sm:$0xff]   ;;  %v432_v21 = vld [vmem:[%s742_s3] sm:$0xff]   ;;  %v437_v24 = vunpack.c.l.bf16 %v503_v17  ;;  %v438_v29 = vunpack.c.h.bf16 %v503_v17  ;;  %v505_v49 = vld [vmem:[%s742_s3 + $0x18] sm:$0xff]  }
   0x8   :  { %537 = vmatprep.subr.bf16.mxu0 %v583_v2  ;;  %567 = vmatprep.subr.bf16.mxu1 %v583_v2  ;;  %v506_v22 = vld [vmem:[%s742_s3 + $0x20] sm:$0xff]   ;;  %v453_v26 = vunpack.c.l.bf16 %v507_v18  ;;  %v454_v30 = vunpack.c.h.bf16 %v507_v18  ;;  %v433_v32 = vunpack.c.l.bf16 %v432_v21  ;;  %v434_v39 = vunpack.c.h.bf16 %v432_v21  ;;  %v509_v50 = vld [vmem:[%s742_s3 + $0x38] sm:$0xff]   ;;  %v504_v59 = vld [vmem:[%s742_s3 + $0x10] sm:$0xff]  }
   0x9   :  { %v449_v34 = vunpack.c.l.bf16 %v506_v22  ;;  %v450_v40 = vunpack.c.h.bf16 %v506_v22  ;;  %v508_v60 = vld [vmem:[%s742_s3 + $0x30] sm:$0xff]   ;;  %v445_v62 = vunpack.c.l.bf16 %v505_v49  ;;  %v461_v0 = vunpack.c.l.bf16 %v509_v50 }
   0xa   :  { %v446_v5 = vunpack.c.h.bf16 %v505_v49  ;;  %v458_v17 = vunpack.c.h.bf16 %v508_v60 }
   0xb   :  { %538 = vmatpush3.bf16.msra.mxu0 %v583_v2  ;;  %575 = vmatpush3.bf16.msra.mxu1 %v583_v2 }
   0xc   :  { %539 = vmatprep.subr.bf16.mxu0 %v584_v3  ;;  %568 = vmatprep.subr.bf16.mxu1 %v584_v3 }
   0xf   :  { %540 = vmatpush3.bf16.msra.mxu0 %v584_v3  ;;  %576 = vmatpush3.bf16.msra.mxu1 %v584_v3 }
  0x10   :  { %541 = vmatprep.subr.bf16.mxu0 %v585_v6  ;;  %569 = vmatprep.subr.bf16.mxu1 %v585_v6 }
  0x13   :  { %542 = vmatpush3.bf16.msra.mxu0 %v585_v6  ;;  %577 = vmatpush3.bf16.msra.mxu1 %v585_v6  ;;  %v462_v6 = vunpack.c.h.bf16 %v509_v50 }
  0x14   :  { %543 = vmatprep.subr.bf16.mxu0 %v586_v7  ;;  %570 = vmatprep.subr.bf16.mxu1 %v586_v7 }
  0x17   :  { %544 = vmatpush3.bf16.msra.mxu0 %v586_v7  ;;  %578 = vmatpush3.bf16.msra.mxu1 %v586_v7 }
  0x18   :  { %545 = vmatprep.subr.bf16.mxu0 %v587_v8  ;;  %571 = vmatprep.subr.bf16.mxu1 %v587_v8 }
  0x1b   :  { %546 = vmatpush3.bf16.msra.mxu0 %v587_v8  ;;  %579 = vmatpush3.bf16.msra.mxu1 %v587_v8  ;;  %v441_v8 = vunpack.c.l.bf16 %v504_v59 }
  0x1c   :  { %547 = vmatprep.subr.bf16.mxu0 %v588_v9  ;;  %572 = vmatprep.subr.bf16.mxu1 %v588_v9 }
  0x1f   :  { %548 = vmatpush3.bf16.msra.mxu0 %v588_v9  ;;  %580 = vmatpush3.bf16.msra.mxu1 %v588_v9 }
  0x22   :  { %550 = vmatmul.mubr.bf16.vlgmr.msra.gmra.mxu0 %v591_v10  ;;  %558 = vmatmul.mubr.bf16.vlgmr.msra.gmra.mxu1 %v592_v11  ;;  %v457_v10 = vunpack.c.l.bf16 %v508_v60 }
  0x23   :  { %553 = vmatprep.mubr.bf16.mxu0 %v593_v12  ;;  %561 = vmatprep.mubr.bf16.mxu1 %v594_v13 }
  0x2a   :  { %554 = vmatmul.mubr.bf16.gmra.mxu0 %v595_v14  ;;  %562 = vmatmul.mubr.bf16.gmra.mxu1 %v596_v15  ;;  %v442_v15 = vunpack.c.h.bf16 %v504_v59 }
  0xe2   :  { %v551_v19 = vpop.f32.mrf.mxu0  ;;  %v559_v20 = vpop.f32.mrf.mxu1 }
  0xe3   :  { %v196_v23 = vadd.f32 %v551_v19, %v673_v16  ;;  %v228_v25 = vadd.f32 %v559_v20, %v673_v16 }
  0xe4   :  { %v187_v27 = vpop.f32.mrf.mxu0  ;;  %v219_v28 = vpop.f32.mrf.mxu1 }
  0xe5   :  { %v188_v31 = vadd.f32 %v673_v16, %v187_v27  ;;  %v220_v33 = vadd.f32 %v673_v16, %v219_v28  ;;  %v284_v41 = vadd.f32 %v437_v24, %v196_v23  ;;  %v292_v42 = vadd.f32 %v453_v26, %v228_v25 }
  0xe6   :  { %v552_v35 = vpop.f32.mrf.mxu0  ;;  %v560_v36 = vpop.f32.mrf.mxu1 }
  0xe7   :  { %v199_v37 = vadd.f32 %v552_v35, %v673_v16  ;;  %v231_v38 = vadd.f32 %v560_v36, %v673_v16  ;;  %v282_v51 = vadd.f32 %v433_v32, %v188_v31  ;;  %v290_v52 = vadd.f32 %v449_v34, %v220_v33 }
  0xe8   :  { %v190_v43 = vpop.f32.mrf.mxu0  ;;  %v222_v44 = vpop.f32.mrf.mxu1 }
  0xe9   :  { %v285_v45 = vadd.f32 %v438_v29, %v199_v37  ;;  %v293_v46 = vadd.f32 %v454_v30, %v231_v38  ;;  %v191_v47 = vadd.f32 %v673_v16, %v190_v43  ;;  %v223_v48 = vadd.f32 %v673_v16, %v222_v44 }
  0xea   :  { %v555_v53 = vpop.f32.mrf.mxu0  ;;  %v563_v54 = vpop.f32.mrf.mxu1 }
  0xeb   :  { %v471_v55 = vpack.c.bf16 %v285_v45, %v284_v41  ;;  %v491_v56 = vpack.c.bf16 %v293_v46, %v292_v42  ;;  %v283_v57 = vadd.f32 %v434_v39, %v191_v47  ;;  %v291_v58 = vadd.f32 %v450_v40, %v223_v48 }
  0xec   :  { %v212_v61 = vadd.f32 %v555_v53, %v673_v16  ;;  %v244_v63 = vadd.f32 %v563_v54, %v673_v16  ;;  %v203_v1 = vpop.f32.mrf.mxu0  ;;  %v235_v2 = vpop.f32.mrf.mxu1 }
  0xed   :  { %510 = vst [vmem:[%s743_s4 + $0x8] sm:$0xff] %v471_v55   ;;  %514 = vst [vmem:[%s743_s4 + $0x28] sm:$0xff] %v491_v56   ;;  %v466_v3 = vpack.c.bf16 %v283_v57, %v282_v51  ;;  %v486_v4 = vpack.c.bf16 %v291_v58, %v290_v52  ;;  %v204_v7 = vadd.f32 %v673_v16, %v203_v1 }
  0xee   :  { %v236_v9 = vadd.f32 %v673_v16, %v235_v2  ;;  %v556_v11 = vpop.f32.mrf.mxu0  ;;  %v564_v12 = vpop.f32.mrf.mxu1  ;;  %v288_v18 = vadd.f32 %v445_v62, %v212_v61  ;;  %v296_v19 = vadd.f32 %v461_v0, %v244_v63 }
  0xef   :  { %467 = vst [vmem:[%s743_s4] sm:$0xff] %v466_v3   ;;  %513 = vst [vmem:[%s743_s4 + $0x20] sm:$0xff] %v486_v4   ;;  %v215_v13 = vadd.f32 %v556_v11, %v673_v16  ;;  %v247_v14 = vadd.f32 %v564_v12, %v673_v16  ;;  %v286_v26 = vadd.f32 %v441_v8, %v204_v7 }
  0xf0   :  { %v206_v20 = vpop.f32.mrf.mxu0  ;;  %v238_v21 = vpop.f32.mrf.mxu1  ;;  %v294_v27 = vadd.f32 %v457_v10, %v236_v9 }
  0xf1   :  { %v289_v22 = vadd.f32 %v446_v5, %v215_v13  ;;  %v297_v23 = vadd.f32 %v462_v6, %v247_v14  ;;  %v207_v24 = vadd.f32 %v673_v16, %v206_v20  ;;  %v239_v25 = vadd.f32 %v673_v16, %v238_v21 }
  0xf3   :  { %v481_v28 = vpack.c.bf16 %v289_v22, %v288_v18  ;;  %v501_v29 = vpack.c.bf16 %v297_v23, %v296_v19  ;;  %v287_v30 = vadd.f32 %v442_v15, %v207_v24  ;;  %v295_v31 = vadd.f32 %v458_v17, %v239_v25 }
  0xf5   :  { %512 = vst [vmem:[%s743_s4 + $0x18] sm:$0xff] %v481_v28   ;;  %516 = vst [vmem:[%s743_s4 + $0x38] sm:$0xff] %v501_v29   ;;  %v476_v32 = vpack.c.bf16 %v287_v30, %v286_v26  ;;  %v496_v33 = vpack.c.bf16 %v295_v31, %v294_v27 }
  0xf7   :  { %511 = vst [vmem:[%s743_s4 + $0x10] sm:$0xff] %v476_v32   ;;  %515 = vst [vmem:[%s743_s4 + $0x30] sm:$0xff] %v496_v33  }

// kernel: fc_decoder_forward.9
= control target key start
LH: loop header
LB: loop body
LE: loop exit
PB: predicated region body
PF: predicated region fallthrough
CT: control target
= control target key end

     0   :  { %s1591_s12 = smov 0   ;;  %s1593_s13 = smov 0   ;;  %s1805_s0 = inlined_call_operand.vmem [shape: bf16[128,1152], index: 0, kind: input, shape index: {}]   ;;  %s1806_s1 = inlined_call_operand.vmem [shape: bf16[1152,128], index: 1, kind: input, shape index: {}]   ;;  %s1807_s2 = inlined_call_operand.vmem [shape: f32[1,128], index: 2, kind: input, shape index: {}]   ;;  %s1808_s3 = inlined_call_operand.vmem [shape: bf16[128,128], index: 3, kind: output, shape index: {}]  }
   0x1   :  { %s1595_s14 = smov 0   ;;  %s1597_s15 = smov 0  }
   0x2   :  { %s1599_s16 = smov 0  }
   0x3 LB: > { %s22_s17 = sadd.s32 1, %s1564_s15  ;;  %p41_p1 = scmp.ne.s32.totalorder %s1556_s13, %s1552_s12  ;;  %s1568_s16 = sphi %s1599_s16, %s13_s16   ;;  %s1564_s15 = sphi %s1597_s15, %s1812_s15   ;;  %s1560_s14 = sphi %s1595_s14, %s1811_s14   ;;  %s1556_s13 = sphi %s1593_s13, %s1810_s13   ;;  %s1552_s12 = sphi %s1591_s12, %s1809_s12  }
   0x4   : > { %p23_p0 = scmp.ge.s32.totalorder %s22_s17, 3  ;;  %p42_p2 = scmp.eq.s32.totalorder %s1568_s16, 0 }
   0x5   : > { %s34_s19 = sadd.s32 1, %s1556_s13  ;;  %p1148_p5 = scmp.ge.s32.totalorder %s1568_s16, 3 }
   0x6   : > { %s1814_s17 = smov (%p23_p0, %s22_s17), 0  ;;  %p43_p3 = por %p42_p2, %p41_p1 }
   0x7   : > { %s30_s18 = ssub.s32 %s1564_s15, %s1814_s17  ;;  %143 = sbr.rel (%p1148_p5) target bundleno = 35 (0x23), region = 20 }
   0x8   : > { %p32_p4 = scmp.eq.s32.totalorder %s30_s18, 0 }
   0xa   : > { %s1626_s20 = scalar_select %p32_p4, %s1556_s13, %s34_s19  }
   0xc   : > { %146 = sbr.rel (!%p43_p3) target bundleno = 35 (0x23), region = 24  ;;  %s148_s21 = sand.u32 (%p43_p3), 1, %s1556_s13  }
   0xd   : > { %s1255_s22 = smul.u32 (%p43_p3), 12, %s1564_s15 }
   0xe   : > { %s1431_s23 = smul.u32 (%p43_p3), 192, %s148_s21 }
   0xf   : > { %s1634_s26 = scalar_lea.vmem (%p43_p3), %s1805_s0, %s1255_s22 }
  0x10   : > { %v171_v0 = vld [vmem:[%s1634_s26] sm:$0xff] (%p43_p3)  ;;  %v175_v2 = vld [vmem:[%s1634_s26 + $0x48] sm:$0xff] (%p43_p3)  ;;  %s1639_s27 = scalar_lea.vmem (%p43_p3), [#allocation3], %s1431_s23  ;;  %v179_v4 = vld [vmem:[%s1634_s26 + $0x90] sm:$0xff] (%p43_p3) }
  0x11   : > { %v173_v1 = vld [vmem:[%s1634_s26 + $0x24] sm:$0xff]  ;;  %172 = vst [vmem:[%s1639_s27] sm:$0xff] %v171_v0  ;;  %176 = vst [vmem:[%s1639_s27 + $0x18] sm:$0xff] %v175_v2  ;;  %v177_v3 = vld [vmem:[%s1634_s26 + $0x6c] sm:$0xff] }
  0x12   : > { %174 = vst [vmem:[%s1639_s27 + $0xc] sm:$0xff] %v173_v1  ;;  %v181_v5 = vld [vmem:[%s1634_s26 + $0xb4] sm:$0xff]  ;;  %178 = vst [vmem:[%s1639_s27 + $0x24] sm:$0xff] %v177_v3  ;;  %v185_v7 = vld [vmem:[%s1634_s26 + $0xfc] sm:$0xff] }
  0x13   : > { %180 = vst [vmem:[%s1639_s27 + $0x30] sm:$0xff] %v179_v4  ;;  %182 = vst [vmem:[%s1639_s27 + $0x3c] sm:$0xff] %v181_v5  ;;  %v183_v6 = vld [vmem:[%s1634_s26 + $0xd8] sm:$0xff]  ;;  %v187_v8 = vld [vmem:[%s1634_s26 + $0x120] sm:$0xff] }
  0x14   : > { %184 = vst [vmem:[%s1639_s27 + $0x48] sm:$0xff] %v183_v6  ;;  %186 = vst [vmem:[%s1639_s27 + $0x54] sm:$0xff] %v185_v7  ;;  %v189_v9 = vld [vmem:[%s1634_s26 + $0x144] sm:$0xff]  ;;  %v193_v11 = vld [vmem:[%s1634_s26 + $0x18c] sm:$0xff] }
  0x15   : > { %188 = vst [vmem:[%s1639_s27 + $0x60] sm:$0xff] %v187_v8  ;;  %v191_v10 = vld [vmem:[%s1634_s26 + $0x168] sm:$0xff]  ;;  %190 = vst [vmem:[%s1639_s27 + $0x6c] sm:$0xff] %v189_v9  ;;  %v195_v12 = vld [vmem:[%s1634_s26 + $0x1b0] sm:$0xff] }
  0x16   : > { %192 = vst [vmem:[%s1639_s27 + $0x78] sm:$0xff] %v191_v10  ;;  %194 = vst [vmem:[%s1639_s27 + $0x84] sm:$0xff] %v193_v11  ;;  %v197_v13 = vld [vmem:[%s1634_s26 + $0x1d4] sm:$0xff]  ;;  %v201_v15 = vld [vmem:[%s1634_s26 + $0x21c] sm:$0xff] }
  0x17   : > { %v199_v14 = vld [vmem:[%s1634_s26 + $0x1f8] sm:$0xff]  ;;  %196 = vst [vmem:[%s1639_s27 + $0x90] sm:$0xff] %v195_v12  ;;  %198 = vst [vmem:[%s1639_s27 + $0x9c] sm:$0xff] %v197_v13  ;;  %v1150_v16 = vld [vmem:[%s1634_s26 + $0x8] sm:$0xf] }
  0x18   : > { %200 = vst [vmem:[%s1639_s27 + $0xa8] sm:$0xff] %v199_v14  ;;  %v1152_v17 = vld [vmem:[%s1634_s26 + $0x2c] sm:$0xf]  ;;  %202 = vst [vmem:[%s1639_s27 + $0xb4] sm:$0xff] %v201_v15  ;;  %v1154_v18 = vld [vmem:[%s1634_s26 + $0x50] sm:$0xf] }
  0x19   : > { %1151 = vst [vmem:[%s1639_s27 + $0x8] sm:$0xf] %v1150_v16  ;;  %1153 = vst [vmem:[%s1639_s27 + $0x14] sm:$0xf] %v1152_v17  ;;  %v1156_v19 = vld [vmem:[%s1634_s26 + $0x74] sm:$0xf] }
  0x1a   : > { %v1158_v20 = vld [vmem:[%s1634_s26 + $0x98] sm:$0xf]  ;;  %1155 = vst [vmem:[%s1639_s27 + $0x20] sm:$0xf] %v1154_v18  ;;  %1157 = vst [vmem:[%s1639_s27 + $0x2c] sm:$0xf] %v1156_v19 }
  0x1b   : > { %1159 = vst [vmem:[%s1639_s27 + $0x38] sm:$0xf] %v1158_v20  ;;  %v1160_v21 = vld [vmem:[%s1634_s26 + $0xbc] sm:$0xf]  ;;  %v1162_v22 = vld [vmem:[%s1634_s26 + $0xe0] sm:$0xf] }
  0x1c   : > { %v1164_v23 = vld [vmem:[%s1634_s26 + $0x104] sm:$0xf]  ;;  %1161 = vst [vmem:[%s1639_s27 + $0x44] sm:$0xf] %v1160_v21  ;;  %1163 = vst [vmem:[%s1639_s27 + $0x50] sm:$0xf] %v1162_v22 }
  0x1d   : > { %1165 = vst [vmem:[%s1639_s27 + $0x5c] sm:$0xf] %v1164_v23  ;;  %v1166_v24 = vld [vmem:[%s1634_s26 + $0x128] sm:$0xf]  ;;  %v1168_v25 = vld [vmem:[%s1634_s26 + $0x14c] sm:$0xf] }
  0x1e   : > { %v1170_v26 = vld [vmem:[%s1634_s26 + $0x170] sm:$0xf]  ;;  %1167 = vst [vmem:[%s1639_s27 + $0x68] sm:$0xf] %v1166_v24  ;;  %1169 = vst [vmem:[%s1639_s27 + $0x74] sm:$0xf] %v1168_v25 }
  0x1f   : > { %1171 = vst [vmem:[%s1639_s27 + $0x80] sm:$0xf] %v1170_v26  ;;  %v1172_v27 = vld [vmem:[%s1634_s26 + $0x194] sm:$0xf]  ;;  %v1174_v28 = vld [vmem:[%s1634_s26 + $0x1b8] sm:$0xf] }
  0x20   : > { %v1176_v29 = vld [vmem:[%s1634_s26 + $0x1dc] sm:$0xf]  ;;  %1173 = vst [vmem:[%s1639_s27 + $0x8c] sm:$0xf] %v1172_v27  ;;  %1175 = vst [vmem:[%s1639_s27 + $0x98] sm:$0xf] %v1174_v28 }
  0x21   : > { %1177 = vst [vmem:[%s1639_s27 + $0xa4] sm:$0xf] %v1176_v29  ;;  %v1178_v30 = vld [vmem:[%s1634_s26 + $0x200] sm:$0xf]  ;;  %v1180_v31 = vld [vmem:[%s1634_s26 + $0x224] sm:$0xf] }
  0x22   : > { %1179 = vst [vmem:[%s1639_s27 + $0xb0] sm:$0xf] %v1178_v30  ;;  %1181 = vst [vmem:[%s1639_s27 + $0xbc] sm:$0xf] %v1180_v31 }
  0x23 PF: > { %p1182_p6 = scmp.ge.s32.totalorder %s1568_s16, 1  ;;  %p256_p7 = scmp.lt.s32.totalorder %s1568_s16, 4 }
  0x25   : > { %p257_p8 = pnand %p1182_p6, %p256_p7 }
  0x26   : > { %s263_s28 = sand.u32 (!%p257_p8), 1, %s1552_s12   ;;  %s293_s29 = smul.u32 (!%p257_p8), 48, %s1560_s14 }
  0x27   : > { %260 = sbr.rel (%p257_p8) target bundleno = 369 (0x171), region = 54  ;;  %p1184_p10 = scmp.ne.s32.totalorder (!%p257_p8), %s1560_s14, 0 }
  0x28   : > { %s1432_s30 = smul.u32 (!%p257_p8), 192, %s263_s28  ;;  %p294_p9 = scmp.lt.s32.totalorder (!%p257_p8), %s293_s29, 143 }
  0x2a   : > { %s1711_s8 = scalar_lea.vmem (!%p257_p8), [#allocation3], %s1432_s30 }
  0x2c   : > { %s1816_s29 = smov (!%p294_p9, %s293_s29), 143  ;;  %309 = sbr.rel (%p1184_p10) target bundleno = 58 (0x3a), region = 62 }
  0x2d   : > { %s1183_s4 = sshll.u32 %s1816_s29, 2 }
  0x2e   : > { %s1709_s7 = scalar_lea.vmem %s1806_s1, %s1183_s4 }
  0x31   : > { %v1570_v32 = vmov 0.0  }
  0x32   : > { %310 = vst [vmem:[#allocation2 + $0x30] sm:$0xff] %v1570_v32  ;;  %311 = vst [vmem:[#allocation2] sm:$0xff] %v1570_v32 }
  0x33   : > { %312 = vst [vmem:[#allocation2 + $0x58] sm:$0xff] %v1570_v32  ;;  %313 = vst [vmem:[#allocation2 + $0x18] sm:$0xff] %v1570_v32 }
  0x34   : > { %314 = vst [vmem:[#allocation2 + $0x50] sm:$0xff] %v1570_v32  ;;  %315 = vst [vmem:[#allocation2 + $0x68] sm:$0xff] %v1570_v32 }
  0x35   : > { %316 = vst [vmem:[#allocation2 + $0x8] sm:$0xff] %v1570_v32  ;;  %317 = vst [vmem:[#allocation2 + $0x48] sm:$0xff] %v1570_v32 }
  0x36   : > { %318 = vst [vmem:[#allocation2 + $0x40] sm:$0xff] %v1570_v32  ;;  %319 = vst [vmem:[#allocation2 + $0x20] sm:$0xff] %v1570_v32 }
  0x37   : > { %320 = vst [vmem:[#allocation2 + $0x10] sm:$0xff] %v1570_v32  ;;  %321 = vst [vmem:[#allocation2 + $0x38] sm:$0xff] %v1570_v32 }
  0x38   : > { %322 = vst [vmem:[#allocation2 + $0x60] sm:$0xff] %v1570_v32  ;;  %323 = vst [vmem:[#allocation2 + $0x70] sm:$0xff] %v1570_v32 }
  0x39   : > { %324 = vst [vmem:[#allocation2 + $0x78] sm:$0xff] %v1570_v32  ;;  %325 = vst [vmem:[#allocation2 + $0x28] sm:$0xff] %v1570_v32 }
  0x3a PF: > { %v1474_v33 = vld [vmem:[%s1709_s7 + $0x78] sm:$0xff]   ;;  %v1477_v36 = vld [vmem:[%s1709_s7 + $0x70] sm:$0xff]   ;;  %v1480_v39 = vld [vmem:[%s1709_s7 + $0x68] sm:$0xff]   ;;  %p1233_p11 = scmp.ne.s32.totalorder %s1560_s14, 2 }
  0x3b   : > { %v1475_v34 = vld [vmem:[%s1709_s7 + $0x38] sm:$0xff]   ;;  %1319 = vmatprep.subr.bf16.mxu0 %v1474_v33  ;;  %v1478_v37 = vld [vmem:[%s1709_s7 + $0x30] sm:$0xff]   ;;  %v1481_v40 = vld [vmem:[%s1709_s7 + $0x28] sm:$0xff]  }
  0x3c   : > { %v1476_v35 = vld [vmem:[%s1709_s7 + $0xb8] sm:$0xff]   ;;  %1320 = vmatpush3.bf16.msra.mxu0 %v1475_v34  ;;  %v1479_v38 = vld [vmem:[%s1709_s7 + $0xb0] sm:$0xff]   ;;  %v1482_v41 = vld [vmem:[%s1709_s7 + $0xa8] sm:$0xff]  }
  0x3d   : > { %1399 = vmatprep.subr.bf16.mxu1 %v1476_v35  ;;  %1321 = vmatprep.subr.bf16.mxu0 %v1477_v36  ;;  %v1483_v42 = vld [vmem:[%s1709_s7 + $0x60] sm:$0xff]   ;;  %v1486_v45 = vld [vmem:[%s1709_s7 + $0x58] sm:$0xff]   ;;  %v1489_v48 = vld [vmem:[%s1709_s7 + $0x50] sm:$0xff]  }
  0x3e   : > { %1400 = vmatpush3.bf16.msra.mxu1 %v1476_v35  ;;  %v1484_v43 = vld [vmem:[%s1709_s7 + $0x20] sm:$0xff]   ;;  %v1488_v46 = vld [vmem:[%s1709_s7 + $0x98] sm:$0xff]   ;;  %v1491_v49 = vld [vmem:[%s1709_s7 + $0x90] sm:$0xff]  }
  0x3f   : > { %1401 = vmatprep.subr.bf16.mxu1 %v1479_v38  ;;  %v1485_v44 = vld [vmem:[%s1709_s7 + $0xa0] sm:$0xff]   ;;  %v1487_v47 = vld [vmem:[%s1709_s7 + $0x18] sm:$0xff]   ;;  %v1490_v50 = vld [vmem:[%s1709_s7 + $0x10] sm:$0xff]  }
  0x40   : > { %1322 = vmatpush3.bf16.msra.mxu0 %v1478_v37  ;;  %v1492_v51 = vld [vmem:[%s1709_s7 + $0x48] sm:$0xff]   ;;  %v1495_v54 = vld [vmem:[%s1709_s7 + $0x40] sm:$0xff]   ;;  %v1510_v1 = vld [vmem:[%s1711_s8 + $0x50] ss:$12 sps:$4 sm:$0xff]  }
  0x41   : > { %1323 = vmatprep.subr.bf16.mxu0 %v1480_v39  ;;  %v1493_v52 = vld [vmem:[%s1709_s7 + $0x8] sm:$0xff]   ;;  %v1497_v55 = vld [vmem:[%s1709_s7 + $0x80] sm:$0xff]   ;;  %v1508_v3 = vld [vmem:[%s1711_s8 + $0x30] ss:$12 sps:$4 sm:$0xff]  }
  0x42   : > { %1402 = vmatpush3.bf16.msra.mxu1 %v1479_v38  ;;  %v1494_v53 = vld [vmem:[%s1709_s7 + $0x88] sm:$0xff]   ;;  %v1500_v56 = vld [vmem:[%s1711_s8 + $0x4] ss:$12 sps:$4 sm:$0xff]   ;;  %v1506_v0 = vld [vmem:[%s1711_s8 + $0x34] ss:$12 sps:$4 sm:$0xff]  }
  0x43   : > { %1403 = vmatprep.subr.bf16.mxu1 %v1482_v41  ;;  %v1501_v57 = vld [vmem:[%s1711_s8 + $0x8] ss:$12 sps:$4 sm:$0xff]   ;;  %v1496_v58 = vld [vmem:[%s1709_s7] sm:$0xff]   ;;  %726 = vmatprep.mubr.bf16.mxu0 %v1500_v56  ;;  %v1511_v4 = vld [vmem:[%s1711_s8 + $0x4c] ss:$12 sps:$4 sm:$0xff]  }
  0x44   : > { %1324 = vmatpush3.bf16.msra.mxu0 %v1481_v40  ;;  %1415 = vmatprep.mubr.bf16.mxu1 %v1501_v57  ;;  %v1498_v59 = vld [vmem:[%s1711_s8] ss:$12 sps:$4 sm:$0xff]   ;;  %v1503_v60 = vld [vmem:[%s1711_s8 + $0x1c] ss:$12 sps:$4 sm:$0xff]   ;;  %v1509_v62 = vld [vmem:[%s1711_s8 + $0x38] ss:$12 sps:$4 sm:$0xff]  }
  0x45   : > { %1325 = vmatprep.subr.bf16.mxu0 %v1483_v42  ;;  %v1502_v61 = vld [vmem:[%s1711_s8 + $0x20] ss:$12 sps:$4 sm:$0xff]   ;;  %v1505_v63 = vld [vmem:[%s1711_s8 + $0x18] ss:$12 sps:$4 sm:$0xff]   ;;  %v1517_v2 = vld [vmem:[%s1711_s8 + $0x68] ss:$12 sps:$4 sm:$0xff]  }
  0x46   : > { %1404 = vmatpush3.bf16.msra.mxu1 %v1482_v41  ;;  %v1518_v5 = vld [vmem:[%s1711_s8 + $0x80] ss:$12 sps:$4 sm:$0xff]   ;;  %v1525_v6 = vld [vmem:[%s1711_s8 + $0x98] ss:$12 sps:$4 sm:$0xff]   ;;  %v1513_v7 = vld [vmem:[%s1711_s8 + $0x48] ss:$12 sps:$4 sm:$0xff]  }
  0x47   : > { %1405 = vmatprep.subr.bf16.mxu1 %v1485_v44  ;;  %v1514_v8 = vld [vmem:[%s1711_s8 + $0x64] ss:$12 sps:$4 sm:$0xff]   ;;  %v1516_v10 = vld [vmem:[%s1711_s8 + $0x60] ss:$12 sps:$4 sm:$0xff]   ;;  %v1519_v11 = vld [vmem:[%s1711_s8 + $0x7c] ss:$12 sps:$4 sm:$0xff]  }
  0x48   : > { %1326 = vmatpush3.bf16.msra.mxu0 %v1484_v43  ;;  %v1526_v9 = vld [vmem:[%s1711_s8 + $0xb0] ss:$12 sps:$4 sm:$0xff]   ;;  %v1521_v12 = vld [vmem:[%s1711_s8 + $0x78] ss:$12 sps:$4 sm:$0xff]   ;;  %v1522_v13 = vld [vmem:[%s1711_s8 + $0x94] ss:$12 sps:$4 sm:$0xff]  }
  0x49   : > { %1327 = vmatprep.subr.bf16.mxu0 %v1486_v45  ;;  %v1524_v14 = vld [vmem:[%s1711_s8 + $0x90] ss:$12 sps:$4 sm:$0xff]   ;;  %v1527_v15 = vld [vmem:[%s1711_s8 + $0xac] ss:$12 sps:$4 sm:$0xff]   ;;  %v1529_v16 = vld [vmem:[%s1711_s8 + $0xa8] ss:$12 sps:$4 sm:$0xff]  }
  0x4a   : > { %1406 = vmatpush3.bf16.msra.mxu1 %v1485_v44  ;;  %v326_v22 = vld [vmem:[#allocation2 + $0x30] sm:$0xff]  ;;  %v327_v30 = vld [vmem:[#allocation2] sm:$0xff]  ;;  %v328_v37 = vld [vmem:[#allocation2 + $0x58] sm:$0xff] }
  0x4b   : > { %1407 = vmatprep.subr.bf16.mxu1 %v1488_v46  ;;  %v329_v44 = vld [vmem:[#allocation2 + $0x18] sm:$0xff] }
  0x4c   : > { %1328 = vmatpush3.bf16.msra.mxu0 %v1487_v47 }
  0x4d   : > { %1329 = vmatprep.subr.bf16.mxu0 %v1489_v48 }
  0x4e   : > { %1408 = vmatpush3.bf16.msra.mxu1 %v1488_v46 }
  0x4f   : > { %1409 = vmatprep.subr.bf16.mxu1 %v1491_v49 }
  0x50   : > { %1330 = vmatpush3.bf16.msra.mxu0 %v1490_v50 }
  0x51   : > { %1331 = vmatprep.subr.bf16.mxu0 %v1492_v51 }
  0x52   : > { %1410 = vmatpush3.bf16.msra.mxu1 %v1491_v49 }
  0x53   : > { %1411 = vmatprep.subr.bf16.mxu1 %v1494_v53 }
  0x54   : > { %1332 = vmatpush3.bf16.msra.mxu0 %v1493_v52  ;;  %v330_v52 = vld [vmem:[#allocation2 + $0x50] sm:$0xff] }
  0x55   : > { %1333 = vmatprep.subr.bf16.mxu0 %v1495_v54 }
  0x56   : > { %1412 = vmatpush3.bf16.msra.mxu1 %v1494_v53 }
  0x57   : > { %1413 = vmatprep.subr.bf16.mxu1 %v1497_v55 }
  0x58   : > { %1334 = vmatpush3.bf16.msra.mxu0 %v1496_v58 }
  0x5a   : > { %1414 = vmatpush3.bf16.msra.mxu1 %v1497_v55 }
  0x5b   : > { %727 = vmatmul.mubr.bf16.vlgmr.msra.gmra.mxu0 %v1498_v59  ;;  %v331_v59 = vld [vmem:[#allocation2 + $0x68] sm:$0xff] }
  0x5c   : > { %734 = vmatprep.mubr.bf16.mxu0 %v1503_v60 }
  0x5d   : > { %1416 = vmatmul.mubr.bf16.vlgmr.msra.gmra.mxu1 %v1502_v61 }
  0x5e   : > { %1419 = vmatprep.mubr.bf16.mxu1 %v1509_v62 }
  0x63   : > { %735 = vmatmul.mubr.bf16.gmra.mxu0 %v1505_v63 }
  0x64   : > { %742 = vmatprep.mubr.bf16.mxu0 %v1506_v0 }
  0x65   : > { %1420 = vmatmul.mubr.bf16.gmra.mxu1 %v1510_v1  ;;  %v332_v1 = vld [vmem:[#allocation2 + $0x8] sm:$0xff] }
  0x66   : > { %1423 = vmatprep.mubr.bf16.mxu1 %v1517_v2 }
  0x6b   : > { %743 = vmatmul.mubr.bf16.gmra.mxu0 %v1508_v3 }
  0x6c   : > { %750 = vmatprep.mubr.bf16.mxu0 %v1511_v4 }
  0x6d   : > { %1424 = vmatmul.mubr.bf16.gmra.mxu1 %v1518_v5 }
  0x6e   : > { %1427 = vmatprep.mubr.bf16.mxu1 %v1525_v6 }
  0x73   : > { %751 = vmatmul.mubr.bf16.gmra.mxu0 %v1513_v7 }
  0x74   : > { %758 = vmatprep.mubr.bf16.mxu0 %v1514_v8  ;;  %v333_v8 = vld [vmem:[#allocation2 + $0x48] sm:$0xff] }
  0x75   : > { %1428 = vmatmul.mubr.bf16.gmra.mxu1 %v1526_v9 }
  0x7b   : > { %759 = vmatmul.mubr.bf16.gmra.mxu0 %v1516_v10 }
  0x7c   : > { %766 = vmatprep.mubr.bf16.mxu0 %v1519_v11 }
  0x83   : > { %767 = vmatmul.mubr.bf16.gmra.mxu0 %v1521_v12 }
  0x84   : > { %774 = vmatprep.mubr.bf16.mxu0 %v1522_v13 }
  0x8b   : > { %775 = vmatmul.mubr.bf16.gmra.mxu0 %v1524_v14 }
  0x8c   : > { %782 = vmatprep.mubr.bf16.mxu0 %v1527_v15 }
  0x93   : > { %783 = vmatmul.mubr.bf16.gmra.mxu0 %v1529_v16  ;;  %v334_v16 = vld [vmem:[#allocation2 + $0x40] sm:$0xff] }
 0x11b   : > { %v1335_v17 = vpop.f32.mrf.mxu0 }
 0x11d   : > { %v1336_v18 = vpop.f32.mrf.mxu0  ;;  %v1417_v19 = vpop.f32.mrf.mxu1 }
 0x11e   : > { %v1337_v20 = vadd.f32 %v1336_v18, %v1335_v17 }
 0x11f   : > { %v1338_v21 = vpop.f32.mrf.mxu0  ;;  %v825_v23 = vpop.f32.mrf.mxu1 }
 0x120   : > { %v826_v24 = vadd.f32 %v1337_v20, %v825_v23  ;;  %v335_v23 = vld [vmem:[#allocation2 + $0x20] sm:$0xff] }
 0x121   : > { %v1339_v25 = vpop.f32.mrf.mxu0  ;;  %v1418_v26 = vpop.f32.mrf.mxu1 }
 0x122   : > { %v888_v27 = vadd.f32 %v826_v24, %v326_v22  ;;  %v1340_v28 = vadd.f32 %v1339_v25, %v1338_v21 }
 0x123   : > { %v1341_v29 = vpop.f32.mrf.mxu0  ;;  %v828_v31 = vpop.f32.mrf.mxu1 }
 0x124   : > { %904 = vst [vmem:[#allocation2 + $0x30] sm:$0xff] %v888_v27  ;;  %v829_v32 = vadd.f32 %v1340_v28, %v828_v31 }
 0x125   : > { %v1342_v33 = vpop.f32.mrf.mxu0  ;;  %v1421_v34 = vpop.f32.mrf.mxu1 }
 0x126   : > { %v889_v35 = vadd.f32 %v829_v32, %v327_v30  ;;  %v1343_v36 = vadd.f32 %v1342_v33, %v1341_v29  ;;  %v336_v29 = vld [vmem:[#allocation2 + $0x10] sm:$0xff] }
 0x127   : > { %v1344_v38 = vpop.f32.mrf.mxu0  ;;  %v841_v41 = vpop.f32.mrf.mxu1 }
 0x128   : > { %905 = vst [vmem:[#allocation2] sm:$0xff] %v889_v35  ;;  %v834_v39 = vadd.f32 %v1417_v19, %v1343_v36  ;;  %v337_v36 = vld [vmem:[#allocation2 + $0x38] sm:$0xff] }
 0x129   : > { %v1345_v40 = vpop.f32.mrf.mxu0  ;;  %v1422_v48 = vpop.f32.mrf.mxu1 }
 0x12a   : > { %v890_v42 = vadd.f32 %v834_v39, %v328_v37  ;;  %v1346_v43 = vadd.f32 %v1345_v40, %v1344_v38 }
 0x12b   : > { %v1347_v45 = vpop.f32.mrf.mxu0  ;;  %v844_v55 = vpop.f32.mrf.mxu1 }
 0x12c   : > { %906 = vst [vmem:[#allocation2 + $0x58] sm:$0xff] %v890_v42  ;;  %v837_v46 = vadd.f32 %v1418_v26, %v1346_v43 }
 0x12d   : > { %v1348_v47 = vpop.f32.mrf.mxu0  ;;  %v1425_v62 = vpop.f32.mrf.mxu1 }
 0x12e   : > { %v891_v49 = vadd.f32 %v837_v46, %v329_v44  ;;  %v1349_v50 = vadd.f32 %v1348_v47, %v1347_v45  ;;  %v338_v44 = vld [vmem:[#allocation2 + $0x60] sm:$0xff] }
 0x12f   : > { %v1350_v51 = vpop.f32.mrf.mxu0  ;;  %v857_v5 = vpop.f32.mrf.mxu1 }
 0x130   : > { %907 = vst [vmem:[#allocation2 + $0x18] sm:$0xff] %v891_v49  ;;  %v842_v53 = vadd.f32 %v1349_v50, %v841_v41 }
 0x131   : > { %v1351_v54 = vpop.f32.mrf.mxu0  ;;  %v1426_v12 = vpop.f32.mrf.mxu1 }
 0x132   : > { %v892_v56 = vadd.f32 %v842_v53, %v330_v52  ;;  %v1352_v57 = vadd.f32 %v1351_v54, %v1350_v51  ;;  %v339_v51 = vld [vmem:[#allocation2 + $0x70] sm:$0xff] }
 0x133   : > { %v1353_v58 = vpop.f32.mrf.mxu0  ;;  %v860_v19 = vpop.f32.mrf.mxu1 }
 0x134   : > { %908 = vst [vmem:[#allocation2 + $0x50] sm:$0xff] %v892_v56  ;;  %v845_v60 = vadd.f32 %v1352_v57, %v844_v55  ;;  %v340_v56 = vld [vmem:[#allocation2 + $0x78] sm:$0xff] }
 0x135   : > { %v1354_v61 = vpop.f32.mrf.mxu0  ;;  %v1429_v26 = vpop.f32.mrf.mxu1 }
 0x136   : > { %v893_v63 = vadd.f32 %v845_v60, %v331_v59  ;;  %v1355_v0 = vadd.f32 %v1354_v61, %v1353_v58 }
 0x137   : > { %v1356_v2 = vpop.f32.mrf.mxu0  ;;  %v873_v33 = vpop.f32.mrf.mxu1 }
 0x138   : > { %909 = vst [vmem:[#allocation2 + $0x68] sm:$0xff] %v893_v63  ;;  %v850_v3 = vadd.f32 %v1421_v34, %v1355_v0 }
 0x139   : > { %v1357_v4 = vpop.f32.mrf.mxu0  ;;  %v1430_v40 = vpop.f32.mrf.mxu1 }
 0x13a   : > { %v894_v6 = vadd.f32 %v850_v3, %v332_v1  ;;  %v1358_v7 = vadd.f32 %v1357_v4, %v1356_v2 }
 0x13b   : > { %v1359_v9 = vpop.f32.mrf.mxu0  ;;  %v876_v47 = vpop.f32.mrf.mxu1 }
 0x13c   : > { %910 = vst [vmem:[#allocation2 + $0x8] sm:$0xff] %v894_v6  ;;  %v853_v10 = vadd.f32 %v1422_v48, %v1358_v7 }
 0x13d   : > { %v1360_v11 = vpop.f32.mrf.mxu0 }
 0x13e   : > { %v895_v13 = vadd.f32 %v853_v10, %v333_v8  ;;  %v1361_v14 = vadd.f32 %v1360_v11, %v1359_v9 }
 0x13f   : > { %v1362_v15 = vpop.f32.mrf.mxu0 }
 0x140   : > { %911 = vst [vmem:[#allocation2 + $0x48] sm:$0xff] %v895_v13  ;;  %v858_v17 = vadd.f32 %v1361_v14, %v857_v5 }
 0x141   : > { %v1363_v18 = vpop.f32.mrf.mxu0 }
 0x142   : > { %v896_v20 = vadd.f32 %v858_v17, %v334_v16  ;;  %v1364_v21 = vadd.f32 %v1363_v18, %v1362_v15 }
 0x143   : > { %v1365_v22 = vpop.f32.mrf.mxu0 }
 0x144   : > { %912 = vst [vmem:[#allocation2 + $0x40] sm:$0xff] %v896_v20  ;;  %v861_v24 = vadd.f32 %v1364_v21, %v860_v19 }
 0x145   : > { %v1366_v25 = vpop.f32.mrf.mxu0 }
 0x146   : > { %v897_v27 = vadd.f32 %v861_v24, %v335_v23  ;;  %v1367_v28 = vadd.f32 %v1366_v25, %v1365_v22 }
 0x147   : > { %v1368_v30 = vpop.f32.mrf.mxu0 }
 0x148   : > { %913 = vst [vmem:[#allocation2 + $0x20] sm:$0xff] %v897_v27  ;;  %v866_v31 = vadd.f32 %v1425_v62, %v1367_v28  ;;  %v341_v62 = vld [vmem:[#allocation2 + $0x28] sm:$0xff] }
 0x149   : > { %v1369_v32 = vpop.f32.mrf.mxu0 }
 0x14a   : > { %v898_v34 = vadd.f32 %v866_v31, %v336_v29  ;;  %v1370_v35 = vadd.f32 %v1369_v32, %v1368_v30 }
 0x14b   : > { %v1371_v37 = vpop.f32.mrf.mxu0 }
 0x14c   : > { %914 = vst [vmem:[#allocation2 + $0x10] sm:$0xff] %v898_v34  ;;  %v869_v38 = vadd.f32 %v1426_v12, %v1370_v35 }
 0x14d   : > { %v1372_v39 = vpop.f32.mrf.mxu0 }
 0x14e   : > { %v899_v41 = vadd.f32 %v869_v38, %v337_v36  ;;  %v1373_v42 = vadd.f32 %v1372_v39, %v1371_v37 }
 0x14f   : > { %v1374_v43 = vpop.f32.mrf.mxu0 }
 0x150   : > { %915 = vst [vmem:[#allocation2 + $0x38] sm:$0xff] %v899_v41  ;;  %v874_v45 = vadd.f32 %v1373_v42, %v873_v33 }
 0x151   : > { %v1375_v46 = vpop.f32.mrf.mxu0 }
 0x152   : > { %v900_v48 = vadd.f32 %v874_v45, %v338_v44  ;;  %v1376_v49 = vadd.f32 %v1375_v46, %v1374_v43 }
 0x153   : > { %v1377_v50 = vpop.f32.mrf.mxu0 }
 0x154   : > { %916 = vst [vmem:[#allocation2 + $0x60] sm:$0xff] %v900_v48  ;;  %v877_v52 = vadd.f32 %v1376_v49, %v876_v47 }
 0x155   : > { %v1378_v53 = vpop.f32.mrf.mxu0 }
 0x156   : > { %v901_v54 = vadd.f32 %v877_v52, %v339_v51  ;;  %v1379_v55 = vadd.f32 %v1378_v53, %v1377_v50 }
 0x157   : > { %v1380_v57 = vpop.f32.mrf.mxu0 }
 0x158   : > { %917 = vst [vmem:[#allocation2 + $0x70] sm:$0xff] %v901_v54  ;;  %v882_v58 = vadd.f32 %v1429_v26, %v1379_v55 }
 0x159   : > { %v1381_v59 = vpop.f32.mrf.mxu0 }
 0x15a   : > { %v902_v60 = vadd.f32 %v882_v58, %v340_v56  ;;  %v1382_v61 = vadd.f32 %v1381_v59, %v1380_v57 }
 0x15c   : > { %918 = vst [vmem:[#allocation2 + $0x78] sm:$0xff] %v902_v60  ;;  %v885_v63 = vadd.f32 %v1430_v40, %v1382_v61  ;;  %923 = sbr.rel (%p1233_p11) target bundleno = 369 (0x171), region = 66 }
 0x15e   : > { %v903_v0 = vadd.f32 %v885_v63, %v341_v62 }
 0x160   : > { %919 = vst [vmem:[#allocation2 + $0x28] sm:$0xff] %v903_v0 }
 0x161   : > { %v924_v1 = vld [vmem:[#allocation2 + $0x30] sm:$0xff]  ;;  %v925_v2 = vld [vmem:[#allocation2] sm:$0xff]  ;;  %v926_v6 = vld [vmem:[#allocation2 + $0x58] sm:$0xff] }
 0x162   : > { %v1234_v3 = vld [vmem:[%s1807_s2] ss:$0 sm:$0xff]  ;;  %v927_v7 = vld [vmem:[#allocation2 + $0x18] sm:$0xff]  ;;  %v928_v8 = vld [vmem:[#allocation2 + $0x50] sm:$0xff] }
 0x163   : > { %v947_v4 = vadd.f32 %v1234_v3, %v924_v1  ;;  %v948_v5 = vadd.f32 %v1234_v3, %v925_v2  ;;  %v949_v9 = vadd.f32 %v1234_v3, %v926_v6  ;;  %v950_v10 = vadd.f32 %v1234_v3, %v927_v7  ;;  %v929_v11 = vld [vmem:[#allocation2 + $0x68] sm:$0xff]  ;;  %v932_v19 = vld [vmem:[#allocation2 + $0x40] sm:$0xff]  ;;  %v934_v21 = vld [vmem:[#allocation2 + $0x10] sm:$0xff] }
 0x164   : > { %v951_v12 = vadd.f32 %v1234_v3, %v928_v8  ;;  %v930_v13 = vld [vmem:[#allocation2 + $0x8] sm:$0xff]  ;;  %v952_v17 = vadd.f32 %v1234_v3, %v929_v11  ;;  %v933_v20 = vld [vmem:[#allocation2 + $0x20] sm:$0xff]  ;;  %v935_v26 = vld [vmem:[#allocation2 + $0x38] sm:$0xff]  ;;  %v955_v31 = vadd.f32 %v1234_v3, %v932_v19  ;;  %v957_v36 = vadd.f32 %v1234_v3, %v934_v21 }
 0x165   : > { %v931_v14 = vld [vmem:[#allocation2 + $0x48] sm:$0xff]  ;;  %v963_v15 = vmax.f32 %v947_v4, 0.0  ;;  %v964_v16 = vmax.f32 %v948_v5, 0.0  ;;  %v953_v18 = vadd.f32 %v1234_v3, %v930_v13  ;;  %v965_v22 = vmax.f32 %v949_v9, 0.0  ;;  %v936_v27 = vld [vmem:[#allocation2 + $0x60] sm:$0xff]  ;;  %v937_v32 = vld [vmem:[#allocation2 + $0x70] sm:$0xff] }
 0x166   : > { %v966_v23 = vmax.f32 %v950_v10, 0.0  ;;  %v967_v24 = vmax.f32 %v951_v12, 0.0  ;;  %v954_v25 = vadd.f32 %v1234_v3, %v931_v14  ;;  %v968_v29 = vmax.f32 %v952_v17, 0.0  ;;  %v938_v37 = vld [vmem:[#allocation2 + $0x78] sm:$0xff] }
 0x167   : > { %v1275_v28 = vpack.c.bf16 %v964_v16, %v963_v15  ;;  %v969_v30 = vmax.f32 %v953_v18, 0.0  ;;  %v956_v35 = vadd.f32 %v1234_v3, %v933_v20  ;;  %v939_v38 = vld [vmem:[#allocation2 + $0x28] sm:$0xff]  ;;  %v971_v40 = vmax.f32 %v955_v31, 0.0 }
 0x168   : > { %v1280_v33 = vpack.c.bf16 %v966_v23, %v965_v22  ;;  %v970_v34 = vmax.f32 %v954_v25, 0.0  ;;  %v1285_v39 = vpack.c.bf16 %v968_v29, %v967_v24  ;;  %v958_v41 = vadd.f32 %v1234_v3, %v935_v26 }
 0x169   : > { %1276 = vst [vmem:[%s1808_s3] sm:$0xff] %v1275_v28   ;;  %v959_v42 = vadd.f32 %v1234_v3, %v936_v27  ;;  %v972_v44 = vmax.f32 %v956_v35, 0.0  ;;  %v973_v45 = vmax.f32 %v957_v36, 0.0  ;;  %v960_v46 = vadd.f32 %v1234_v3, %v937_v32 }
 0x16a   : > { %1312 = vst [vmem:[%s1808_s3 + $0x8] sm:$0xff] %v1280_v33   ;;  %v1290_v43 = vpack.c.bf16 %v970_v34, %v969_v30  ;;  %1313 = vst [vmem:[%s1808_s3 + $0x10] sm:$0xff] %v1285_v39   ;;  %v974_v47 = vmax.f32 %v958_v41, 0.0  ;;  %v961_v49 = vadd.f32 %v1234_v3, %v938_v37  ;;  %v962_v50 = vadd.f32 %v1234_v3, %v939_v38 }
 0x16b   : > { %v975_v48 = vmax.f32 %v959_v42, 0.0  ;;  %v1295_v51 = vpack.c.bf16 %v972_v44, %v971_v40  ;;  %v976_v52 = vmax.f32 %v960_v46, 0.0 }
 0x16c   : > { %1314 = vst [vmem:[%s1808_s3 + $0x18] sm:$0xff] %v1290_v43   ;;  %v1300_v53 = vpack.c.bf16 %v974_v47, %v973_v45  ;;  %v977_v54 = vmax.f32 %v961_v49, 0.0  ;;  %v978_v55 = vmax.f32 %v962_v50, 0.0 }
 0x16d   : > { %1315 = vst [vmem:[%s1808_s3 + $0x20] sm:$0xff] %v1295_v51   ;;  %v1305_v56 = vpack.c.bf16 %v976_v52, %v975_v48 }
 0x16e   : > { %1316 = vst [vmem:[%s1808_s3 + $0x28] sm:$0xff] %v1300_v53   ;;  %v1310_v57 = vpack.c.bf16 %v978_v55, %v977_v54 }
 0x16f   : > { %1317 = vst [vmem:[%s1808_s3 + $0x30] sm:$0xff] %v1305_v56  }
 0x170   : > { %1318 = vst [vmem:[%s1808_s3 + $0x38] sm:$0xff] %v1310_v57  }
 0x171 PF: > { %s13_s16 = sadd.s32 1, %s1568_s16   ;;  %s1809_s12 = smov %s1556_s13 }
 0x172   : > { %p10_p12 = scmp.ge.s32.totalorder %s13_s16, 5   ;;  %s1810_s13 = smov %s1626_s20 }
 0x173   : > { %s1811_s14 = smov %s1564_s15  ;;  %s1812_s15 = smov %s1814_s17 }
 0x174   :  { %12 = sbr.rel (!%p10_p12) target bundleno = 3 (0x3), region = 110 }

// kernel: fc_decoder_forward.10
= control target key start
LH: loop header
LB: loop body
LE: loop exit
PB: predicated region body
PF: predicated region fallthrough
CT: control target
= control target key end

     0   :  { %s771_s1 = inlined_call_operand.vmem [shape: bf16[128,128], index: 1, kind: input, shape index: {}]   ;;  %s772_s0 = inlined_call_operand.vmem [shape: bf16[128,128], index: 0, kind: input, shape index: {}]   ;;  %s773_s2 = inlined_call_operand.vmem [shape: f32[1,128], index: 2, kind: input, shape index: {}]   ;;  %s774_s3 = inlined_call_operand.vmem [shape: bf16[128,128], index: 3, kind: input, shape index: {}]   ;;  %s775_s4 = inlined_call_operand.vmem [shape: bf16[128,128], index: 4, kind: output, shape index: {}]  }
   0x1   :  { %v597_v0 = vld [vmem:[%s771_s1 + $0x38] sm:$0xff]   ;;  %v598_v1 = vld [vmem:[%s771_s1 + $0x30] sm:$0xff]   ;;  %v599_v2 = vld [vmem:[%s771_s1 + $0x28] sm:$0xff]  }
   0x2   :  { %549 = vmatprep.subr.bf16.mxu0 %v597_v0  ;;  %581 = vmatprep.subr.bf16.mxu1 %v597_v0  ;;  %v600_v3 = vld [vmem:[%s771_s1 + $0x20] sm:$0xff]   ;;  %v601_v6 = vld [vmem:[%s771_s1 + $0x18] sm:$0xff]   ;;  %v602_v7 = vld [vmem:[%s771_s1 + $0x10] sm:$0xff]  }
   0x3   :  { %550 = vmatpush3.bf16.msra.mxu0 %v597_v0  ;;  %589 = vmatpush3.bf16.msra.mxu1 %v597_v0  ;;  %v605_v4 = vld [vmem:[%s772_s0] sm:$0xff]   ;;  %v603_v8 = vld [vmem:[%s771_s1 + $0x8] sm:$0xff]   ;;  %v609_v12 = vld [vmem:[%s772_s0 + $0x10] sm:$0xff]  }
   0x4   :  { %551 = vmatprep.subr.bf16.mxu0 %v598_v1  ;;  %582 = vmatprep.subr.bf16.mxu1 %v598_v1  ;;  %v606_v5 = vld [vmem:[%s772_s0 + $0x20] sm:$0xff]   ;;  %v607_v10 = vld [vmem:[%s772_s0 + $0x8] sm:$0xff]   ;;  %v610_v13 = vld [vmem:[%s772_s0 + $0x30] sm:$0xff]  }
   0x5   :  { %565 = vmatprep.mubr.bf16.mxu0 %v605_v4  ;;  %573 = vmatprep.mubr.bf16.mxu1 %v606_v5  ;;  %v604_v9 = vld [vmem:[%s771_s1] sm:$0xff]   ;;  %v608_v11 = vld [vmem:[%s772_s0 + $0x28] sm:$0xff]   ;;  %v611_v14 = vld [vmem:[%s772_s0 + $0x18] sm:$0xff]  }
   0x6   :  { %v612_v15 = vld [vmem:[%s772_s0 + $0x38] sm:$0xff]   ;;  %v689_v16 = vld [vmem:[%s773_s2] ss:$0 sm:$0xff]  ;;  %v519_v17 = vld [vmem:[%s774_s3 + $0x8] sm:$0xff]  }
   0x7   :  { %552 = vmatpush3.bf16.msra.mxu0 %v598_v1  ;;  %590 = vmatpush3.bf16.msra.mxu1 %v598_v1  ;;  %v523_v18 = vld [vmem:[%s774_s3 + $0x28] sm:$0xff]   ;;  %v448_v21 = vld [vmem:[%s774_s3] sm:$0xff]   ;;  %v453_v24 = vunpack.c.l.bf16 %v519_v17  ;;  %v708_v29 = vld [vmem:[%s774_s3 + $0x18] sm:$0xff]   ;;  %v454_v38 = vunpack.c.h.bf16 %v519_v17 }
   0x8   :  { %553 = vmatprep.subr.bf16.mxu0 %v599_v2  ;;  %583 = vmatprep.subr.bf16.mxu1 %v599_v2  ;;  %v522_v22 = vld [vmem:[%s774_s3 + $0x20] sm:$0xff]   ;;  %v469_v26 = vunpack.c.l.bf16 %v523_v18  ;;  %v713_v30 = vld [vmem:[%s774_s3 + $0x38] sm:$0xff]   ;;  %v449_v32 = vunpack.c.l.bf16 %v448_v21  ;;  %v720_v35 = vld [vmem:[%s774_s3 + $0x10] sm:$0xff]   ;;  %v470_v40 = vunpack.c.h.bf16 %v523_v18  ;;  %v450_v41 = vunpack.c.h.bf16 %v448_v21 }
   0x9   :  { %v465_v34 = vunpack.c.l.bf16 %v522_v22  ;;  %v725_v36 = vld [vmem:[%s774_s3 + $0x30] sm:$0xff]   ;;  %v466_v42 = vunpack.c.h.bf16 %v522_v22  ;;  %v461_v45 = vunpack.c.l.bf16 %v708_v29  ;;  %v477_v46 = vunpack.c.l.bf16 %v713_v30 }
   0xa   :  { %v457_v51 = vunpack.c.l.bf16 %v720_v35  ;;  %v473_v52 = vunpack.c.l.bf16 %v725_v36  ;;  %v462_v61 = vunpack.c.h.bf16 %v708_v29  ;;  %v478_v62 = vunpack.c.h.bf16 %v713_v30 }
   0xb   :  { %554 = vmatpush3.bf16.msra.mxu0 %v599_v2  ;;  %591 = vmatpush3.bf16.msra.mxu1 %v599_v2  ;;  %v458_v22 = vunpack.c.h.bf16 %v720_v35 }
   0xc   :  { %555 = vmatprep.subr.bf16.mxu0 %v600_v3  ;;  %584 = vmatprep.subr.bf16.mxu1 %v600_v3 }
   0xf   :  { %556 = vmatpush3.bf16.msra.mxu0 %v600_v3  ;;  %592 = vmatpush3.bf16.msra.mxu1 %v600_v3 }
  0x10   :  { %557 = vmatprep.subr.bf16.mxu0 %v601_v6  ;;  %585 = vmatprep.subr.bf16.mxu1 %v601_v6 }
  0x13   :  { %558 = vmatpush3.bf16.msra.mxu0 %v601_v6  ;;  %593 = vmatpush3.bf16.msra.mxu1 %v601_v6 }
  0x14   :  { %559 = vmatprep.subr.bf16.mxu0 %v602_v7  ;;  %586 = vmatprep.subr.bf16.mxu1 %v602_v7 }
  0x17   :  { %560 = vmatpush3.bf16.msra.mxu0 %v602_v7  ;;  %594 = vmatpush3.bf16.msra.mxu1 %v602_v7 }
  0x18   :  { %561 = vmatprep.subr.bf16.mxu0 %v603_v8  ;;  %587 = vmatprep.subr.bf16.mxu1 %v603_v8 }
  0x1b   :  { %562 = vmatpush3.bf16.msra.mxu0 %v603_v8  ;;  %595 = vmatpush3.bf16.msra.mxu1 %v603_v8 }
  0x1c   :  { %563 = vmatprep.subr.bf16.mxu0 %v604_v9  ;;  %588 = vmatprep.subr.bf16.mxu1 %v604_v9 }
  0x1f   :  { %564 = vmatpush3.bf16.msra.mxu0 %v604_v9  ;;  %596 = vmatpush3.bf16.msra.mxu1 %v604_v9 }
  0x22   :  { %566 = vmatmul.mubr.bf16.vlgmr.msra.gmra.mxu0 %v607_v10  ;;  %574 = vmatmul.mubr.bf16.vlgmr.msra.gmra.mxu1 %v608_v11 }
  0x23   :  { %569 = vmatprep.mubr.bf16.mxu0 %v609_v12  ;;  %577 = vmatprep.mubr.bf16.mxu1 %v610_v13 }
  0x2a   :  { %570 = vmatmul.mubr.bf16.gmra.mxu0 %v611_v14  ;;  %578 = vmatmul.mubr.bf16.gmra.mxu1 %v612_v15 }
  0xe2   :  { %v567_v19 = vpop.f32.mrf.mxu0  ;;  %v575_v20 = vpop.f32.mrf.mxu1 }
  0xe3   :  { %v196_v23 = vadd.f32 %v567_v19, %v689_v16  ;;  %v228_v25 = vadd.f32 %v575_v20, %v689_v16 }
  0xe4   :  { %v187_v27 = vpop.f32.mrf.mxu0  ;;  %v219_v28 = vpop.f32.mrf.mxu1 }
  0xe5   :  { %v188_v31 = vadd.f32 %v689_v16, %v187_v27  ;;  %v220_v33 = vadd.f32 %v689_v16, %v219_v28  ;;  %v284_v43 = vadd.f32 %v453_v24, %v196_v23  ;;  %v292_v44 = vadd.f32 %v469_v26, %v228_v25 }
  0xe6   :  { %v568_v37 = vpop.f32.mrf.mxu0  ;;  %v576_v39 = vpop.f32.mrf.mxu1  ;;  %v474_v23 = vunpack.c.h.bf16 %v725_v36 }
  0xe7   :  { %v199_v47 = vadd.f32 %v568_v37, %v689_v16  ;;  %v231_v48 = vadd.f32 %v576_v39, %v689_v16  ;;  %v282_v53 = vadd.f32 %v449_v32, %v188_v31  ;;  %v290_v54 = vadd.f32 %v465_v34, %v220_v33 }
  0xe8   :  { %v190_v49 = vpop.f32.mrf.mxu0  ;;  %v222_v50 = vpop.f32.mrf.mxu1  ;;  %v300_v63 = vmax.f32 %v284_v43, 0.0  ;;  %v308_v0 = vmax.f32 %v292_v44, 0.0 }
  0xe9   :  { %v191_v55 = vadd.f32 %v689_v16, %v190_v49  ;;  %v223_v56 = vadd.f32 %v689_v16, %v222_v50  ;;  %v285_v57 = vadd.f32 %v454_v38, %v199_v47  ;;  %v293_v58 = vadd.f32 %v470_v40, %v231_v48 }
  0xea   :  { %v571_v59 = vpop.f32.mrf.mxu0  ;;  %v579_v60 = vpop.f32.mrf.mxu1  ;;  %v298_v9 = vmax.f32 %v282_v53, 0.0  ;;  %v306_v10 = vmax.f32 %v290_v54, 0.0 }
  0xeb   :  { %v283_v1 = vadd.f32 %v450_v41, %v191_v55  ;;  %v291_v2 = vadd.f32 %v466_v42, %v223_v56  ;;  %v301_v3 = vmax.f32 %v285_v57, 0.0  ;;  %v309_v4 = vmax.f32 %v293_v58, 0.0 }
  0xec   :  { %v212_v5 = vadd.f32 %v571_v59, %v689_v16  ;;  %v244_v6 = vadd.f32 %v579_v60, %v689_v16  ;;  %v203_v7 = vpop.f32.mrf.mxu0  ;;  %v235_v8 = vpop.f32.mrf.mxu1 }
  0xed   :  { %v299_v11 = vmax.f32 %v283_v1, 0.0  ;;  %v307_v12 = vmax.f32 %v291_v2, 0.0  ;;  %v487_v13 = vpack.c.bf16 %v301_v3, %v300_v63  ;;  %v507_v14 = vpack.c.bf16 %v309_v4, %v308_v0 }
  0xee   :  { %v204_v15 = vadd.f32 %v689_v16, %v203_v7  ;;  %v236_v17 = vadd.f32 %v689_v16, %v235_v8  ;;  %v572_v18 = vpop.f32.mrf.mxu0  ;;  %v580_v19 = vpop.f32.mrf.mxu1  ;;  %v288_v24 = vadd.f32 %v461_v45, %v212_v5  ;;  %v296_v25 = vadd.f32 %v477_v46, %v244_v6 }
  0xef   :  { %v482_v20 = vpack.c.bf16 %v299_v11, %v298_v9  ;;  %v502_v21 = vpack.c.bf16 %v307_v12, %v306_v10  ;;  %526 = vst [vmem:[%s775_s4 + $0x8] sm:$0xff] %v487_v13   ;;  %530 = vst [vmem:[%s775_s4 + $0x28] sm:$0xff] %v507_v14   ;;  %v215_v26 = vadd.f32 %v572_v18, %v689_v16 }
  0xf0   :  { %v247_v27 = vadd.f32 %v580_v19, %v689_v16  ;;  %v206_v28 = vpop.f32.mrf.mxu0  ;;  %v238_v29 = vpop.f32.mrf.mxu1  ;;  %v286_v30 = vadd.f32 %v457_v51, %v204_v15  ;;  %v294_v31 = vadd.f32 %v473_v52, %v236_v17  ;;  %v304_v38 = vmax.f32 %v288_v24, 0.0 }
  0xf1   :  { %483 = vst [vmem:[%s775_s4] sm:$0xff] %v482_v20   ;;  %529 = vst [vmem:[%s775_s4 + $0x20] sm:$0xff] %v502_v21   ;;  %v207_v32 = vadd.f32 %v689_v16, %v206_v28  ;;  %v239_v33 = vadd.f32 %v689_v16, %v238_v29  ;;  %v289_v34 = vadd.f32 %v462_v61, %v215_v26  ;;  %v312_v39 = vmax.f32 %v296_v25, 0.0 }
  0xf2   :  { %v297_v35 = vadd.f32 %v478_v62, %v247_v27  ;;  %v302_v42 = vmax.f32 %v286_v30, 0.0  ;;  %v310_v43 = vmax.f32 %v294_v31, 0.0 }
  0xf3   :  { %v287_v36 = vadd.f32 %v458_v22, %v207_v32  ;;  %v295_v37 = vadd.f32 %v474_v23, %v239_v33  ;;  %v305_v40 = vmax.f32 %v289_v34, 0.0 }
  0xf4   :  { %v313_v41 = vmax.f32 %v297_v35, 0.0 }
  0xf5   :  { %v303_v44 = vmax.f32 %v287_v36, 0.0  ;;  %v311_v45 = vmax.f32 %v295_v37, 0.0  ;;  %v497_v46 = vpack.c.bf16 %v305_v40, %v304_v38 }
  0xf6   :  { %v517_v47 = vpack.c.bf16 %v313_v41, %v312_v39 }
  0xf7   :  { %v492_v48 = vpack.c.bf16 %v303_v44, %v302_v42  ;;  %v512_v49 = vpack.c.bf16 %v311_v45, %v310_v43  ;;  %528 = vst [vmem:[%s775_s4 + $0x18] sm:$0xff] %v497_v46  }
  0xf8   :  { %532 = vst [vmem:[%s775_s4 + $0x38] sm:$0xff] %v517_v47  }
  0xf9   :  { %527 = vst [vmem:[%s775_s4 + $0x10] sm:$0xff] %v492_v48   ;;  %531 = vst [vmem:[%s775_s4 + $0x30] sm:$0xff] %v512_v49  }

// kernel: tile.13
= control target key start
LH: loop header
LB: loop body
LE: loop exit
PB: predicated region body
PF: predicated region fallthrough
CT: control target
= control target key end

     0   :  { %s22_s0 = inlined_call_operand.vmem [shape: f32[128], index: 0, kind: input, shape index: {}]   ;;  %s23_s1 = inlined_call_operand.vmem [shape: f32[4,128], index: 1, kind: output, shape index: {}]  }
   0x1   :  { %v4_v0 = vld [vmem:[%s22_s0] ss:$0 sm:$0xff] }
   0x2   :  { %5 = vst [vmem:[%s23_s1] sm:$0xf] %v4_v0 }

// kernel: fc_decoder_forward.13
= control target key start
LH: loop header
LB: loop body
LE: loop exit
PB: predicated region body
PF: predicated region fallthrough
CT: control target
= control target key end

     0   :  { %s3421_s1 = inlined_call_operand.vmem [shape: bf16[512,512], index: 1, kind: input, shape index: {}]   ;;  %s3422_s0 = inlined_call_operand.vmem [shape: bf16[168,512], index: 0, kind: input, shape index: {}]   ;;  %s3423_s2 = inlined_call_operand.vmem [shape: f32[1,512], index: 2, kind: input, shape index: {}]   ;;  %s3424_s3 = inlined_call_operand.vmem [shape: bf16[168,512], index: 3, kind: output, shape index: {}]  }
   0x1   :  { %v2266_v0 = vld [vmem:[%s3421_s1 + $0xe4] ss:$16 sps:$4 sm:$0xff]   ;;  %v2270_v2 = vld [vmem:[%s3421_s1 + $0xe0] ss:$16 sps:$4 sm:$0xff]   ;;  %v2700_v51 = vld [vmem:[%s3422_s0 + $0xc] ss:$16 sps:$4 sm:$0xff]  }
   0x2   :  { %v2268_v1 = vld [vmem:[%s3421_s1 + $0x2e4] ss:$16 sps:$4 sm:$0xff]   ;;  %1060 = vmatprep.subr.bf16.mxu0 %v2266_v0  ;;  %v2271_v3 = vld [vmem:[%s3421_s1 + $0x2e0] ss:$16 sps:$4 sm:$0xff]   ;;  %1233 = vmatprep.mubr.bf16.mxu1 %v2700_v51 }
   0x3   :  { %1201 = vmatprep.subr.bf16.mxu1 %v2268_v1  ;;  %v2272_v4 = vld [vmem:[%s3421_s1 + $0xc4] ss:$16 sps:$4 sm:$0xff]   ;;  %1061 = vmatpush1.bf16.msra.mxu0 %v2270_v2  ;;  %v2276_v6 = vld [vmem:[%s3421_s1 + $0xc0] ss:$16 sps:$4 sm:$0xff]   ;;  %v2370_v2 = vld [vmem:[%s3421_s1 + $0xec] ss:$16 sps:$4 sm:$0xff]  }
   0x4   :  { %1202 = vmatpush1.bf16.msra.mxu1 %v2271_v3  ;;  %v2274_v5 = vld [vmem:[%s3421_s1 + $0x2c4] ss:$16 sps:$4 sm:$0xff]   ;;  %1062 = vmatprep.subr.bf16.mxu0 %v2272_v4  ;;  %v2277_v7 = vld [vmem:[%s3421_s1 + $0x2c0] ss:$16 sps:$4 sm:$0xff]   ;;  %v2373_v3 = vld [vmem:[%s3421_s1 + $0x2ec] ss:$16 sps:$4 sm:$0xff]  }
   0x5   :  { %1203 = vmatprep.subr.bf16.mxu1 %v2274_v5  ;;  %v2278_v8 = vld [vmem:[%s3421_s1 + $0xa4] ss:$16 sps:$4 sm:$0xff]   ;;  %v2282_v10 = vld [vmem:[%s3421_s1 + $0xa0] ss:$16 sps:$4 sm:$0xff]   ;;  %v2760_v5 = vld [vmem:[%s3422_s0 + $0x8] ss:$16 sps:$4 sm:$0xff]  }
   0x6   :  { %v2280_v9 = vld [vmem:[%s3421_s1 + $0x2a4] ss:$16 sps:$4 sm:$0xff]   ;;  %v2283_v11 = vld [vmem:[%s3421_s1 + $0x2a0] ss:$16 sps:$4 sm:$0xff]  }
   0x7   :  { %1063 = vmatpush1.bf16.msra.mxu0 %v2276_v6  ;;  %v2284_v12 = vld [vmem:[%s3421_s1 + $0x84] ss:$16 sps:$4 sm:$0xff]   ;;  %v2288_v14 = vld [vmem:[%s3421_s1 + $0x80] ss:$16 sps:$4 sm:$0xff]   ;;  %v2368_v6 = vld [vmem:[%s3421_s1 + $0xe8] ss:$16 sps:$4 sm:$0xff]  }
   0x8   :  { %1204 = vmatpush1.bf16.msra.mxu1 %v2277_v7  ;;  %1064 = vmatprep.subr.bf16.mxu0 %v2278_v8  ;;  %v2286_v13 = vld [vmem:[%s3421_s1 + $0x284] ss:$16 sps:$4 sm:$0xff]   ;;  %v2289_v15 = vld [vmem:[%s3421_s1 + $0x280] ss:$16 sps:$4 sm:$0xff]   ;;  %v2371_v7 = vld [vmem:[%s3421_s1 + $0x2e8] ss:$16 sps:$4 sm:$0xff]  }
   0x9   :  { %1205 = vmatprep.subr.bf16.mxu1 %v2280_v9  ;;  %v2290_v16 = vld [vmem:[%s3421_s1 + $0x64] ss:$16 sps:$4 sm:$0xff]   ;;  %v2294_v18 = vld [vmem:[%s3421_s1 + $0x60] ss:$16 sps:$4 sm:$0xff]   ;;  %v2376_v8 = vld [vmem:[%s3421_s1 + $0xcc] ss:$16 sps:$4 sm:$0xff]  }
   0xa   :  { %v2292_v17 = vld [vmem:[%s3421_s1 + $0x264] ss:$16 sps:$4 sm:$0xff]   ;;  %v2295_v19 = vld [vmem:[%s3421_s1 + $0x260] ss:$16 sps:$4 sm:$0xff]  }
   0xb   :  { %1065 = vmatpush1.bf16.msra.mxu0 %v2282_v10  ;;  %v2296_v20 = vld [vmem:[%s3421_s1 + $0x44] ss:$16 sps:$4 sm:$0xff]   ;;  %v2300_v22 = vld [vmem:[%s3421_s1 + $0x40] ss:$16 sps:$4 sm:$0xff]   ;;  %v2779_v10 = vld [vmem:[%s3422_s0 + $0x2c] ss:$16 sps:$4 sm:$0xff]  }
   0xc   :  { %1206 = vmatpush1.bf16.msra.mxu1 %v2283_v11  ;;  %1066 = vmatprep.subr.bf16.mxu0 %v2284_v12  ;;  %v2298_v21 = vld [vmem:[%s3421_s1 + $0x244] ss:$16 sps:$4 sm:$0xff]   ;;  %v2301_v23 = vld [vmem:[%s3421_s1 + $0x240] ss:$16 sps:$4 sm:$0xff]   ;;  %v2385_v11 = vld [vmem:[%s3421_s1 + $0x2cc] ss:$16 sps:$4 sm:$0xff]  }
   0xd   :  { %1207 = vmatprep.subr.bf16.mxu1 %v2286_v13  ;;  %v2302_v24 = vld [vmem:[%s3421_s1 + $0x24] ss:$16 sps:$4 sm:$0xff]   ;;  %v2306_v26 = vld [vmem:[%s3421_s1 + $0x20] ss:$16 sps:$4 sm:$0xff]   ;;  %v2374_v12 = vld [vmem:[%s3421_s1 + $0xc8] ss:$16 sps:$4 sm:$0xff]  }
   0xe   :  { %v2304_v25 = vld [vmem:[%s3421_s1 + $0x224] ss:$16 sps:$4 sm:$0xff]   ;;  %v2307_v27 = vld [vmem:[%s3421_s1 + $0x220] ss:$16 sps:$4 sm:$0xff]   ;;  %v2383_v13 = vld [vmem:[%s3421_s1 + $0x2c8] ss:$16 sps:$4 sm:$0xff]  }
   0xf   :  { %1067 = vmatpush1.bf16.msra.mxu0 %v2288_v14  ;;  %v2308_v28 = vld [vmem:[%s3421_s1 + $0x4] ss:$16 sps:$4 sm:$0xff]   ;;  %v2312_v30 = vld [vmem:[%s3421_s1] ss:$16 sps:$4 sm:$0xff]   ;;  %v2388_v14 = vld [vmem:[%s3421_s1 + $0xac] ss:$16 sps:$4 sm:$0xff]  }
  0x10   :  { %1208 = vmatpush1.bf16.msra.mxu1 %v2289_v15  ;;  %1068 = vmatprep.subr.bf16.mxu0 %v2290_v16  ;;  %v2310_v29 = vld [vmem:[%s3421_s1 + $0x204] ss:$16 sps:$4 sm:$0xff]   ;;  %v2313_v31 = vld [vmem:[%s3421_s1 + $0x200] ss:$16 sps:$4 sm:$0xff]   ;;  %v2391_v15 = vld [vmem:[%s3421_s1 + $0x2ac] ss:$16 sps:$4 sm:$0xff]  }
  0x11   :  { %1209 = vmatprep.subr.bf16.mxu1 %v2292_v17  ;;  %v2314_v32 = vld [vmem:[%s3421_s1 + $0x1e4] ss:$16 sps:$4 sm:$0xff]   ;;  %v2318_v34 = vld [vmem:[%s3421_s1 + $0x1e0] ss:$16 sps:$4 sm:$0xff]   ;;  %v2808_v17 = vld [vmem:[%s3422_s0 + $0x28] ss:$16 sps:$4 sm:$0xff]  }
  0x12   :  { %v2316_v33 = vld [vmem:[%s3421_s1 + $0x3e4] ss:$16 sps:$4 sm:$0xff]   ;;  %v2319_v35 = vld [vmem:[%s3421_s1 + $0x3e0] ss:$16 sps:$4 sm:$0xff]  }
  0x13   :  { %1069 = vmatpush1.bf16.msra.mxu0 %v2294_v18  ;;  %v2320_v36 = vld [vmem:[%s3421_s1 + $0x1c4] ss:$16 sps:$4 sm:$0xff]   ;;  %v2324_v38 = vld [vmem:[%s3421_s1 + $0x1c0] ss:$16 sps:$4 sm:$0xff]   ;;  %v2386_v18 = vld [vmem:[%s3421_s1 + $0xa8] ss:$16 sps:$4 sm:$0xff]  }
  0x14   :  { %1210 = vmatpush1.bf16.msra.mxu1 %v2295_v19  ;;  %1070 = vmatprep.subr.bf16.mxu0 %v2296_v20  ;;  %v2322_v37 = vld [vmem:[%s3421_s1 + $0x3c4] ss:$16 sps:$4 sm:$0xff]   ;;  %v2325_v39 = vld [vmem:[%s3421_s1 + $0x3c0] ss:$16 sps:$4 sm:$0xff]   ;;  %v2389_v19 = vld [vmem:[%s3421_s1 + $0x2a8] ss:$16 sps:$4 sm:$0xff]  }
  0x15   :  { %1211 = vmatprep.subr.bf16.mxu1 %v2298_v21  ;;  %v2326_v40 = vld [vmem:[%s3421_s1 + $0x1a4] ss:$16 sps:$4 sm:$0xff]   ;;  %v2330_v42 = vld [vmem:[%s3421_s1 + $0x1a0] ss:$16 sps:$4 sm:$0xff]   ;;  %v2824_v21 = vld [vmem:[%s3422_s0 + $0x4c] ss:$16 sps:$4 sm:$0xff]  }
  0x16   :  { %v2328_v41 = vld [vmem:[%s3421_s1 + $0x3a4] ss:$16 sps:$4 sm:$0xff]   ;;  %v2331_v43 = vld [vmem:[%s3421_s1 + $0x3a0] ss:$16 sps:$4 sm:$0xff]  }
  0x17   :  { %1071 = vmatpush1.bf16.msra.mxu0 %v2300_v22  ;;  %v2332_v44 = vld [vmem:[%s3421_s1 + $0x184] ss:$16 sps:$4 sm:$0xff]   ;;  %v2336_v46 = vld [vmem:[%s3421_s1 + $0x180] ss:$16 sps:$4 sm:$0xff]   ;;  %v2400_v22 = vld [vmem:[%s3421_s1 + $0x8c] ss:$16 sps:$4 sm:$0xff]  }
  0x18   :  { %1212 = vmatpush1.bf16.msra.mxu1 %v2301_v23  ;;  %1072 = vmatprep.subr.bf16.mxu0 %v2302_v24  ;;  %v2334_v45 = vld [vmem:[%s3421_s1 + $0x384] ss:$16 sps:$4 sm:$0xff]   ;;  %v2337_v47 = vld [vmem:[%s3421_s1 + $0x380] ss:$16 sps:$4 sm:$0xff]   ;;  %v2403_v23 = vld [vmem:[%s3421_s1 + $0x28c] ss:$16 sps:$4 sm:$0xff]  }
  0x19   :  { %1213 = vmatprep.subr.bf16.mxu1 %v2304_v25  ;;  %v2338_v48 = vld [vmem:[%s3421_s1 + $0x164] ss:$16 sps:$4 sm:$0xff]   ;;  %v2342_v52 = vld [vmem:[%s3421_s1 + $0x160] ss:$16 sps:$4 sm:$0xff]   ;;  %v2398_v24 = vld [vmem:[%s3421_s1 + $0x88] ss:$16 sps:$4 sm:$0xff]  }
  0x1a   :  { %v2692_v49 = vld [vmem:[%s3422_s0 + $0x4] ss:$16 sps:$4 sm:$0xff]   ;;  %v2343_v53 = vld [vmem:[%s3421_s1 + $0x360] ss:$16 sps:$4 sm:$0xff]   ;;  %v2401_v25 = vld [vmem:[%s3421_s1 + $0x288] ss:$16 sps:$4 sm:$0xff]  }
  0x1b   :  { %1073 = vmatpush1.bf16.msra.mxu0 %v2306_v26  ;;  %v2340_v50 = vld [vmem:[%s3421_s1 + $0x364] ss:$16 sps:$4 sm:$0xff]   ;;  %1092 = vmatprep.mubr.bf16.mxu0 %v2692_v49  ;;  %v2348_v56 = vld [vmem:[%s3421_s1 + $0x140] ss:$16 sps:$4 sm:$0xff]   ;;  %v2406_v26 = vld [vmem:[%s3421_s1 + $0x6c] ss:$16 sps:$4 sm:$0xff]  }
  0x1c   :  { %1214 = vmatpush1.bf16.msra.mxu1 %v2307_v27  ;;  %1074 = vmatprep.subr.bf16.mxu0 %v2308_v28  ;;  %v2344_v54 = vld [vmem:[%s3421_s1 + $0x144] ss:$16 sps:$4 sm:$0xff]   ;;  %v2349_v57 = vld [vmem:[%s3421_s1 + $0x340] ss:$16 sps:$4 sm:$0xff]   ;;  %v2415_v27 = vld [vmem:[%s3421_s1 + $0x26c] ss:$16 sps:$4 sm:$0xff]  }
  0x1d   :  { %1215 = vmatprep.subr.bf16.mxu1 %v2310_v29  ;;  %v2346_v55 = vld [vmem:[%s3421_s1 + $0x344] ss:$16 sps:$4 sm:$0xff]   ;;  %v2354_v60 = vld [vmem:[%s3421_s1 + $0x120] ss:$16 sps:$4 sm:$0xff]   ;;  %v2856_v29 = vld [vmem:[%s3422_s0 + $0x48] ss:$16 sps:$4 sm:$0xff]  }
  0x1e   :  { %v2350_v58 = vld [vmem:[%s3421_s1 + $0x124] ss:$16 sps:$4 sm:$0xff]   ;;  %v2355_v61 = vld [vmem:[%s3421_s1 + $0x320] ss:$16 sps:$4 sm:$0xff]  }
  0x1f   :  { %1075 = vmatpush1.bf16.msra.mxu0 %v2312_v30  ;;  %v2352_v59 = vld [vmem:[%s3421_s1 + $0x324] ss:$16 sps:$4 sm:$0xff]   ;;  %v2360_v0 = vld [vmem:[%s3421_s1 + $0x100] ss:$16 sps:$4 sm:$0xff]   ;;  %v2404_v30 = vld [vmem:[%s3421_s1 + $0x68] ss:$16 sps:$4 sm:$0xff]  }
  0x20   :  { %1216 = vmatpush1.bf16.msra.mxu1 %v2313_v31  ;;  %1076 = vmatprep.subr.bf16.mxu0 %v2314_v32  ;;  %v2356_v62 = vld [vmem:[%s3421_s1 + $0x104] ss:$16 sps:$4 sm:$0xff]   ;;  %v2361_v1 = vld [vmem:[%s3421_s1 + $0x300] ss:$16 sps:$4 sm:$0xff]   ;;  %v2869_v32 = vld [vmem:[%s3422_s0 + $0x6c] ss:$16 sps:$4 sm:$0xff]  }
  0x21   :  { %1217 = vmatprep.subr.bf16.mxu1 %v2316_v33  ;;  %v2358_v63 = vld [vmem:[%s3421_s1 + $0x304] ss:$16 sps:$4 sm:$0xff]   ;;  %v2755_v4 = vld [vmem:[%s3422_s0] ss:$16 sps:$4 sm:$0xff]   ;;  %v2413_v33 = vld [vmem:[%s3421_s1 + $0x268] ss:$16 sps:$4 sm:$0xff]  }
  0x22   :  { %v2774_v9 = vld [vmem:[%s3422_s0 + $0x24] ss:$16 sps:$4 sm:$0xff]   ;;  %v2803_v16 = vld [vmem:[%s3422_s0 + $0x20] ss:$16 sps:$4 sm:$0xff]  }
  0x23   :  { %1077 = vmatpush2.bf16.msra.mxu0 %v2318_v34  ;;  %v2819_v20 = vld [vmem:[%s3422_s0 + $0x44] ss:$16 sps:$4 sm:$0xff]   ;;  %v2851_v28 = vld [vmem:[%s3422_s0 + $0x40] ss:$16 sps:$4 sm:$0xff]   ;;  %v2418_v34 = vld [vmem:[%s3421_s1 + $0x4c] ss:$16 sps:$4 sm:$0xff]  }
  0x24   :  { %1218 = vmatpush2.bf16.msra.mxu1 %v2319_v35  ;;  %1078 = vmatprep.subr.bf16.mxu0 %v2320_v36  ;;  %v2864_v31 = vld [vmem:[%s3422_s0 + $0x64] ss:$16 sps:$4 sm:$0xff]   ;;  %v2421_v35 = vld [vmem:[%s3421_s1 + $0x24c] ss:$16 sps:$4 sm:$0xff]   ;;  %v2416_v36 = vld [vmem:[%s3421_s1 + $0x48] ss:$16 sps:$4 sm:$0xff]  }
  0x25   :  { %1219 = vmatprep.subr.bf16.mxu1 %v2322_v37  ;;  %v2890_v37 = vld [vmem:[%s3422_s0 + $0x60] ss:$16 sps:$4 sm:$0xff]  }
  0x27   :  { %1079 = vmatpush2.bf16.msra.mxu0 %v2324_v38  ;;  %v2895_v38 = vld [vmem:[%s3422_s0 + $0x68] ss:$16 sps:$4 sm:$0xff]  }
  0x28   :  { %1220 = vmatpush2.bf16.msra.mxu1 %v2325_v39  ;;  %1080 = vmatprep.subr.bf16.mxu0 %v2326_v40  ;;  %v2419_v39 = vld [vmem:[%s3421_s1 + $0x248] ss:$16 sps:$4 sm:$0xff]   ;;  %v2903_v40 = vld [vmem:[%s3422_s0 + $0x84] ss:$16 sps:$4 sm:$0xff]  }
  0x29   :  { %1221 = vmatprep.subr.bf16.mxu1 %v2328_v41  ;;  %v2430_v41 = vld [vmem:[%s3421_s1 + $0x2c] ss:$16 sps:$4 sm:$0xff]  }
  0x2b   :  { %1081 = vmatpush2.bf16.msra.mxu0 %v2330_v42  ;;  %v2433_v42 = vld [vmem:[%s3421_s1 + $0x22c] ss:$16 sps:$4 sm:$0xff]  }
  0x2c   :  { %1222 = vmatpush2.bf16.msra.mxu1 %v2331_v43  ;;  %1082 = vmatprep.subr.bf16.mxu0 %v2332_v44  ;;  %v2914_v43 = vld [vmem:[%s3422_s0 + $0x8c] ss:$16 sps:$4 sm:$0xff]   ;;  %v2428_v44 = vld [vmem:[%s3421_s1 + $0x28] ss:$16 sps:$4 sm:$0xff]  }
  0x2d   :  { %1223 = vmatprep.subr.bf16.mxu1 %v2334_v45  ;;  %v2431_v45 = vld [vmem:[%s3421_s1 + $0x228] ss:$16 sps:$4 sm:$0xff]  }
  0x2f   :  { %1083 = vmatpush2.bf16.msra.mxu0 %v2336_v46  ;;  %v2440_v46 = vld [vmem:[%s3421_s1 + $0xc] ss:$16 sps:$4 sm:$0xff]  }
  0x30   :  { %1224 = vmatpush2.bf16.msra.mxu1 %v2337_v47  ;;  %1084 = vmatprep.subr.bf16.mxu0 %v2338_v48  ;;  %v2445_v47 = vld [vmem:[%s3421_s1 + $0x20c] ss:$16 sps:$4 sm:$0xff]   ;;  %v2438_v48 = vld [vmem:[%s3421_s1 + $0x8] ss:$16 sps:$4 sm:$0xff]  }
  0x31   :  { %1225 = vmatprep.subr.bf16.mxu1 %v2340_v50  ;;  %v2938_v50 = vld [vmem:[%s3422_s0 + $0x80] ss:$16 sps:$4 sm:$0xff]  }
  0x33   :  { %1085 = vmatpush2.bf16.msra.mxu0 %v2342_v52  ;;  %v2943_v52 = vld [vmem:[%s3422_s0 + $0x88] ss:$16 sps:$4 sm:$0xff]  }
  0x34   :  { %1226 = vmatpush2.bf16.msra.mxu1 %v2343_v53  ;;  %1086 = vmatprep.subr.bf16.mxu0 %v2344_v54  ;;  %v2443_v53 = vld [vmem:[%s3421_s1 + $0x208] ss:$16 sps:$4 sm:$0xff]   ;;  %v2448_v54 = vld [vmem:[%s3421_s1 + $0x1ec] ss:$16 sps:$4 sm:$0xff]  }
  0x35   :  { %1227 = vmatprep.subr.bf16.mxu1 %v2346_v55  ;;  %v2451_v55 = vld [vmem:[%s3421_s1 + $0x3ec] ss:$16 sps:$4 sm:$0xff]  }
  0x37   :  { %1087 = vmatpush2.bf16.msra.mxu0 %v2348_v56  ;;  %v2957_v56 = vld [vmem:[%s3422_s0 + $0xa4] ss:$16 sps:$4 sm:$0xff]  }
  0x38   :  { %1228 = vmatpush2.bf16.msra.mxu1 %v2349_v57  ;;  %1088 = vmatprep.subr.bf16.mxu0 %v2350_v58  ;;  %v2962_v57 = vld [vmem:[%s3422_s0 + $0xac] ss:$16 sps:$4 sm:$0xff]   ;;  %v2446_v58 = vld [vmem:[%s3421_s1 + $0x1e8] ss:$16 sps:$4 sm:$0xff]  }
  0x39   :  { %1229 = vmatprep.subr.bf16.mxu1 %v2352_v59  ;;  %v2449_v59 = vld [vmem:[%s3421_s1 + $0x3e8] ss:$16 sps:$4 sm:$0xff]  }
  0x3b   :  { %1089 = vmatpush2.bf16.msra.mxu0 %v2354_v60  ;;  %v2460_v60 = vld [vmem:[%s3421_s1 + $0x1cc] ss:$16 sps:$4 sm:$0xff]  }
  0x3c   :  { %1230 = vmatpush2.bf16.msra.mxu1 %v2355_v61  ;;  %1090 = vmatprep.subr.bf16.mxu0 %v2356_v62  ;;  %v2463_v61 = vld [vmem:[%s3421_s1 + $0x3cc] ss:$16 sps:$4 sm:$0xff]   ;;  %v2458_v62 = vld [vmem:[%s3421_s1 + $0x1c8] ss:$16 sps:$4 sm:$0xff]  }
  0x3d   :  { %1231 = vmatprep.subr.bf16.mxu1 %v2358_v63  ;;  %v2461_v63 = vld [vmem:[%s3421_s1 + $0x3c8] ss:$16 sps:$4 sm:$0xff]  }
  0x3f   :  { %1091 = vmatpush2.bf16.msra.mxu0 %v2360_v0  ;;  %v2989_v0 = vld [vmem:[%s3422_s0 + $0xa0] ss:$16 sps:$4 sm:$0xff]  }
  0x40   :  { %1232 = vmatpush2.bf16.msra.mxu1 %v2361_v1  ;;  %1342 = vmatprep.subr.bf16.mxu0 %v2370_v2  ;;  %v2470_v1 = vld [vmem:[%s3421_s1 + $0x1ac] ss:$16 sps:$4 sm:$0xff]  }
  0x41   :  { %1483 = vmatprep.subr.bf16.mxu1 %v2373_v3  ;;  %v2475_v2 = vld [vmem:[%s3421_s1 + $0x3ac] ss:$16 sps:$4 sm:$0xff]   ;;  %v3000_v3 = vld [vmem:[%s3422_s0 + $0xa8] ss:$16 sps:$4 sm:$0xff]  }
  0x42   :  { %1093 = vmatmul.mubr.bf16.vlgmr.msra.gmra.mxu0 %v2755_v4 }
  0x43   :  { %1234 = vmatmul.mubr.bf16.vlgmr.msra.gmra.mxu1 %v2760_v5  ;;  %1343 = vmatpush1.bf16.msra.mxu0 %v2368_v6  ;;  %v3005_v6 = vld [vmem:[%s3422_s0 + $0xc4] ss:$16 sps:$4 sm:$0xff]  }
  0x44   :  { %1484 = vmatpush1.bf16.msra.mxu1 %v2371_v7  ;;  %1344 = vmatprep.subr.bf16.mxu0 %v2376_v8  ;;  %v3010_v7 = vld [vmem:[%s3422_s0 + $0xcc] ss:$16 sps:$4 sm:$0xff]   ;;  %v2468_v8 = vld [vmem:[%s3421_s1 + $0x1a8] ss:$16 sps:$4 sm:$0xff]  }
  0x45   :  { %1102 = vmatprep.mubr.bf16.mxu0 %v2774_v9  ;;  %1243 = vmatprep.mubr.bf16.mxu1 %v2779_v10 }
  0x46   :  { %1485 = vmatprep.subr.bf16.mxu1 %v2385_v11  ;;  %v2473_v11 = vld [vmem:[%s3421_s1 + $0x3a8] ss:$16 sps:$4 sm:$0xff]  }
  0x47   :  { %1345 = vmatpush1.bf16.msra.mxu0 %v2374_v12  ;;  %v2478_v12 = vld [vmem:[%s3421_s1 + $0x18c] ss:$16 sps:$4 sm:$0xff]  }
  0x48   :  { %1486 = vmatpush1.bf16.msra.mxu1 %v2383_v13  ;;  %1346 = vmatprep.subr.bf16.mxu0 %v2388_v14  ;;  %v2485_v13 = vld [vmem:[%s3421_s1 + $0x38c] ss:$16 sps:$4 sm:$0xff]   ;;  %v2476_v14 = vld [vmem:[%s3421_s1 + $0x188] ss:$16 sps:$4 sm:$0xff]  }
  0x49   :  { %1487 = vmatprep.subr.bf16.mxu1 %v2391_v15  ;;  %v3034_v15 = vld [vmem:[%s3422_s0 + $0xc0] ss:$16 sps:$4 sm:$0xff]  }
  0x4a   :  { %1103 = vmatmul.mubr.bf16.gmra.mxu0 %v2803_v16 }
  0x4b   :  { %1244 = vmatmul.mubr.bf16.gmra.mxu1 %v2808_v17  ;;  %1347 = vmatpush1.bf16.msra.mxu0 %v2386_v18  ;;  %v2483_v18 = vld [vmem:[%s3421_s1 + $0x388] ss:$16 sps:$4 sm:$0xff]  }
  0x4c   :  { %1488 = vmatpush1.bf16.msra.mxu1 %v2389_v19  ;;  %1112 = vmatprep.mubr.bf16.mxu0 %v2819_v20  ;;  %v2490_v19 = vld [vmem:[%s3421_s1 + $0x16c] ss:$16 sps:$4 sm:$0xff]  }
  0x4d   :  { %1253 = vmatprep.mubr.bf16.mxu1 %v2824_v21  ;;  %1348 = vmatprep.subr.bf16.mxu0 %v2400_v22  ;;  %v2493_v22 = vld [vmem:[%s3421_s1 + $0x36c] ss:$16 sps:$4 sm:$0xff]  }
  0x4e   :  { %1489 = vmatprep.subr.bf16.mxu1 %v2403_v23  ;;  %v3048_v23 = vld [vmem:[%s3422_s0 + $0xc8] ss:$16 sps:$4 sm:$0xff]  }
  0x4f   :  { %1349 = vmatpush1.bf16.msra.mxu0 %v2398_v24  ;;  %v3053_v24 = vld [vmem:[%s3422_s0 + $0xe4] ss:$16 sps:$4 sm:$0xff]  }
  0x50   :  { %1490 = vmatpush1.bf16.msra.mxu1 %v2401_v25  ;;  %1350 = vmatprep.subr.bf16.mxu0 %v2406_v26  ;;  %v3058_v25 = vld [vmem:[%s3422_s0 + $0xec] ss:$16 sps:$4 sm:$0xff]   ;;  %v2488_v26 = vld [vmem:[%s3421_s1 + $0x168] ss:$16 sps:$4 sm:$0xff]  }
  0x51   :  { %1491 = vmatprep.subr.bf16.mxu1 %v2415_v27  ;;  %v2491_v27 = vld [vmem:[%s3421_s1 + $0x368] ss:$16 sps:$4 sm:$0xff]  }
  0x52   :  { %1113 = vmatmul.mubr.bf16.gmra.mxu0 %v2851_v28 }
  0x53   :  { %1254 = vmatmul.mubr.bf16.gmra.mxu1 %v2856_v29  ;;  %1122 = vmatprep.mubr.bf16.mxu0 %v2864_v31 }
  0x54   :  { %1263 = vmatprep.mubr.bf16.mxu1 %v2869_v32  ;;  %1351 = vmatpush1.bf16.msra.mxu0 %v2404_v30  ;;  %v2502_v30 = vld [vmem:[%s3421_s1 + $0x14c] ss:$16 sps:$4 sm:$0xff]  }
  0x55   :  { %1492 = vmatpush1.bf16.msra.mxu1 %v2413_v33  ;;  %1352 = vmatprep.subr.bf16.mxu0 %v2418_v34  ;;  %v2505_v33 = vld [vmem:[%s3421_s1 + $0x34c] ss:$16 sps:$4 sm:$0xff]   ;;  %v2500_v34 = vld [vmem:[%s3421_s1 + $0x148] ss:$16 sps:$4 sm:$0xff]  }
  0x56   :  { %1493 = vmatprep.subr.bf16.mxu1 %v2421_v35  ;;  %v2503_v35 = vld [vmem:[%s3421_s1 + $0x348] ss:$16 sps:$4 sm:$0xff]  }
  0x58   :  { %1353 = vmatpush1.bf16.msra.mxu0 %v2416_v36  ;;  %v2508_v36 = vld [vmem:[%s3421_s1 + $0x12c] ss:$16 sps:$4 sm:$0xff]  }
  0x59   :  { %1494 = vmatpush1.bf16.msra.mxu1 %v2419_v39  ;;  %1354 = vmatprep.subr.bf16.mxu0 %v2430_v41  ;;  %v2513_v39 = vld [vmem:[%s3421_s1 + $0x32c] ss:$16 sps:$4 sm:$0xff]   ;;  %v3091_v41 = vld [vmem:[%s3422_s0 + $0xe0] ss:$16 sps:$4 sm:$0xff]  }
  0x5a   :  { %1495 = vmatprep.subr.bf16.mxu1 %v2433_v42  ;;  %1123 = vmatmul.mubr.bf16.gmra.mxu0 %v2890_v37  ;;  %v3096_v42 = vld [vmem:[%s3422_s0 + $0xe8] ss:$16 sps:$4 sm:$0xff]  }
  0x5b   :  { %1264 = vmatmul.mubr.bf16.gmra.mxu1 %v2895_v38  ;;  %1132 = vmatprep.mubr.bf16.mxu0 %v2903_v40 }
  0x5c   :  { %1273 = vmatprep.mubr.bf16.mxu1 %v2914_v43  ;;  %1355 = vmatpush1.bf16.msra.mxu0 %v2428_v44  ;;  %v3101_v44 = vld [vmem:[%s3422_s0 + $0x104] ss:$16 sps:$4 sm:$0xff]  }
  0x5d   :  { %1496 = vmatpush1.bf16.msra.mxu1 %v2431_v45  ;;  %1356 = vmatprep.subr.bf16.mxu0 %v2440_v46  ;;  %v3106_v45 = vld [vmem:[%s3422_s0 + $0x10c] ss:$16 sps:$4 sm:$0xff]   ;;  %v2506_v46 = vld [vmem:[%s3421_s1 + $0x128] ss:$16 sps:$4 sm:$0xff]  }
  0x5e   :  { %1497 = vmatprep.subr.bf16.mxu1 %v2445_v47  ;;  %v2511_v47 = vld [vmem:[%s3421_s1 + $0x328] ss:$16 sps:$4 sm:$0xff]  }
  0x60   :  { %1357 = vmatpush1.bf16.msra.mxu0 %v2438_v48  ;;  %v2518_v48 = vld [vmem:[%s3421_s1 + $0x10c] ss:$16 sps:$4 sm:$0xff]  }
  0x61   :  { %1498 = vmatpush1.bf16.msra.mxu1 %v2443_v53  ;;  %1358 = vmatprep.subr.bf16.mxu0 %v2448_v54  ;;  %v2521_v53 = vld [vmem:[%s3421_s1 + $0x30c] ss:$16 sps:$4 sm:$0xff]   ;;  %v2516_v54 = vld [vmem:[%s3421_s1 + $0x108] ss:$16 sps:$4 sm:$0xff]  }
  0x62   :  { %1499 = vmatprep.subr.bf16.mxu1 %v2451_v55  ;;  %1133 = vmatmul.mubr.bf16.gmra.mxu0 %v2938_v50  ;;  %v2519_v55 = vld [vmem:[%s3421_s1 + $0x308] ss:$16 sps:$4 sm:$0xff]  }
  0x63   :  { %1274 = vmatmul.mubr.bf16.gmra.mxu1 %v2943_v52  ;;  %1142 = vmatprep.mubr.bf16.mxu0 %v2957_v56 }
  0x64   :  { %1283 = vmatprep.mubr.bf16.mxu1 %v2962_v57  ;;  %1359 = vmatpush2.bf16.msra.mxu0 %v2446_v58  ;;  %v2486_v58 = vld [vmem:[%s3422_s0 + $0x100] ss:$16 sps:$4 sm:$0xff]  }
  0x65   :  { %1500 = vmatpush2.bf16.msra.mxu1 %v2449_v59  ;;  %1360 = vmatprep.subr.bf16.mxu0 %v2460_v60  ;;  %v2487_v59 = vld [vmem:[%s3422_s0 + $0x108] ss:$16 sps:$4 sm:$0xff]   ;;  %v2494_v60 = vld [vmem:[%s3422_s0 + $0x124] ss:$16 sps:$4 sm:$0xff]  }
  0x66   :  { %1501 = vmatprep.subr.bf16.mxu1 %v2463_v61  ;;  %v2496_v61 = vld [vmem:[%s3422_s0 + $0x12c] ss:$16 sps:$4 sm:$0xff]  }
  0x68   :  { %1361 = vmatpush2.bf16.msra.mxu0 %v2458_v62  ;;  %v54_v62 = vld [vmem:[%s3422_s0 + $0x140] sm:$0xff] }
  0x69   :  { %1502 = vmatpush2.bf16.msra.mxu1 %v2461_v63  ;;  %1362 = vmatprep.subr.bf16.mxu0 %v2470_v1  ;;  %v55_v63 = vld [vmem:[%s3422_s0 + $0x148] sm:$0xff]  ;;  %v2498_v1 = vld [vmem:[%s3422_s0 + $0x120] ss:$16 sps:$4 sm:$0xff]  }
  0x6a   :  { %1503 = vmatprep.subr.bf16.mxu1 %v2475_v2  ;;  %1143 = vmatmul.mubr.bf16.gmra.mxu0 %v2989_v0  ;;  %v2499_v2 = vld [vmem:[%s3422_s0 + $0x128] ss:$16 sps:$4 sm:$0xff]  }
  0x6b   :  { %1284 = vmatmul.mubr.bf16.gmra.mxu1 %v3000_v3  ;;  %1152 = vmatprep.mubr.bf16.mxu0 %v3005_v6 }
  0x6c   :  { %1293 = vmatprep.mubr.bf16.mxu1 %v3010_v7  ;;  %1363 = vmatpush2.bf16.msra.mxu0 %v2468_v8  ;;  %v2051_v8 = vcombine.high %v54_v62, %v54_v62 }
  0x6d   :  { %1504 = vmatpush2.bf16.msra.mxu1 %v2473_v11  ;;  %1364 = vmatprep.subr.bf16.mxu0 %v2478_v12  ;;  %v2053_v11 = vcombine.high %v55_v63, %v55_v63  ;;  %v2050_v12 = vcombine.low %v54_v62, %v54_v62 }
  0x6e   :  { %1505 = vmatprep.subr.bf16.mxu1 %v2485_v13  ;;  %v2052_v13 = vcombine.low %v55_v63, %v55_v63 }
  0x70   :  { %1365 = vmatpush2.bf16.msra.mxu0 %v2476_v14 }
  0x71   :  { %1506 = vmatpush2.bf16.msra.mxu1 %v2483_v18  ;;  %1366 = vmatprep.subr.bf16.mxu0 %v2490_v19 }
  0x72   :  { %1507 = vmatprep.subr.bf16.mxu1 %v2493_v22  ;;  %1153 = vmatmul.mubr.bf16.gmra.mxu0 %v3034_v15 }
  0x73   :  { %1294 = vmatmul.mubr.bf16.gmra.mxu1 %v3048_v23  ;;  %1162 = vmatprep.mubr.bf16.mxu0 %v3053_v24 }
  0x74   :  { %1303 = vmatprep.mubr.bf16.mxu1 %v3058_v25  ;;  %1367 = vmatpush2.bf16.msra.mxu0 %v2488_v26 }
  0x75   :  { %1508 = vmatpush2.bf16.msra.mxu1 %v2491_v27  ;;  %1368 = vmatprep.subr.bf16.mxu0 %v2502_v30 }
  0x76   :  { %1509 = vmatprep.subr.bf16.mxu1 %v2505_v33 }
  0x78   :  { %1369 = vmatpush2.bf16.msra.mxu0 %v2500_v34 }
  0x79   :  { %1510 = vmatpush2.bf16.msra.mxu1 %v2503_v35  ;;  %1370 = vmatprep.subr.bf16.mxu0 %v2508_v36 }
  0x7a   :  { %1511 = vmatprep.subr.bf16.mxu1 %v2513_v39  ;;  %1163 = vmatmul.mubr.bf16.gmra.mxu0 %v3091_v41 }
  0x7b   :  { %1304 = vmatmul.mubr.bf16.gmra.mxu1 %v3096_v42  ;;  %1172 = vmatprep.mubr.bf16.mxu0 %v3101_v44 }
  0x7c   :  { %1313 = vmatprep.mubr.bf16.mxu1 %v3106_v45  ;;  %1371 = vmatpush2.bf16.msra.mxu0 %v2506_v46 }
  0x7d   :  { %1512 = vmatpush2.bf16.msra.mxu1 %v2511_v47  ;;  %1372 = vmatprep.subr.bf16.mxu0 %v2518_v48 }
  0x7e   :  { %1513 = vmatprep.subr.bf16.mxu1 %v2521_v53 }
  0x80   :  { %1373 = vmatpush2.bf16.msra.mxu0 %v2516_v54 }
  0x81   :  { %1514 = vmatpush2.bf16.msra.mxu1 %v2519_v55 }
  0x82   :  { %1173 = vmatmul.mubr.bf16.gmra.mxu0 %v2486_v58 }
  0x83   :  { %1314 = vmatmul.mubr.bf16.gmra.mxu1 %v2487_v59  ;;  %1182 = vmatprep.mubr.bf16.mxu0 %v2494_v60 }
  0x84   :  { %1323 = vmatprep.mubr.bf16.mxu1 %v2496_v61 }
  0x8a   :  { %1183 = vmatmul.mubr.bf16.gmra.mxu0 %v2498_v1 }
  0x8b   :  { %1324 = vmatmul.mubr.bf16.gmra.mxu1 %v2499_v2  ;;  %1192 = vmatprep.mubr.bf16.mxu0 %v2051_v8 }
  0x8c   :  { %1333 = vmatprep.mubr.bf16.mxu1 %v2053_v11 }
  0x92   :  { %1193 = vmatmul.mubr.bf16.gmra.mxu0 %v2050_v12 }
  0x93   :  { %1334 = vmatmul.mubr.bf16.gmra.mxu1 %v2052_v13  ;;  %1374 = vmatprep.mubr.bf16.mxu0 %v2692_v49  ;;  %v186_v49 = vlaneseq }
  0x94   :  { %1515 = vmatprep.mubr.bf16.mxu1 %v2700_v51 }
  0x95   :  { %v3188_v51 = vshrl.u32 %v186_v49, 7 }
  0x9a   :  { %1375 = vmatmul.mubr.bf16.vlgmr.msra.gmra.mxu0 %v2755_v4  ;;  %v188_v4 = vsub.s32 0, %v3188_v51 }
  0x9b   :  { %1516 = vmatmul.mubr.bf16.vlgmr.msra.gmra.mxu1 %v2760_v5  ;;  %1384 = vmatprep.mubr.bf16.mxu0 %v2774_v9  ;;  %v3194_v5 = vld [vmem:[%s3423_s2] sm:$0xf]  ;;  %v192_v9 = vsub.s32 1, %v3188_v51 }
  0x9c   :  { %1525 = vmatprep.mubr.bf16.mxu1 %v2779_v10  ;;  %v3198_v10 = vrot.slane %v3194_v5, %v188_v4 }
  0xa2   :  { %1385 = vmatmul.mubr.bf16.gmra.mxu0 %v2803_v16  ;;  %v3201_v16 = vrot.slane %v3194_v5, %v192_v9 }
  0xa3   :  { %1526 = vmatmul.mubr.bf16.gmra.mxu1 %v2808_v17  ;;  %1394 = vmatprep.mubr.bf16.mxu0 %v2819_v20 }
  0xa4   :  { %1535 = vmatprep.mubr.bf16.mxu1 %v2824_v21 }
  0xaa   :  { %1395 = vmatmul.mubr.bf16.gmra.mxu0 %v2851_v28 }
  0xab   :  { %1536 = vmatmul.mubr.bf16.gmra.mxu1 %v2856_v29  ;;  %1404 = vmatprep.mubr.bf16.mxu0 %v2864_v31 }
  0xac   :  { %1545 = vmatprep.mubr.bf16.mxu1 %v2869_v32 }
  0xb2   :  { %1405 = vmatmul.mubr.bf16.gmra.mxu0 %v2890_v37 }
  0xb3   :  { %1546 = vmatmul.mubr.bf16.gmra.mxu1 %v2895_v38  ;;  %1414 = vmatprep.mubr.bf16.mxu0 %v2903_v40 }
  0xb4   :  { %1555 = vmatprep.mubr.bf16.mxu1 %v2914_v43 }
  0xba   :  { %1415 = vmatmul.mubr.bf16.gmra.mxu0 %v2938_v50 }
  0xbb   :  { %1556 = vmatmul.mubr.bf16.gmra.mxu1 %v2943_v52  ;;  %1424 = vmatprep.mubr.bf16.mxu0 %v2957_v56 }
  0xbc   :  { %1565 = vmatprep.mubr.bf16.mxu1 %v2962_v57 }
  0xc2   :  { %1425 = vmatmul.mubr.bf16.gmra.mxu0 %v2989_v0 }
  0xc3   :  { %1566 = vmatmul.mubr.bf16.gmra.mxu1 %v3000_v3  ;;  %1434 = vmatprep.mubr.bf16.mxu0 %v3005_v6 }
  0xc4   :  { %1575 = vmatprep.mubr.bf16.mxu1 %v3010_v7 }
  0xca   :  { %1435 = vmatmul.mubr.bf16.gmra.mxu0 %v3034_v15 }
  0xcb   :  { %1576 = vmatmul.mubr.bf16.gmra.mxu1 %v3048_v23  ;;  %1444 = vmatprep.mubr.bf16.mxu0 %v3053_v24 }
  0xcc   :  { %1585 = vmatprep.mubr.bf16.mxu1 %v3058_v25 }
  0xd2   :  { %1445 = vmatmul.mubr.bf16.gmra.mxu0 %v3091_v41 }
  0xd3   :  { %1586 = vmatmul.mubr.bf16.gmra.mxu1 %v3096_v42  ;;  %1454 = vmatprep.mubr.bf16.mxu0 %v3101_v44 }
  0xd4   :  { %1595 = vmatprep.mubr.bf16.mxu1 %v3106_v45 }
  0xda   :  { %1455 = vmatmul.mubr.bf16.gmra.mxu0 %v2486_v58 }
  0xdb   :  { %1596 = vmatmul.mubr.bf16.gmra.mxu1 %v2487_v59  ;;  %1464 = vmatprep.mubr.bf16.mxu0 %v2494_v60 }
  0xdc   :  { %1605 = vmatprep.mubr.bf16.mxu1 %v2496_v61 }
  0xe2   :  { %1465 = vmatmul.mubr.bf16.gmra.mxu0 %v2498_v1 }
  0xe3   :  { %1606 = vmatmul.mubr.bf16.gmra.mxu1 %v2499_v2  ;;  %1474 = vmatprep.mubr.bf16.mxu0 %v2051_v8 }
  0xe4   :  { %1615 = vmatprep.mubr.bf16.mxu1 %v2053_v11 }
  0xea   :  { %1475 = vmatmul.mubr.bf16.gmra.mxu0 %v2050_v12 }
  0xeb   :  { %1616 = vmatmul.mubr.bf16.gmra.mxu1 %v2052_v13 }
 0x102   :  { %v1094_v17 = vpop.f32.mrf.mxu0 }
 0x103   :  { %v1235_v20 = vpop.f32.mrf.mxu1  ;;  %v1095_v21 = vadd.f32 %v1094_v17, %v3198_v10 }
 0x104   :  { %v1096_v28 = vpop.f32.mrf.mxu0 }
 0x105   :  { %v1237_v29 = vpop.f32.mrf.mxu1  ;;  %v1236_v31 = vadd.f32 %v1235_v20, %v1095_v21  ;;  %v1097_v32 = vadd.f32 %v1096_v28, %v3201_v16 }
 0x106   :  { %v1098_v37 = vpop.f32.mrf.mxu0 }
 0x107   :  { %v1239_v38 = vpop.f32.mrf.mxu1  ;;  %v1238_v40 = vadd.f32 %v1237_v29, %v1097_v32  ;;  %v1099_v43 = vadd.f32 %v1098_v37, %v3198_v10  ;;  %v1624_v56 = vmax.f32 %v1236_v31, 0.0 }
 0x108   :  { %v1100_v50 = vpop.f32.mrf.mxu0 }
 0x109   :  { %v1241_v52 = vpop.f32.mrf.mxu1  ;;  %v1625_v57 = vmax.f32 %v1238_v40, 0.0  ;;  %v1240_v0 = vadd.f32 %v1239_v38, %v1099_v43  ;;  %v1101_v3 = vadd.f32 %v1100_v50, %v3201_v16 }
 0x10a   :  { %v1104_v6 = vpop.f32.mrf.mxu0 }
 0x10b   :  { %v1245_v7 = vpop.f32.mrf.mxu1  ;;  %v2224_v14 = vpack.c.bf16 %v1625_v57, %v1624_v56  ;;  %v1242_v15 = vadd.f32 %v1241_v52, %v1101_v3  ;;  %v1105_v18 = vadd.f32 %v1104_v6, %v3198_v10  ;;  %v1628_v23 = vmax.f32 %v1240_v0, 0.0 }
 0x10c   :  { %v1106_v19 = vpop.f32.mrf.mxu0 }
 0x10d   :  { %v1247_v22 = vpop.f32.mrf.mxu1  ;;  %1964 = vst [vmem:[%s3424_s3] sm:$0xff] %v2224_v14  ;;  %v1629_v24 = vmax.f32 %v1242_v15, 0.0  ;;  %v1246_v25 = vadd.f32 %v1245_v7, %v1105_v18  ;;  %v1107_v26 = vadd.f32 %v1106_v19, %v3201_v16 }
 0x10e   :  { %v1108_v27 = vpop.f32.mrf.mxu0 }
 0x10f   :  { %v1249_v30 = vpop.f32.mrf.mxu1  ;;  %v2226_v33 = vpack.c.bf16 %v1629_v24, %v1628_v23  ;;  %v1248_v34 = vadd.f32 %v1247_v22, %v1107_v26  ;;  %v1109_v35 = vadd.f32 %v1108_v27, %v3198_v10  ;;  %v1632_v41 = vmax.f32 %v1246_v25, 0.0 }
 0x110   :  { %v1110_v36 = vpop.f32.mrf.mxu0 }
 0x111   :  { %v1251_v39 = vpop.f32.mrf.mxu1  ;;  %1966 = vst [vmem:[%s3424_s3 + $0x10] sm:$0xff] %v2226_v33  ;;  %v1633_v42 = vmax.f32 %v1248_v34, 0.0  ;;  %v1250_v44 = vadd.f32 %v1249_v30, %v1109_v35  ;;  %v1111_v45 = vadd.f32 %v1110_v36, %v3201_v16 }
 0x112   :  { %v1114_v46 = vpop.f32.mrf.mxu0 }
 0x113   :  { %v1255_v47 = vpop.f32.mrf.mxu1  ;;  %v2228_v48 = vpack.c.bf16 %v1633_v42, %v1632_v41  ;;  %v1252_v53 = vadd.f32 %v1251_v39, %v1111_v45  ;;  %v1115_v54 = vadd.f32 %v1114_v46, %v3198_v10  ;;  %v1636_v59 = vmax.f32 %v1250_v44, 0.0 }
 0x114   :  { %v1116_v55 = vpop.f32.mrf.mxu0 }
 0x115   :  { %v1257_v58 = vpop.f32.mrf.mxu1  ;;  %1968 = vst [vmem:[%s3424_s3 + $0x20] sm:$0xff] %v2228_v48  ;;  %v1637_v60 = vmax.f32 %v1252_v53, 0.0  ;;  %v1256_v61 = vadd.f32 %v1255_v47, %v1115_v54  ;;  %v1117_v62 = vadd.f32 %v1116_v55, %v3201_v16 }
 0x116   :  { %v1118_v63 = vpop.f32.mrf.mxu0 }
 0x117   :  { %v1259_v1 = vpop.f32.mrf.mxu1  ;;  %v2230_v2 = vpack.c.bf16 %v1637_v60, %v1636_v59  ;;  %v1258_v8 = vadd.f32 %v1257_v58, %v1117_v62  ;;  %v1119_v11 = vadd.f32 %v1118_v63, %v3198_v10  ;;  %v1640_v49 = vmax.f32 %v1256_v61, 0.0 }
 0x118   :  { %v1120_v12 = vpop.f32.mrf.mxu0 }
 0x119   :  { %v1261_v13 = vpop.f32.mrf.mxu1  ;;  %1970 = vst [vmem:[%s3424_s3 + $0x30] sm:$0xff] %v2230_v2  ;;  %v1641_v4 = vmax.f32 %v1258_v8, 0.0  ;;  %v1260_v9 = vadd.f32 %v1259_v1, %v1119_v11  ;;  %v1121_v17 = vadd.f32 %v1120_v12, %v3201_v16 }
 0x11a   :  { %v1124_v20 = vpop.f32.mrf.mxu0 }
 0x11b   :  { %v1265_v21 = vpop.f32.mrf.mxu1  ;;  %v2232_v28 = vpack.c.bf16 %v1641_v4, %v1640_v49  ;;  %v1262_v29 = vadd.f32 %v1261_v13, %v1121_v17  ;;  %v1125_v31 = vadd.f32 %v1124_v20, %v3198_v10  ;;  %v1644_v38 = vmax.f32 %v1260_v9, 0.0 }
 0x11c   :  { %v1126_v32 = vpop.f32.mrf.mxu0 }
 0x11d   :  { %v1267_v37 = vpop.f32.mrf.mxu1  ;;  %1972 = vst [vmem:[%s3424_s3 + $0x40] sm:$0xff] %v2232_v28  ;;  %v1645_v40 = vmax.f32 %v1262_v29, 0.0  ;;  %v1266_v43 = vadd.f32 %v1265_v21, %v1125_v31  ;;  %v1127_v50 = vadd.f32 %v1126_v32, %v3201_v16 }
 0x11e   :  { %v1128_v52 = vpop.f32.mrf.mxu0 }
 0x11f   :  { %v1269_v56 = vpop.f32.mrf.mxu1  ;;  %v2234_v57 = vpack.c.bf16 %v1645_v40, %v1644_v38  ;;  %v1268_v0 = vadd.f32 %v1267_v37, %v1127_v50  ;;  %v1129_v3 = vadd.f32 %v1128_v52, %v3198_v10  ;;  %v1648_v14 = vmax.f32 %v1266_v43, 0.0 }
 0x120   :  { %v1130_v6 = vpop.f32.mrf.mxu0 }
 0x121   :  { %v1271_v7 = vpop.f32.mrf.mxu1  ;;  %1974 = vst [vmem:[%s3424_s3 + $0x50] sm:$0xff] %v2234_v57  ;;  %v1649_v15 = vmax.f32 %v1268_v0, 0.0  ;;  %v1270_v18 = vadd.f32 %v1269_v56, %v1129_v3  ;;  %v1131_v19 = vadd.f32 %v1130_v6, %v3201_v16 }
 0x122   :  { %v1134_v22 = vpop.f32.mrf.mxu0 }
 0x123   :  { %v1275_v23 = vpop.f32.mrf.mxu1  ;;  %v2236_v24 = vpack.c.bf16 %v1649_v15, %v1648_v14  ;;  %v1272_v25 = vadd.f32 %v1271_v7, %v1131_v19  ;;  %v1135_v26 = vadd.f32 %v1134_v22, %v3198_v10  ;;  %v1652_v33 = vmax.f32 %v1270_v18, 0.0 }
 0x124   :  { %v1136_v27 = vpop.f32.mrf.mxu0 }
 0x125   :  { %v1277_v30 = vpop.f32.mrf.mxu1  ;;  %1976 = vst [vmem:[%s3424_s3 + $0x60] sm:$0xff] %v2236_v24  ;;  %v1653_v34 = vmax.f32 %v1272_v25, 0.0  ;;  %v1276_v35 = vadd.f32 %v1275_v23, %v1135_v26  ;;  %v1137_v36 = vadd.f32 %v1136_v27, %v3201_v16 }
 0x126   :  { %v1138_v39 = vpop.f32.mrf.mxu0 }
 0x127   :  { %v1279_v41 = vpop.f32.mrf.mxu1  ;;  %v2238_v42 = vpack.c.bf16 %v1653_v34, %v1652_v33  ;;  %v1278_v44 = vadd.f32 %v1277_v30, %v1137_v36  ;;  %v1139_v45 = vadd.f32 %v1138_v39, %v3198_v10  ;;  %v1656_v48 = vmax.f32 %v1276_v35, 0.0 }
 0x128   :  { %v1140_v46 = vpop.f32.mrf.mxu0 }
 0x129   :  { %v1281_v47 = vpop.f32.mrf.mxu1  ;;  %1978 = vst [vmem:[%s3424_s3 + $0x70] sm:$0xff] %v2238_v42  ;;  %v1657_v53 = vmax.f32 %v1278_v44, 0.0  ;;  %v1280_v54 = vadd.f32 %v1279_v41, %v1139_v45  ;;  %v1141_v55 = vadd.f32 %v1140_v46, %v3201_v16 }
 0x12a   :  { %v1144_v58 = vpop.f32.mrf.mxu0 }
 0x12b   :  { %v1285_v59 = vpop.f32.mrf.mxu1  ;;  %v2240_v60 = vpack.c.bf16 %v1657_v53, %v1656_v48  ;;  %v1282_v61 = vadd.f32 %v1281_v47, %v1141_v55  ;;  %v1145_v62 = vadd.f32 %v1144_v58, %v3198_v10  ;;  %v1660_v2 = vmax.f32 %v1280_v54, 0.0 }
 0x12c   :  { %v1146_v63 = vpop.f32.mrf.mxu0 }
 0x12d   :  { %v1287_v1 = vpop.f32.mrf.mxu1  ;;  %1980 = vst [vmem:[%s3424_s3 + $0x80] sm:$0xff] %v2240_v60  ;;  %v1661_v8 = vmax.f32 %v1282_v61, 0.0  ;;  %v1286_v11 = vadd.f32 %v1285_v59, %v1145_v62  ;;  %v1147_v12 = vadd.f32 %v1146_v63, %v3201_v16 }
 0x12e   :  { %v1148_v13 = vpop.f32.mrf.mxu0 }
 0x12f   :  { %v1289_v49 = vpop.f32.mrf.mxu1  ;;  %v2242_v4 = vpack.c.bf16 %v1661_v8, %v1660_v2  ;;  %v1288_v9 = vadd.f32 %v1287_v1, %v1147_v12  ;;  %v1149_v17 = vadd.f32 %v1148_v13, %v3198_v10  ;;  %v1664_v28 = vmax.f32 %v1286_v11, 0.0 }
 0x130   :  { %v1150_v20 = vpop.f32.mrf.mxu0 }
 0x131   :  { %v1291_v21 = vpop.f32.mrf.mxu1  ;;  %1982 = vst [vmem:[%s3424_s3 + $0x90] sm:$0xff] %v2242_v4  ;;  %v1665_v29 = vmax.f32 %v1288_v9, 0.0  ;;  %v1290_v31 = vadd.f32 %v1289_v49, %v1149_v17  ;;  %v1151_v32 = vadd.f32 %v1150_v20, %v3201_v16 }
 0x132   :  { %v1154_v37 = vpop.f32.mrf.mxu0 }
 0x133   :  { %v1295_v38 = vpop.f32.mrf.mxu1  ;;  %v2244_v40 = vpack.c.bf16 %v1665_v29, %v1664_v28  ;;  %v1292_v43 = vadd.f32 %v1291_v21, %v1151_v32  ;;  %v1155_v50 = vadd.f32 %v1154_v37, %v3198_v10  ;;  %v1668_v57 = vmax.f32 %v1290_v31, 0.0 }
 0x134   :  { %v1156_v52 = vpop.f32.mrf.mxu0 }
 0x135   :  { %v1297_v56 = vpop.f32.mrf.mxu1  ;;  %1984 = vst [vmem:[%s3424_s3 + $0xa0] sm:$0xff] %v2244_v40  ;;  %v1669_v0 = vmax.f32 %v1292_v43, 0.0  ;;  %v1296_v3 = vadd.f32 %v1295_v38, %v1155_v50  ;;  %v1157_v6 = vadd.f32 %v1156_v52, %v3201_v16 }
 0x136   :  { %v1158_v7 = vpop.f32.mrf.mxu0 }
 0x137   :  { %v1299_v14 = vpop.f32.mrf.mxu1  ;;  %v2246_v15 = vpack.c.bf16 %v1669_v0, %v1668_v57  ;;  %v1298_v18 = vadd.f32 %v1297_v56, %v1157_v6  ;;  %v1159_v19 = vadd.f32 %v1158_v7, %v3198_v10  ;;  %v1672_v24 = vmax.f32 %v1296_v3, 0.0 }
 0x138   :  { %v1160_v22 = vpop.f32.mrf.mxu0 }
 0x139   :  { %v1301_v23 = vpop.f32.mrf.mxu1  ;;  %1986 = vst [vmem:[%s3424_s3 + $0xb0] sm:$0xff] %v2246_v15  ;;  %v1673_v25 = vmax.f32 %v1298_v18, 0.0  ;;  %v1300_v26 = vadd.f32 %v1299_v14, %v1159_v19  ;;  %v1161_v27 = vadd.f32 %v1160_v22, %v3201_v16 }
 0x13a   :  { %v1164_v30 = vpop.f32.mrf.mxu0 }
 0x13b   :  { %v1305_v33 = vpop.f32.mrf.mxu1  ;;  %v2248_v34 = vpack.c.bf16 %v1673_v25, %v1672_v24  ;;  %v1302_v35 = vadd.f32 %v1301_v23, %v1161_v27  ;;  %v1165_v36 = vadd.f32 %v1164_v30, %v3198_v10  ;;  %v1676_v42 = vmax.f32 %v1300_v26, 0.0 }
 0x13c   :  { %v1166_v39 = vpop.f32.mrf.mxu0 }
 0x13d   :  { %v1307_v41 = vpop.f32.mrf.mxu1  ;;  %1988 = vst [vmem:[%s3424_s3 + $0xc0] sm:$0xff] %v2248_v34  ;;  %v1677_v44 = vmax.f32 %v1302_v35, 0.0  ;;  %v1306_v45 = vadd.f32 %v1305_v33, %v1165_v36  ;;  %v1167_v46 = vadd.f32 %v1166_v39, %v3201_v16 }
 0x13e   :  { %v1168_v47 = vpop.f32.mrf.mxu0 }
 0x13f   :  { %v1309_v48 = vpop.f32.mrf.mxu1  ;;  %v2250_v53 = vpack.c.bf16 %v1677_v44, %v1676_v42  ;;  %v1308_v54 = vadd.f32 %v1307_v41, %v1167_v46  ;;  %v1169_v55 = vadd.f32 %v1168_v47, %v3198_v10  ;;  %v1680_v60 = vmax.f32 %v1306_v45, 0.0 }
 0x140   :  { %v1170_v58 = vpop.f32.mrf.mxu0  ;;  %v196_v47 = vsub.s32 2, %v3188_v51 }
 0x141   :  { %v1311_v59 = vpop.f32.mrf.mxu1  ;;  %1990 = vst [vmem:[%s3424_s3 + $0xd0] sm:$0xff] %v2250_v53  ;;  %v1681_v61 = vmax.f32 %v1308_v54, 0.0  ;;  %v1310_v62 = vadd.f32 %v1309_v48, %v1169_v55  ;;  %v1171_v63 = vadd.f32 %v1170_v58, %v3201_v16  ;;  %v200_v54 = vsub.s32 3, %v3188_v51 }
 0x142   :  { %v1174_v1 = vpop.f32.mrf.mxu0 }
 0x143   :  { %v1315_v2 = vpop.f32.mrf.mxu1  ;;  %v2252_v8 = vpack.c.bf16 %v1681_v61, %v1680_v60  ;;  %v1312_v11 = vadd.f32 %v1311_v59, %v1171_v63  ;;  %v1175_v12 = vadd.f32 %v1174_v1, %v3198_v10  ;;  %v1684_v4 = vmax.f32 %v1310_v62, 0.0 }
 0x144   :  { %v1176_v13 = vpop.f32.mrf.mxu0 }
 0x145   :  { %v1317_v49 = vpop.f32.mrf.mxu1  ;;  %1992 = vst [vmem:[%s3424_s3 + $0xe0] sm:$0xff] %v2252_v8  ;;  %v1685_v9 = vmax.f32 %v1312_v11, 0.0  ;;  %v1316_v17 = vadd.f32 %v1315_v2, %v1175_v12  ;;  %v1177_v20 = vadd.f32 %v1176_v13, %v3201_v16  ;;  %v3311_v12 = vrot.slane %v3194_v5, %v200_v54 }
 0x146   :  { %v1178_v21 = vpop.f32.mrf.mxu0 }
 0x147   :  { %v1319_v28 = vpop.f32.mrf.mxu1  ;;  %v2254_v29 = vpack.c.bf16 %v1685_v9, %v1684_v4  ;;  %v1318_v31 = vadd.f32 %v1317_v49, %v1177_v20  ;;  %v1179_v32 = vadd.f32 %v1178_v21, %v3198_v10  ;;  %v1688_v40 = vmax.f32 %v1316_v17, 0.0 }
 0x148   :  { %v1180_v37 = vpop.f32.mrf.mxu0 }
 0x149   :  { %v1321_v38 = vpop.f32.mrf.mxu1  ;;  %1994 = vst [vmem:[%s3424_s3 + $0xf0] sm:$0xff] %v2254_v29  ;;  %v1689_v43 = vmax.f32 %v1318_v31, 0.0  ;;  %v1320_v50 = vadd.f32 %v1319_v28, %v1179_v32  ;;  %v1181_v52 = vadd.f32 %v1180_v37, %v3201_v16 }
 0x14a   :  { %v1184_v56 = vpop.f32.mrf.mxu0 }
 0x14b   :  { %v1325_v57 = vpop.f32.mrf.mxu1  ;;  %v2256_v0 = vpack.c.bf16 %v1689_v43, %v1688_v40  ;;  %v1322_v3 = vadd.f32 %v1321_v38, %v1181_v52  ;;  %v1185_v6 = vadd.f32 %v1184_v56, %v3198_v10  ;;  %v1692_v15 = vmax.f32 %v1320_v50, 0.0 }
 0x14c   :  { %v1186_v7 = vpop.f32.mrf.mxu0 }
 0x14d   :  { %v1327_v14 = vpop.f32.mrf.mxu1  ;;  %1996 = vst [vmem:[%s3424_s3 + $0x100] sm:$0xff] %v2256_v0  ;;  %v1693_v18 = vmax.f32 %v1322_v3, 0.0  ;;  %v1326_v19 = vadd.f32 %v1325_v57, %v1185_v6  ;;  %v1187_v22 = vadd.f32 %v1186_v7, %v3201_v16 }
 0x14e   :  { %v1188_v23 = vpop.f32.mrf.mxu0 }
 0x14f   :  { %v1329_v24 = vpop.f32.mrf.mxu1  ;;  %v2258_v25 = vpack.c.bf16 %v1693_v18, %v1692_v15  ;;  %v1328_v26 = vadd.f32 %v1327_v14, %v1187_v22  ;;  %v1189_v27 = vadd.f32 %v1188_v23, %v3198_v10  ;;  %v1696_v34 = vmax.f32 %v1326_v19, 0.0 }
 0x150   :  { %v1190_v30 = vpop.f32.mrf.mxu0 }
 0x151   :  { %v1331_v33 = vpop.f32.mrf.mxu1  ;;  %1998 = vst [vmem:[%s3424_s3 + $0x110] sm:$0xff] %v2258_v25  ;;  %v1697_v35 = vmax.f32 %v1328_v26, 0.0  ;;  %v1330_v36 = vadd.f32 %v1329_v24, %v1189_v27  ;;  %v1191_v39 = vadd.f32 %v1190_v30, %v3201_v16 }
 0x152   :  { %v1194_v41 = vpop.f32.mrf.mxu0 }
 0x153   :  { %v1335_v42 = vpop.f32.mrf.mxu1  ;;  %v2260_v44 = vpack.c.bf16 %v1697_v35, %v1696_v34  ;;  %v1332_v45 = vadd.f32 %v1331_v33, %v1191_v39  ;;  %v1195_v46 = vadd.f32 %v1194_v41, %v3198_v10  ;;  %v1700_v55 = vmax.f32 %v1330_v36, 0.0 }
 0x154   :  { %v1196_v48 = vpop.f32.mrf.mxu0  ;;  %v3305_v10 = vrot.slane %v3194_v5, %v196_v47 }
 0x155   :  { %v1337_v53 = vpop.f32.mrf.mxu1  ;;  %2000 = vst [vmem:[%s3424_s3 + $0x120] sm:$0xff] %v2260_v44  ;;  %v1701_v58 = vmax.f32 %v1332_v45, 0.0  ;;  %v1336_v59 = vadd.f32 %v1335_v42, %v1195_v46  ;;  %v1197_v60 = vadd.f32 %v1196_v48, %v3201_v16 }
 0x156   :  { %v1198_v61 = vpop.f32.mrf.mxu0 }
 0x157   :  { %v1339_v62 = vpop.f32.mrf.mxu1  ;;  %v2262_v63 = vpack.c.bf16 %v1701_v58, %v1700_v55  ;;  %v1338_v1 = vadd.f32 %v1337_v53, %v1197_v60  ;;  %v1704_v51 = vmax.f32 %v1336_v59, 0.0 }
 0x158   :  { %v1199_v2 = vpop.f32.mrf.mxu0 }
 0x159   :  { %v1340_v8 = vpop.f32.mrf.mxu1  ;;  %2002 = vst [vmem:[%s3424_s3 + $0x130] sm:$0xff] %v2262_v63  ;;  %v1705_v11 = vmax.f32 %v1338_v1, 0.0 }
 0x15a   :  { %v1376_v13 = vpop.f32.mrf.mxu0 }
 0x15b   :  { %v1517_v16 = vpop.f32.mrf.mxu1  ;;  %v2264_v49 = vpack.c.bf16 %v1705_v11, %v1704_v51  ;;  %v1377_v4 = vadd.f32 %v1376_v13, %v3305_v10 }
 0x15c   :  { %v1378_v9 = vpop.f32.mrf.mxu0 }
 0x15d   :  { %v1519_v17 = vpop.f32.mrf.mxu1  ;;  %2004 = vst [vmem:[%s3424_s3 + $0x140] sm:$0xff] %v2264_v49  ;;  %v1518_v20 = vadd.f32 %v1517_v16, %v1377_v4  ;;  %v1379_v21 = vadd.f32 %v1378_v9, %v3311_v12 }
 0x15e   :  { %v1380_v28 = vpop.f32.mrf.mxu0 }
 0x15f   :  { %v1521_v29 = vpop.f32.mrf.mxu1  ;;  %v1520_v31 = vadd.f32 %v1519_v17, %v1379_v21  ;;  %v1381_v5 = vadd.f32 %v1380_v28, %v3305_v10  ;;  %v1626_v38 = vmax.f32 %v1518_v20, 0.0 }
 0x160   :  { %v1382_v32 = vpop.f32.mrf.mxu0 }
 0x161   :  { %v1523_v37 = vpop.f32.mrf.mxu1  ;;  %v1627_v40 = vmax.f32 %v1520_v31, 0.0  ;;  %v1522_v43 = vadd.f32 %v1521_v29, %v1381_v5  ;;  %v1383_v50 = vadd.f32 %v1382_v32, %v3311_v12 }
 0x162   :  { %v1386_v52 = vpop.f32.mrf.mxu0 }
 0x163   :  { %v1527_v56 = vpop.f32.mrf.mxu1  ;;  %v2225_v57 = vpack.c.bf16 %v1627_v40, %v1626_v38  ;;  %v1524_v0 = vadd.f32 %v1523_v37, %v1383_v50  ;;  %v1387_v3 = vadd.f32 %v1386_v52, %v3305_v10  ;;  %v1630_v14 = vmax.f32 %v1522_v43, 0.0 }
 0x164   :  { %v1388_v6 = vpop.f32.mrf.mxu0 }
 0x165   :  { %v1529_v7 = vpop.f32.mrf.mxu1  ;;  %1965 = vst [vmem:[%s3424_s3 + $0x8] sm:$0xff] %v2225_v57  ;;  %v1631_v15 = vmax.f32 %v1524_v0, 0.0  ;;  %v1528_v18 = vadd.f32 %v1527_v56, %v1387_v3  ;;  %v1389_v19 = vadd.f32 %v1388_v6, %v3311_v12 }
 0x166   :  { %v1390_v22 = vpop.f32.mrf.mxu0 }
 0x167   :  { %v1531_v23 = vpop.f32.mrf.mxu1  ;;  %v2227_v24 = vpack.c.bf16 %v1631_v15, %v1630_v14  ;;  %v1530_v25 = vadd.f32 %v1529_v7, %v1389_v19  ;;  %v1391_v26 = vadd.f32 %v1390_v22, %v3305_v10  ;;  %v1634_v33 = vmax.f32 %v1528_v18, 0.0 }
 0x168   :  { %v1392_v27 = vpop.f32.mrf.mxu0 }
 0x169   :  { %v1533_v30 = vpop.f32.mrf.mxu1  ;;  %1967 = vst [vmem:[%s3424_s3 + $0x18] sm:$0xff] %v2227_v24  ;;  %v1635_v34 = vmax.f32 %v1530_v25, 0.0  ;;  %v1532_v35 = vadd.f32 %v1531_v23, %v1391_v26  ;;  %v1393_v36 = vadd.f32 %v1392_v27, %v3311_v12 }
 0x16a   :  { %v1396_v39 = vpop.f32.mrf.mxu0 }
 0x16b   :  { %v1537_v41 = vpop.f32.mrf.mxu1  ;;  %v2229_v42 = vpack.c.bf16 %v1635_v34, %v1634_v33  ;;  %v1534_v44 = vadd.f32 %v1533_v30, %v1393_v36  ;;  %v1397_v45 = vadd.f32 %v1396_v39, %v3305_v10  ;;  %v1638_v48 = vmax.f32 %v1532_v35, 0.0 }
 0x16c   :  { %v1398_v46 = vpop.f32.mrf.mxu0 }
 0x16d   :  { %v1539_v47 = vpop.f32.mrf.mxu1  ;;  %1969 = vst [vmem:[%s3424_s3 + $0x28] sm:$0xff] %v2229_v42  ;;  %v1639_v53 = vmax.f32 %v1534_v44, 0.0  ;;  %v1538_v54 = vadd.f32 %v1537_v41, %v1397_v45  ;;  %v1399_v55 = vadd.f32 %v1398_v46, %v3311_v12 }
 0x16e   :  { %v1400_v58 = vpop.f32.mrf.mxu0 }
 0x16f   :  { %v1541_v59 = vpop.f32.mrf.mxu1  ;;  %v2231_v60 = vpack.c.bf16 %v1639_v53, %v1638_v48  ;;  %v1540_v61 = vadd.f32 %v1539_v47, %v1399_v55  ;;  %v1401_v62 = vadd.f32 %v1400_v58, %v3305_v10  ;;  %v1642_v2 = vmax.f32 %v1538_v54, 0.0 }
 0x170   :  { %v1402_v63 = vpop.f32.mrf.mxu0 }
 0x171   :  { %v1543_v1 = vpop.f32.mrf.mxu1  ;;  %1971 = vst [vmem:[%s3424_s3 + $0x38] sm:$0xff] %v2231_v60  ;;  %v1643_v8 = vmax.f32 %v1540_v61, 0.0  ;;  %v1542_v51 = vadd.f32 %v1541_v59, %v1401_v62  ;;  %v1403_v11 = vadd.f32 %v1402_v63, %v3311_v12 }
 0x172   :  { %v1406_v13 = vpop.f32.mrf.mxu0 }
 0x173   :  { %v1547_v16 = vpop.f32.mrf.mxu1  ;;  %v2233_v49 = vpack.c.bf16 %v1643_v8, %v1642_v2  ;;  %v1544_v4 = vadd.f32 %v1543_v1, %v1403_v11  ;;  %v1407_v9 = vadd.f32 %v1406_v13, %v3305_v10  ;;  %v1646_v21 = vmax.f32 %v1542_v51, 0.0 }
 0x174   :  { %v1408_v17 = vpop.f32.mrf.mxu0 }
 0x175   :  { %v1549_v20 = vpop.f32.mrf.mxu1  ;;  %1973 = vst [vmem:[%s3424_s3 + $0x48] sm:$0xff] %v2233_v49  ;;  %v1647_v28 = vmax.f32 %v1544_v4, 0.0  ;;  %v1548_v29 = vadd.f32 %v1547_v16, %v1407_v9  ;;  %v1409_v31 = vadd.f32 %v1408_v17, %v3311_v12 }
 0x176   :  { %v1410_v5 = vpop.f32.mrf.mxu0 }
 0x177   :  { %v1551_v32 = vpop.f32.mrf.mxu1  ;;  %v2235_v37 = vpack.c.bf16 %v1647_v28, %v1646_v21  ;;  %v1550_v38 = vadd.f32 %v1549_v20, %v1409_v31  ;;  %v1411_v40 = vadd.f32 %v1410_v5, %v3305_v10  ;;  %v1650_v52 = vmax.f32 %v1548_v29, 0.0 }
 0x178   :  { %v1412_v43 = vpop.f32.mrf.mxu0 }
 0x179   :  { %v1553_v50 = vpop.f32.mrf.mxu1  ;;  %1975 = vst [vmem:[%s3424_s3 + $0x58] sm:$0xff] %v2235_v37  ;;  %v1651_v56 = vmax.f32 %v1550_v38, 0.0  ;;  %v1552_v57 = vadd.f32 %v1551_v32, %v1411_v40  ;;  %v1413_v0 = vadd.f32 %v1412_v43, %v3311_v12 }
 0x17a   :  { %v1416_v3 = vpop.f32.mrf.mxu0 }
 0x17b   :  { %v1557_v6 = vpop.f32.mrf.mxu1  ;;  %v2237_v7 = vpack.c.bf16 %v1651_v56, %v1650_v52  ;;  %v1554_v14 = vadd.f32 %v1553_v50, %v1413_v0  ;;  %v1417_v15 = vadd.f32 %v1416_v3, %v3305_v10  ;;  %v1654_v22 = vmax.f32 %v1552_v57, 0.0 }
 0x17c   :  { %v1418_v18 = vpop.f32.mrf.mxu0 }
 0x17d   :  { %v1559_v19 = vpop.f32.mrf.mxu1  ;;  %1977 = vst [vmem:[%s3424_s3 + $0x68] sm:$0xff] %v2237_v7  ;;  %v1655_v23 = vmax.f32 %v1554_v14, 0.0  ;;  %v1558_v24 = vadd.f32 %v1557_v6, %v1417_v15  ;;  %v1419_v25 = vadd.f32 %v1418_v18, %v3311_v12 }
 0x17e   :  { %v1420_v26 = vpop.f32.mrf.mxu0 }
 0x17f   :  { %v1561_v27 = vpop.f32.mrf.mxu1  ;;  %v2239_v30 = vpack.c.bf16 %v1655_v23, %v1654_v22  ;;  %v1560_v33 = vadd.f32 %v1559_v19, %v1419_v25  ;;  %v1421_v34 = vadd.f32 %v1420_v26, %v3305_v10  ;;  %v1658_v39 = vmax.f32 %v1558_v24, 0.0 }
 0x180   :  { %v1422_v35 = vpop.f32.mrf.mxu0 }
 0x181   :  { %v1563_v36 = vpop.f32.mrf.mxu1  ;;  %1979 = vst [vmem:[%s3424_s3 + $0x78] sm:$0xff] %v2239_v30  ;;  %v1659_v41 = vmax.f32 %v1560_v33, 0.0  ;;  %v1562_v42 = vadd.f32 %v1561_v27, %v1421_v34  ;;  %v1423_v44 = vadd.f32 %v1422_v35, %v3311_v12 }
 0x182   :  { %v1426_v45 = vpop.f32.mrf.mxu0 }
 0x183   :  { %v1567_v46 = vpop.f32.mrf.mxu1  ;;  %v2241_v47 = vpack.c.bf16 %v1659_v41, %v1658_v39  ;;  %v1564_v48 = vadd.f32 %v1563_v36, %v1423_v44  ;;  %v1427_v53 = vadd.f32 %v1426_v45, %v3305_v10  ;;  %v1662_v58 = vmax.f32 %v1562_v42, 0.0 }
 0x184   :  { %v1428_v54 = vpop.f32.mrf.mxu0 }
 0x185   :  { %v1569_v55 = vpop.f32.mrf.mxu1  ;;  %1981 = vst [vmem:[%s3424_s3 + $0x88] sm:$0xff] %v2241_v47  ;;  %v1663_v59 = vmax.f32 %v1564_v48, 0.0  ;;  %v1568_v60 = vadd.f32 %v1567_v46, %v1427_v53  ;;  %v1429_v61 = vadd.f32 %v1428_v54, %v3311_v12 }
 0x186   :  { %v1430_v62 = vpop.f32.mrf.mxu0 }
 0x187   :  { %v1571_v63 = vpop.f32.mrf.mxu1  ;;  %v2243_v1 = vpack.c.bf16 %v1663_v59, %v1662_v58  ;;  %v1570_v2 = vadd.f32 %v1569_v55, %v1429_v61  ;;  %v1431_v8 = vadd.f32 %v1430_v62, %v3305_v10  ;;  %v1666_v13 = vmax.f32 %v1568_v60, 0.0 }
 0x188   :  { %v1432_v51 = vpop.f32.mrf.mxu0 }
 0x189   :  { %v1573_v11 = vpop.f32.mrf.mxu1  ;;  %1983 = vst [vmem:[%s3424_s3 + $0x98] sm:$0xff] %v2243_v1  ;;  %v1667_v16 = vmax.f32 %v1570_v2, 0.0  ;;  %v1572_v49 = vadd.f32 %v1571_v63, %v1431_v8  ;;  %v1433_v4 = vadd.f32 %v1432_v51, %v3311_v12 }
 0x18a   :  { %v1436_v9 = vpop.f32.mrf.mxu0 }
 0x18b   :  { %v1577_v17 = vpop.f32.mrf.mxu1  ;;  %v2245_v20 = vpack.c.bf16 %v1667_v16, %v1666_v13  ;;  %v1574_v21 = vadd.f32 %v1573_v11, %v1433_v4  ;;  %v1437_v28 = vadd.f32 %v1436_v9, %v3305_v10  ;;  %v1670_v5 = vmax.f32 %v1572_v49, 0.0 }
 0x18c   :  { %v1438_v29 = vpop.f32.mrf.mxu0 }
 0x18d   :  { %v1579_v31 = vpop.f32.mrf.mxu1  ;;  %1985 = vst [vmem:[%s3424_s3 + $0xa8] sm:$0xff] %v2245_v20  ;;  %v1671_v32 = vmax.f32 %v1574_v21, 0.0  ;;  %v1578_v37 = vadd.f32 %v1577_v17, %v1437_v28  ;;  %v1439_v38 = vadd.f32 %v1438_v29, %v3311_v12 }
 0x18e   :  { %v1440_v40 = vpop.f32.mrf.mxu0 }
 0x18f   :  { %v1581_v43 = vpop.f32.mrf.mxu1  ;;  %v2247_v50 = vpack.c.bf16 %v1671_v32, %v1670_v5  ;;  %v1580_v52 = vadd.f32 %v1579_v31, %v1439_v38  ;;  %v1441_v56 = vadd.f32 %v1440_v40, %v3305_v10  ;;  %v1674_v3 = vmax.f32 %v1578_v37, 0.0 }
 0x190   :  { %v1442_v57 = vpop.f32.mrf.mxu0 }
 0x191   :  { %v1583_v0 = vpop.f32.mrf.mxu1  ;;  %1987 = vst [vmem:[%s3424_s3 + $0xb8] sm:$0xff] %v2247_v50  ;;  %v1675_v6 = vmax.f32 %v1580_v52, 0.0  ;;  %v1582_v7 = vadd.f32 %v1581_v43, %v1441_v56  ;;  %v1443_v14 = vadd.f32 %v1442_v57, %v3311_v12 }
 0x192   :  { %v1446_v15 = vpop.f32.mrf.mxu0 }
 0x193   :  { %v1587_v18 = vpop.f32.mrf.mxu1  ;;  %v2249_v19 = vpack.c.bf16 %v1675_v6, %v1674_v3  ;;  %v1584_v22 = vadd.f32 %v1583_v0, %v1443_v14  ;;  %v1447_v23 = vadd.f32 %v1446_v15, %v3305_v10  ;;  %v1678_v26 = vmax.f32 %v1582_v7, 0.0 }
 0x194   :  { %v1448_v24 = vpop.f32.mrf.mxu0 }
 0x195   :  { %v1589_v25 = vpop.f32.mrf.mxu1  ;;  %1989 = vst [vmem:[%s3424_s3 + $0xc8] sm:$0xff] %v2249_v19  ;;  %v1679_v27 = vmax.f32 %v1584_v22, 0.0  ;;  %v1588_v30 = vadd.f32 %v1587_v18, %v1447_v23  ;;  %v1449_v33 = vadd.f32 %v1448_v24, %v3311_v12 }
 0x196   :  { %v1450_v34 = vpop.f32.mrf.mxu0 }
 0x197   :  { %v1591_v35 = vpop.f32.mrf.mxu1  ;;  %v2251_v36 = vpack.c.bf16 %v1679_v27, %v1678_v26  ;;  %v1590_v39 = vadd.f32 %v1589_v25, %v1449_v33  ;;  %v1451_v41 = vadd.f32 %v1450_v34, %v3305_v10  ;;  %v1682_v45 = vmax.f32 %v1588_v30, 0.0 }
 0x198   :  { %v1452_v42 = vpop.f32.mrf.mxu0 }
 0x199   :  { %v1593_v44 = vpop.f32.mrf.mxu1  ;;  %1991 = vst [vmem:[%s3424_s3 + $0xd8] sm:$0xff] %v2251_v36  ;;  %v1683_v46 = vmax.f32 %v1590_v39, 0.0  ;;  %v1592_v47 = vadd.f32 %v1591_v35, %v1451_v41  ;;  %v1453_v48 = vadd.f32 %v1452_v42, %v3311_v12 }
 0x19a   :  { %v1456_v53 = vpop.f32.mrf.mxu0 }
 0x19b   :  { %v1597_v54 = vpop.f32.mrf.mxu1  ;;  %v2253_v55 = vpack.c.bf16 %v1683_v46, %v1682_v45  ;;  %v1594_v58 = vadd.f32 %v1593_v44, %v1453_v48  ;;  %v1457_v59 = vadd.f32 %v1456_v53, %v3305_v10  ;;  %v1686_v62 = vmax.f32 %v1592_v47, 0.0 }
 0x19c   :  { %v1458_v60 = vpop.f32.mrf.mxu0 }
 0x19d   :  { %v1599_v61 = vpop.f32.mrf.mxu1  ;;  %1993 = vst [vmem:[%s3424_s3 + $0xe8] sm:$0xff] %v2253_v55  ;;  %v1687_v63 = vmax.f32 %v1594_v58, 0.0  ;;  %v1598_v1 = vadd.f32 %v1597_v54, %v1457_v59  ;;  %v1459_v2 = vadd.f32 %v1458_v60, %v3311_v12 }
 0x19e   :  { %v1460_v8 = vpop.f32.mrf.mxu0 }
 0x19f   :  { %v1601_v51 = vpop.f32.mrf.mxu1  ;;  %v2255_v11 = vpack.c.bf16 %v1687_v63, %v1686_v62  ;;  %v1600_v13 = vadd.f32 %v1599_v61, %v1459_v2  ;;  %v1461_v16 = vadd.f32 %v1460_v8, %v3305_v10  ;;  %v1690_v9 = vmax.f32 %v1598_v1, 0.0 }
 0x1a0   :  { %v1462_v49 = vpop.f32.mrf.mxu0 }
 0x1a1   :  { %v1603_v4 = vpop.f32.mrf.mxu1  ;;  %1995 = vst [vmem:[%s3424_s3 + $0xf8] sm:$0xff] %v2255_v11  ;;  %v1691_v17 = vmax.f32 %v1600_v13, 0.0  ;;  %v1602_v20 = vadd.f32 %v1601_v51, %v1461_v16  ;;  %v1463_v21 = vadd.f32 %v1462_v49, %v3311_v12 }
 0x1a2   :  { %v1466_v28 = vpop.f32.mrf.mxu0 }
 0x1a3   :  { %v1607_v29 = vpop.f32.mrf.mxu1  ;;  %v2257_v31 = vpack.c.bf16 %v1691_v17, %v1690_v9  ;;  %v1604_v5 = vadd.f32 %v1603_v4, %v1463_v21  ;;  %v1467_v32 = vadd.f32 %v1466_v28, %v3305_v10  ;;  %v1694_v40 = vmax.f32 %v1602_v20, 0.0 }
 0x1a4   :  { %v1468_v37 = vpop.f32.mrf.mxu0 }
 0x1a5   :  { %v1609_v38 = vpop.f32.mrf.mxu1  ;;  %1997 = vst [vmem:[%s3424_s3 + $0x108] sm:$0xff] %v2257_v31  ;;  %v1695_v43 = vmax.f32 %v1604_v5, 0.0  ;;  %v1608_v50 = vadd.f32 %v1607_v29, %v1467_v32  ;;  %v1469_v52 = vadd.f32 %v1468_v37, %v3311_v12 }
 0x1a6   :  { %v1470_v56 = vpop.f32.mrf.mxu0 }
 0x1a7   :  { %v1611_v57 = vpop.f32.mrf.mxu1  ;;  %v2259_v0 = vpack.c.bf16 %v1695_v43, %v1694_v40  ;;  %v1610_v3 = vadd.f32 %v1609_v38, %v1469_v52  ;;  %v1471_v6 = vadd.f32 %v1470_v56, %v3305_v10  ;;  %v1698_v15 = vmax.f32 %v1608_v50, 0.0 }
 0x1a8   :  { %v1472_v7 = vpop.f32.mrf.mxu0 }
 0x1a9   :  { %v1613_v14 = vpop.f32.mrf.mxu1  ;;  %1999 = vst [vmem:[%s3424_s3 + $0x118] sm:$0xff] %v2259_v0  ;;  %v1699_v18 = vmax.f32 %v1610_v3, 0.0  ;;  %v1612_v19 = vadd.f32 %v1611_v57, %v1471_v6  ;;  %v1473_v22 = vadd.f32 %v1472_v7, %v3311_v12 }
 0x1aa   :  { %v1476_v23 = vpop.f32.mrf.mxu0 }
 0x1ab   :  { %v1617_v24 = vpop.f32.mrf.mxu1  ;;  %v2261_v25 = vpack.c.bf16 %v1699_v18, %v1698_v15  ;;  %v1614_v26 = vadd.f32 %v1613_v14, %v1473_v22  ;;  %v1477_v27 = vadd.f32 %v1476_v23, %v3305_v10  ;;  %v1702_v34 = vmax.f32 %v1612_v19, 0.0 }
 0x1ac   :  { %v1478_v30 = vpop.f32.mrf.mxu0 }
 0x1ad   :  { %v1619_v33 = vpop.f32.mrf.mxu1  ;;  %2001 = vst [vmem:[%s3424_s3 + $0x128] sm:$0xff] %v2261_v25  ;;  %v1703_v35 = vmax.f32 %v1614_v26, 0.0  ;;  %v1618_v36 = vadd.f32 %v1617_v24, %v1477_v27  ;;  %v1479_v39 = vadd.f32 %v1478_v30, %v3311_v12 }
 0x1ae   :  { %v1480_v41 = vpop.f32.mrf.mxu0 }
 0x1af   :  { %v1621_v42 = vpop.f32.mrf.mxu1  ;;  %v2263_v44 = vpack.c.bf16 %v1703_v35, %v1702_v34  ;;  %v1620_v45 = vadd.f32 %v1619_v33, %v1479_v39  ;;  %v1706_v10 = vmax.f32 %v1618_v36, 0.0 }
 0x1b0   :  { %v1481_v46 = vpop.f32.mrf.mxu0 }
 0x1b1   :  { %v1622_v47 = vpop.f32.mrf.mxu1  ;;  %2003 = vst [vmem:[%s3424_s3 + $0x138] sm:$0xff] %v2263_v44  ;;  %v1707_v48 = vmax.f32 %v1620_v45, 0.0 }
 0x1b3   :  { %v2265_v53 = vpack.c.bf16 %v1707_v48, %v1706_v10 }
 0x1b5   :  { %2005 = vst [vmem:[%s3424_s3 + $0x148] sm:$0xff] %v2265_v53 }

// kernel: fc_decoder_forward.14
= control target key start
LH: loop header
LB: loop body
LE: loop exit
PB: predicated region body
PF: predicated region fallthrough
CT: control target
= control target key end

     0   :  { %s3850_s12 = smov 0   ;;  %s3852_s13 = smov 0   ;;  %s4904_s0 = inlined_call_operand.vmem [shape: bf16[592,512], index: 0, kind: input, shape index: {}]   ;;  %s4905_s1 = inlined_call_operand.vmem [shape: bf16[512,512], index: 1, kind: input, shape index: {}]   ;;  %s4906_s2 = inlined_call_operand.vmem [shape: f32[1,512], index: 2, kind: input, shape index: {}]   ;;  %s4907_s3 = inlined_call_operand.vmem [shape: bf16[592,512], index: 3, kind: output, shape index: {}]  }
   0x1   :  { %s3854_s14 = smov 0  }
   0x2 LB: > { %s25_s15 = sadd.s32 1, %s3824_s13  ;;  %p3117_p0 = scmp.ge.s32.totalorder %s3828_s14, 1  ;;  %s3828_s14 = sphi %s3854_s14, %s13_s14   ;;  %s3824_s13 = sphi %s3852_s13, %s4951_s13   ;;  %s3820_s12 = sphi %s3850_s12, %s4950_s12  }
   0x3   : > { %p27_p1 = scmp.ge.s32.totalorder %s25_s15, 2  ;;  %p170_p2 = scmp.lt.s32.totalorder %s3828_s14, 3 }
   0x5   : > { %s4953_s15 = smov (%p27_p1, %s25_s15), 0  ;;  %p171_p3 = pnand %p3117_p0, %p170_p2 }
   0x7   : > { %174 = sbr.rel (%p171_p3) target bundleno = 577 (0x241), region = 32 }
   0xc   : > { %v3502_v0 = vld [vmem:[%s4905_s1 + $0xe4] ss:$16 sps:$4 sm:$0xff]   ;;  %v3506_v2 = vld [vmem:[%s4905_s1 + $0xe0] ss:$16 sps:$4 sm:$0xff]   ;;  %s206_s30 = smul.u32 37, %s3820_s12 }
   0xd   : > { %v3504_v1 = vld [vmem:[%s4905_s1 + $0x2e4] ss:$16 sps:$4 sm:$0xff]   ;;  %1470 = vmatprep.subr.bf16.mxu0 %v3502_v0  ;;  %v3507_v3 = vld [vmem:[%s4905_s1 + $0x2e0] ss:$16 sps:$4 sm:$0xff]  }
   0xe   : > { %1691 = vmatprep.subr.bf16.mxu1 %v3504_v1  ;;  %v3508_v4 = vld [vmem:[%s4905_s1 + $0xc4] ss:$16 sps:$4 sm:$0xff]   ;;  %1471 = vmatpush1.bf16.msra.mxu0 %v3506_v2  ;;  %v3512_v6 = vld [vmem:[%s4905_s1 + $0xc0] ss:$16 sps:$4 sm:$0xff]   ;;  %p208_p4 = scmp.lt.s32.totalorder %s206_s30, 73 }
   0xf   : > { %1692 = vmatpush1.bf16.msra.mxu1 %v3507_v3  ;;  %v3510_v5 = vld [vmem:[%s4905_s1 + $0x2c4] ss:$16 sps:$4 sm:$0xff]   ;;  %1472 = vmatprep.subr.bf16.mxu0 %v3508_v4  ;;  %v3513_v7 = vld [vmem:[%s4905_s1 + $0x2c0] ss:$16 sps:$4 sm:$0xff]   ;;  %v3606_v2 = vld [vmem:[%s4905_s1 + $0xec] ss:$16 sps:$4 sm:$0xff]  }
  0x10   : > { %1693 = vmatprep.subr.bf16.mxu1 %v3510_v5  ;;  %v3514_v8 = vld [vmem:[%s4905_s1 + $0xa4] ss:$16 sps:$4 sm:$0xff]   ;;  %v3518_v10 = vld [vmem:[%s4905_s1 + $0xa0] ss:$16 sps:$4 sm:$0xff]   ;;  %s4955_s30 = smov (!%p208_p4, %s206_s30), 73 }
  0x11   : > { %v3516_v9 = vld [vmem:[%s4905_s1 + $0x2a4] ss:$16 sps:$4 sm:$0xff]   ;;  %v3519_v11 = vld [vmem:[%s4905_s1 + $0x2a0] ss:$16 sps:$4 sm:$0xff]   ;;  %s3402_s5 = sshll.u32 %s4955_s30, 4 }
  0x12   : > { %1473 = vmatpush1.bf16.msra.mxu0 %v3512_v6  ;;  %v3520_v12 = vld [vmem:[%s4905_s1 + $0x84] ss:$16 sps:$4 sm:$0xff]   ;;  %v3524_v14 = vld [vmem:[%s4905_s1 + $0x80] ss:$16 sps:$4 sm:$0xff]   ;;  %s4014_s17 = scalar_lea.vmem %s4904_s0, %s3402_s5  ;;  %v3609_v3 = vld [vmem:[%s4905_s1 + $0x2ec] ss:$16 sps:$4 sm:$0xff]   ;;  %s4617_s19 = scalar_lea.vmem %s4907_s3, %s3402_s5 }
  0x13   : > { %1694 = vmatpush1.bf16.msra.mxu1 %v3513_v7  ;;  %1474 = vmatprep.subr.bf16.mxu0 %v3514_v8  ;;  %v3522_v13 = vld [vmem:[%s4905_s1 + $0x284] ss:$16 sps:$4 sm:$0xff]   ;;  %v3525_v15 = vld [vmem:[%s4905_s1 + $0x280] ss:$16 sps:$4 sm:$0xff]   ;;  %v4035_v51 = vld [vmem:[%s4014_s17 + $0xc] ss:$16 sps:$4 sm:$0xff]  }
  0x14   : > { %1695 = vmatprep.subr.bf16.mxu1 %v3516_v9  ;;  %v3526_v16 = vld [vmem:[%s4905_s1 + $0x64] ss:$16 sps:$4 sm:$0xff]   ;;  %v3530_v18 = vld [vmem:[%s4905_s1 + $0x60] ss:$16 sps:$4 sm:$0xff]   ;;  %1723 = vmatprep.mubr.bf16.mxu1 %v4035_v51  ;;  %v4091_v5 = vld [vmem:[%s4014_s17 + $0x8] ss:$16 sps:$4 sm:$0xff]  }
  0x15   : > { %v3528_v17 = vld [vmem:[%s4905_s1 + $0x264] ss:$16 sps:$4 sm:$0xff]   ;;  %v3531_v19 = vld [vmem:[%s4905_s1 + $0x260] ss:$16 sps:$4 sm:$0xff]   ;;  %v3604_v6 = vld [vmem:[%s4905_s1 + $0xe8] ss:$16 sps:$4 sm:$0xff]  }
  0x16   : > { %1475 = vmatpush1.bf16.msra.mxu0 %v3518_v10  ;;  %v3532_v20 = vld [vmem:[%s4905_s1 + $0x44] ss:$16 sps:$4 sm:$0xff]   ;;  %v3536_v22 = vld [vmem:[%s4905_s1 + $0x40] ss:$16 sps:$4 sm:$0xff]   ;;  %v3607_v7 = vld [vmem:[%s4905_s1 + $0x2e8] ss:$16 sps:$4 sm:$0xff]  }
  0x17   : > { %1696 = vmatpush1.bf16.msra.mxu1 %v3519_v11  ;;  %1476 = vmatprep.subr.bf16.mxu0 %v3520_v12  ;;  %v3534_v21 = vld [vmem:[%s4905_s1 + $0x244] ss:$16 sps:$4 sm:$0xff]   ;;  %v3537_v23 = vld [vmem:[%s4905_s1 + $0x240] ss:$16 sps:$4 sm:$0xff]   ;;  %v4103_v9 = vld [vmem:[%s4014_s17 + $0x2c] ss:$16 sps:$4 sm:$0xff]  }
  0x18   : > { %1697 = vmatprep.subr.bf16.mxu1 %v3522_v13  ;;  %v3538_v24 = vld [vmem:[%s4905_s1 + $0x24] ss:$16 sps:$4 sm:$0xff]   ;;  %v3542_v26 = vld [vmem:[%s4905_s1 + $0x20] ss:$16 sps:$4 sm:$0xff]   ;;  %v3618_v10 = vld [vmem:[%s4905_s1 + $0xcc] ss:$16 sps:$4 sm:$0xff]  }
  0x19   : > { %v3540_v25 = vld [vmem:[%s4905_s1 + $0x224] ss:$16 sps:$4 sm:$0xff]   ;;  %v3543_v27 = vld [vmem:[%s4905_s1 + $0x220] ss:$16 sps:$4 sm:$0xff]   ;;  %v3621_v11 = vld [vmem:[%s4905_s1 + $0x2cc] ss:$16 sps:$4 sm:$0xff]  }
  0x1a   : > { %1477 = vmatpush1.bf16.msra.mxu0 %v3524_v14  ;;  %v3544_v28 = vld [vmem:[%s4905_s1 + $0x4] ss:$16 sps:$4 sm:$0xff]   ;;  %v3548_v30 = vld [vmem:[%s4905_s1] ss:$16 sps:$4 sm:$0xff]   ;;  %v3616_v12 = vld [vmem:[%s4905_s1 + $0xc8] ss:$16 sps:$4 sm:$0xff]  }
  0x1b   : > { %1698 = vmatpush1.bf16.msra.mxu1 %v3525_v15  ;;  %1478 = vmatprep.subr.bf16.mxu0 %v3526_v16  ;;  %v3546_v29 = vld [vmem:[%s4905_s1 + $0x204] ss:$16 sps:$4 sm:$0xff]   ;;  %v3549_v31 = vld [vmem:[%s4905_s1 + $0x200] ss:$16 sps:$4 sm:$0xff]   ;;  %v3619_v13 = vld [vmem:[%s4905_s1 + $0x2c8] ss:$16 sps:$4 sm:$0xff]  }
  0x1c   : > { %1699 = vmatprep.subr.bf16.mxu1 %v3528_v17  ;;  %v3550_v32 = vld [vmem:[%s4905_s1 + $0x1e4] ss:$16 sps:$4 sm:$0xff]   ;;  %v3554_v34 = vld [vmem:[%s4905_s1 + $0x1e0] ss:$16 sps:$4 sm:$0xff]   ;;  %v3630_v14 = vld [vmem:[%s4905_s1 + $0xac] ss:$16 sps:$4 sm:$0xff]  }
  0x1d   : > { %v3552_v33 = vld [vmem:[%s4905_s1 + $0x3e4] ss:$16 sps:$4 sm:$0xff]   ;;  %v3555_v35 = vld [vmem:[%s4905_s1 + $0x3e0] ss:$16 sps:$4 sm:$0xff]   ;;  %v3633_v15 = vld [vmem:[%s4905_s1 + $0x2ac] ss:$16 sps:$4 sm:$0xff]  }
  0x1e   : > { %1479 = vmatpush1.bf16.msra.mxu0 %v3530_v18  ;;  %v3556_v36 = vld [vmem:[%s4905_s1 + $0x1c4] ss:$16 sps:$4 sm:$0xff]   ;;  %v3560_v38 = vld [vmem:[%s4905_s1 + $0x1c0] ss:$16 sps:$4 sm:$0xff]   ;;  %v4131_v17 = vld [vmem:[%s4014_s17 + $0x28] ss:$16 sps:$4 sm:$0xff]  }
  0x1f   : > { %1700 = vmatpush1.bf16.msra.mxu1 %v3531_v19  ;;  %1480 = vmatprep.subr.bf16.mxu0 %v3532_v20  ;;  %v3558_v37 = vld [vmem:[%s4905_s1 + $0x3c4] ss:$16 sps:$4 sm:$0xff]   ;;  %v3561_v39 = vld [vmem:[%s4905_s1 + $0x3c0] ss:$16 sps:$4 sm:$0xff]   ;;  %v4137_v19 = vld [vmem:[%s4014_s17 + $0x4c] ss:$16 sps:$4 sm:$0xff]  }
  0x20   : > { %1701 = vmatprep.subr.bf16.mxu1 %v3534_v21  ;;  %v3562_v40 = vld [vmem:[%s4905_s1 + $0x1a4] ss:$16 sps:$4 sm:$0xff]   ;;  %v3566_v42 = vld [vmem:[%s4905_s1 + $0x1a0] ss:$16 sps:$4 sm:$0xff]   ;;  %v3628_v20 = vld [vmem:[%s4905_s1 + $0xa8] ss:$16 sps:$4 sm:$0xff]  }
  0x21   : > { %v3564_v41 = vld [vmem:[%s4905_s1 + $0x3a4] ss:$16 sps:$4 sm:$0xff]   ;;  %v3567_v43 = vld [vmem:[%s4905_s1 + $0x3a0] ss:$16 sps:$4 sm:$0xff]   ;;  %v3631_v21 = vld [vmem:[%s4905_s1 + $0x2a8] ss:$16 sps:$4 sm:$0xff]  }
  0x22   : > { %1481 = vmatpush1.bf16.msra.mxu0 %v3536_v22  ;;  %v3568_v44 = vld [vmem:[%s4905_s1 + $0x184] ss:$16 sps:$4 sm:$0xff]   ;;  %v3572_v46 = vld [vmem:[%s4905_s1 + $0x180] ss:$16 sps:$4 sm:$0xff]   ;;  %v3642_v22 = vld [vmem:[%s4905_s1 + $0x8c] ss:$16 sps:$4 sm:$0xff]  }
  0x23   : > { %1702 = vmatpush1.bf16.msra.mxu1 %v3537_v23  ;;  %1482 = vmatprep.subr.bf16.mxu0 %v3538_v24  ;;  %v3570_v45 = vld [vmem:[%s4905_s1 + $0x384] ss:$16 sps:$4 sm:$0xff]   ;;  %v3573_v47 = vld [vmem:[%s4905_s1 + $0x380] ss:$16 sps:$4 sm:$0xff]   ;;  %v3649_v23 = vld [vmem:[%s4905_s1 + $0x28c] ss:$16 sps:$4 sm:$0xff]  }
  0x24   : > { %1703 = vmatprep.subr.bf16.mxu1 %v3540_v25  ;;  %v3574_v48 = vld [vmem:[%s4905_s1 + $0x164] ss:$16 sps:$4 sm:$0xff]   ;;  %v3578_v52 = vld [vmem:[%s4905_s1 + $0x160] ss:$16 sps:$4 sm:$0xff]   ;;  %v3640_v24 = vld [vmem:[%s4905_s1 + $0x88] ss:$16 sps:$4 sm:$0xff]  }
  0x25   : > { %v4029_v49 = vld [vmem:[%s4014_s17 + $0x4] ss:$16 sps:$4 sm:$0xff]   ;;  %v3579_v53 = vld [vmem:[%s4905_s1 + $0x360] ss:$16 sps:$4 sm:$0xff]   ;;  %v3647_v25 = vld [vmem:[%s4905_s1 + $0x288] ss:$16 sps:$4 sm:$0xff]  }
  0x26   : > { %1483 = vmatpush1.bf16.msra.mxu0 %v3542_v26  ;;  %v3576_v50 = vld [vmem:[%s4905_s1 + $0x364] ss:$16 sps:$4 sm:$0xff]   ;;  %1502 = vmatprep.mubr.bf16.mxu0 %v4029_v49  ;;  %v3584_v56 = vld [vmem:[%s4905_s1 + $0x140] ss:$16 sps:$4 sm:$0xff]  }
  0x27   : > { %1704 = vmatpush1.bf16.msra.mxu1 %v3543_v27  ;;  %1484 = vmatprep.subr.bf16.mxu0 %v3544_v28  ;;  %v3580_v54 = vld [vmem:[%s4905_s1 + $0x144] ss:$16 sps:$4 sm:$0xff]   ;;  %v3585_v57 = vld [vmem:[%s4905_s1 + $0x340] ss:$16 sps:$4 sm:$0xff]   ;;  %v3654_v27 = vld [vmem:[%s4905_s1 + $0x6c] ss:$16 sps:$4 sm:$0xff]  }
  0x28   : > { %1705 = vmatprep.subr.bf16.mxu1 %v3546_v29  ;;  %v3582_v55 = vld [vmem:[%s4905_s1 + $0x344] ss:$16 sps:$4 sm:$0xff]   ;;  %v3590_v60 = vld [vmem:[%s4905_s1 + $0x120] ss:$16 sps:$4 sm:$0xff]   ;;  %v3663_v28 = vld [vmem:[%s4905_s1 + $0x26c] ss:$16 sps:$4 sm:$0xff]  }
  0x29   : > { %v3586_v58 = vld [vmem:[%s4905_s1 + $0x124] ss:$16 sps:$4 sm:$0xff]   ;;  %v3591_v61 = vld [vmem:[%s4905_s1 + $0x320] ss:$16 sps:$4 sm:$0xff]   ;;  %v4171_v29 = vld [vmem:[%s4014_s17 + $0x48] ss:$16 sps:$4 sm:$0xff]  }
  0x2a   : > { %1485 = vmatpush1.bf16.msra.mxu0 %v3548_v30  ;;  %v3588_v59 = vld [vmem:[%s4905_s1 + $0x324] ss:$16 sps:$4 sm:$0xff]   ;;  %v3596_v0 = vld [vmem:[%s4905_s1 + $0x100] ss:$16 sps:$4 sm:$0xff]  }
  0x2b   : > { %1706 = vmatpush1.bf16.msra.mxu1 %v3549_v31  ;;  %1486 = vmatprep.subr.bf16.mxu0 %v3550_v32  ;;  %v3592_v62 = vld [vmem:[%s4905_s1 + $0x104] ss:$16 sps:$4 sm:$0xff]   ;;  %v3597_v1 = vld [vmem:[%s4905_s1 + $0x300] ss:$16 sps:$4 sm:$0xff]   ;;  %v4177_v31 = vld [vmem:[%s4014_s17 + $0x6c] ss:$16 sps:$4 sm:$0xff]  }
  0x2c   : > { %1707 = vmatprep.subr.bf16.mxu1 %v3552_v33  ;;  %v3594_v63 = vld [vmem:[%s4905_s1 + $0x304] ss:$16 sps:$4 sm:$0xff]   ;;  %v4088_v4 = vld [vmem:[%s4014_s17] ss:$16 sps:$4 sm:$0xff]   ;;  %v3652_v32 = vld [vmem:[%s4905_s1 + $0x68] ss:$16 sps:$4 sm:$0xff]  }
  0x2d   : > { %v4100_v8 = vld [vmem:[%s4014_s17 + $0x24] ss:$16 sps:$4 sm:$0xff]   ;;  %v4128_v16 = vld [vmem:[%s4014_s17 + $0x20] ss:$16 sps:$4 sm:$0xff]   ;;  %v3661_v33 = vld [vmem:[%s4905_s1 + $0x268] ss:$16 sps:$4 sm:$0xff]  }
  0x2e   : > { %1487 = vmatpush2.bf16.msra.mxu0 %v3554_v34  ;;  %v4134_v18 = vld [vmem:[%s4014_s17 + $0x44] ss:$16 sps:$4 sm:$0xff]   ;;  %v4162_v26 = vld [vmem:[%s4014_s17 + $0x40] ss:$16 sps:$4 sm:$0xff]   ;;  %v3672_v34 = vld [vmem:[%s4905_s1 + $0x4c] ss:$16 sps:$4 sm:$0xff]  }
  0x2f   : > { %1708 = vmatpush2.bf16.msra.mxu1 %v3555_v35  ;;  %1488 = vmatprep.subr.bf16.mxu0 %v3556_v36  ;;  %v4174_v30 = vld [vmem:[%s4014_s17 + $0x64] ss:$16 sps:$4 sm:$0xff]   ;;  %v3675_v35 = vld [vmem:[%s4905_s1 + $0x24c] ss:$16 sps:$4 sm:$0xff]   ;;  %v3670_v36 = vld [vmem:[%s4905_s1 + $0x48] ss:$16 sps:$4 sm:$0xff]  }
  0x30   : > { %1709 = vmatprep.subr.bf16.mxu1 %v3558_v37  ;;  %v4199_v37 = vld [vmem:[%s4014_s17 + $0x60] ss:$16 sps:$4 sm:$0xff]  }
  0x32   : > { %1489 = vmatpush2.bf16.msra.mxu0 %v3560_v38  ;;  %v4202_v38 = vld [vmem:[%s4014_s17 + $0x68] ss:$16 sps:$4 sm:$0xff]  }
  0x33   : > { %1710 = vmatpush2.bf16.msra.mxu1 %v3561_v39  ;;  %1490 = vmatprep.subr.bf16.mxu0 %v3562_v40  ;;  %v3673_v39 = vld [vmem:[%s4905_s1 + $0x248] ss:$16 sps:$4 sm:$0xff]   ;;  %v3684_v40 = vld [vmem:[%s4905_s1 + $0x2c] ss:$16 sps:$4 sm:$0xff]  }
  0x34   : > { %1711 = vmatprep.subr.bf16.mxu1 %v3564_v41  ;;  %v3687_v41 = vld [vmem:[%s4905_s1 + $0x22c] ss:$16 sps:$4 sm:$0xff]  }
  0x36   : > { %1491 = vmatpush2.bf16.msra.mxu0 %v3566_v42  ;;  %v4214_v42 = vld [vmem:[%s4014_s17 + $0x84] ss:$16 sps:$4 sm:$0xff]  }
  0x37   : > { %1712 = vmatpush2.bf16.msra.mxu1 %v3567_v43  ;;  %1492 = vmatprep.subr.bf16.mxu0 %v3568_v44  ;;  %v4217_v43 = vld [vmem:[%s4014_s17 + $0x8c] ss:$16 sps:$4 sm:$0xff]   ;;  %v3682_v44 = vld [vmem:[%s4905_s1 + $0x28] ss:$16 sps:$4 sm:$0xff]  }
  0x38   : > { %1713 = vmatprep.subr.bf16.mxu1 %v3570_v45  ;;  %v3685_v45 = vld [vmem:[%s4905_s1 + $0x228] ss:$16 sps:$4 sm:$0xff]  }
  0x3a   : > { %1493 = vmatpush2.bf16.msra.mxu0 %v3572_v46  ;;  %v3696_v46 = vld [vmem:[%s4905_s1 + $0xc] ss:$16 sps:$4 sm:$0xff]  }
  0x3b   : > { %1714 = vmatpush2.bf16.msra.mxu1 %v3573_v47  ;;  %1494 = vmatprep.subr.bf16.mxu0 %v3574_v48  ;;  %v3699_v47 = vld [vmem:[%s4905_s1 + $0x20c] ss:$16 sps:$4 sm:$0xff]   ;;  %v3694_v48 = vld [vmem:[%s4905_s1 + $0x8] ss:$16 sps:$4 sm:$0xff]  }
  0x3c   : > { %1715 = vmatprep.subr.bf16.mxu1 %v3576_v50  ;;  %v3697_v50 = vld [vmem:[%s4905_s1 + $0x208] ss:$16 sps:$4 sm:$0xff]  }
  0x3e   : > { %1495 = vmatpush2.bf16.msra.mxu0 %v3578_v52  ;;  %v4242_v52 = vld [vmem:[%s4014_s17 + $0x80] ss:$16 sps:$4 sm:$0xff]  }
  0x3f   : > { %1716 = vmatpush2.bf16.msra.mxu1 %v3579_v53  ;;  %1496 = vmatprep.subr.bf16.mxu0 %v3580_v54  ;;  %v3708_v53 = vld [vmem:[%s4905_s1 + $0x1ec] ss:$16 sps:$4 sm:$0xff]  }
  0x40   : > { %1717 = vmatprep.subr.bf16.mxu1 %v3582_v55  ;;  %v3711_v54 = vld [vmem:[%s4905_s1 + $0x3ec] ss:$16 sps:$4 sm:$0xff]   ;;  %v4251_v55 = vld [vmem:[%s4014_s17 + $0x88] ss:$16 sps:$4 sm:$0xff]  }
  0x42   : > { %1497 = vmatpush2.bf16.msra.mxu0 %v3584_v56  ;;  %v4254_v56 = vld [vmem:[%s4014_s17 + $0xa4] ss:$16 sps:$4 sm:$0xff]  }
  0x43   : > { %1718 = vmatpush2.bf16.msra.mxu1 %v3585_v57  ;;  %1498 = vmatprep.subr.bf16.mxu0 %v3586_v58  ;;  %v4257_v57 = vld [vmem:[%s4014_s17 + $0xac] ss:$16 sps:$4 sm:$0xff]   ;;  %v3706_v58 = vld [vmem:[%s4905_s1 + $0x1e8] ss:$16 sps:$4 sm:$0xff]  }
  0x44   : > { %1719 = vmatprep.subr.bf16.mxu1 %v3588_v59  ;;  %v3709_v59 = vld [vmem:[%s4905_s1 + $0x3e8] ss:$16 sps:$4 sm:$0xff]  }
  0x46   : > { %1499 = vmatpush2.bf16.msra.mxu0 %v3590_v60  ;;  %v3720_v60 = vld [vmem:[%s4905_s1 + $0x1cc] ss:$16 sps:$4 sm:$0xff]  }
  0x47   : > { %1720 = vmatpush2.bf16.msra.mxu1 %v3591_v61  ;;  %1500 = vmatprep.subr.bf16.mxu0 %v3592_v62  ;;  %v3718_v61 = vld [vmem:[%s4905_s1 + $0x1c8] ss:$16 sps:$4 sm:$0xff]  }
  0x48   : > { %1721 = vmatprep.subr.bf16.mxu1 %v3594_v63  ;;  %v3727_v62 = vld [vmem:[%s4905_s1 + $0x3c8] ss:$16 sps:$4 sm:$0xff]   ;;  %v3729_v63 = vld [vmem:[%s4905_s1 + $0x3cc] ss:$16 sps:$4 sm:$0xff]  }
  0x4a   : > { %1501 = vmatpush2.bf16.msra.mxu0 %v3596_v0  ;;  %v4282_v0 = vld [vmem:[%s4014_s17 + $0xa0] ss:$16 sps:$4 sm:$0xff]  }
  0x4b   : > { %1722 = vmatpush2.bf16.msra.mxu1 %v3597_v1  ;;  %1912 = vmatprep.subr.bf16.mxu0 %v3606_v2  ;;  %v4285_v1 = vld [vmem:[%s4014_s17 + $0xa8] ss:$16 sps:$4 sm:$0xff]   ;;  %v4288_v2 = vld [vmem:[%s4014_s17 + $0xc4] ss:$16 sps:$4 sm:$0xff]  }
  0x4c   : > { %2133 = vmatprep.subr.bf16.mxu1 %v3609_v3  ;;  %v4291_v3 = vld [vmem:[%s4014_s17 + $0xcc] ss:$16 sps:$4 sm:$0xff]  }
  0x4d   : > { %1503 = vmatmul.mubr.bf16.vlgmr.msra.gmra.mxu0 %v4088_v4 }
  0x4e   : > { %1724 = vmatmul.mubr.bf16.vlgmr.msra.gmra.mxu1 %v4091_v5  ;;  %1913 = vmatpush1.bf16.msra.mxu0 %v3604_v6  ;;  %v3736_v6 = vld [vmem:[%s4905_s1 + $0x1ac] ss:$16 sps:$4 sm:$0xff]  }
  0x4f   : > { %2134 = vmatpush1.bf16.msra.mxu1 %v3607_v7  ;;  %1512 = vmatprep.mubr.bf16.mxu0 %v4100_v8  ;;  %v3734_v7 = vld [vmem:[%s4905_s1 + $0x1a8] ss:$16 sps:$4 sm:$0xff]  }
  0x50   : > { %1733 = vmatprep.mubr.bf16.mxu1 %v4103_v9  ;;  %1914 = vmatprep.subr.bf16.mxu0 %v3618_v10  ;;  %v3739_v10 = vld [vmem:[%s4905_s1 + $0x3a8] ss:$16 sps:$4 sm:$0xff]  }
  0x51   : > { %2135 = vmatprep.subr.bf16.mxu1 %v3621_v11  ;;  %v3741_v11 = vld [vmem:[%s4905_s1 + $0x3ac] ss:$16 sps:$4 sm:$0xff]  }
  0x52   : > { %1915 = vmatpush1.bf16.msra.mxu0 %v3616_v12  ;;  %v4310_v12 = vld [vmem:[%s4014_s17 + $0xc0] ss:$16 sps:$4 sm:$0xff]  }
  0x53   : > { %2136 = vmatpush1.bf16.msra.mxu1 %v3619_v13  ;;  %1916 = vmatprep.subr.bf16.mxu0 %v3630_v14  ;;  %v4313_v13 = vld [vmem:[%s4014_s17 + $0xc8] ss:$16 sps:$4 sm:$0xff]   ;;  %v4316_v14 = vld [vmem:[%s4014_s17 + $0xe4] ss:$16 sps:$4 sm:$0xff]  }
  0x54   : > { %2137 = vmatprep.subr.bf16.mxu1 %v3633_v15  ;;  %v3748_v15 = vld [vmem:[%s4905_s1 + $0x188] ss:$16 sps:$4 sm:$0xff]  }
  0x55   : > { %1513 = vmatmul.mubr.bf16.gmra.mxu0 %v4128_v16 }
  0x56   : > { %1734 = vmatmul.mubr.bf16.gmra.mxu1 %v4131_v17  ;;  %1522 = vmatprep.mubr.bf16.mxu0 %v4134_v18 }
  0x57   : > { %1743 = vmatprep.mubr.bf16.mxu1 %v4137_v19  ;;  %1917 = vmatpush1.bf16.msra.mxu0 %v3628_v20  ;;  %v3750_v20 = vld [vmem:[%s4905_s1 + $0x18c] ss:$16 sps:$4 sm:$0xff]  }
  0x58   : > { %2138 = vmatpush1.bf16.msra.mxu1 %v3631_v21  ;;  %1918 = vmatprep.subr.bf16.mxu0 %v3642_v22  ;;  %v3751_v21 = vld [vmem:[%s4905_s1 + $0x388] ss:$16 sps:$4 sm:$0xff]   ;;  %v3753_v22 = vld [vmem:[%s4905_s1 + $0x38c] ss:$16 sps:$4 sm:$0xff]  }
  0x59   : > { %2139 = vmatprep.subr.bf16.mxu1 %v3649_v23  ;;  %v4331_v23 = vld [vmem:[%s4014_s17 + $0xec] ss:$16 sps:$4 sm:$0xff]  }
  0x5b   : > { %1919 = vmatpush1.bf16.msra.mxu0 %v3640_v24  ;;  %v3760_v24 = vld [vmem:[%s4905_s1 + $0x168] ss:$16 sps:$4 sm:$0xff]  }
  0x5c   : > { %2140 = vmatpush1.bf16.msra.mxu1 %v3647_v25  ;;  %1920 = vmatprep.subr.bf16.mxu0 %v3654_v27  ;;  %v3762_v25 = vld [vmem:[%s4905_s1 + $0x16c] ss:$16 sps:$4 sm:$0xff]   ;;  %v3763_v27 = vld [vmem:[%s4905_s1 + $0x368] ss:$16 sps:$4 sm:$0xff]  }
  0x5d   : > { %2141 = vmatprep.subr.bf16.mxu1 %v3663_v28  ;;  %1523 = vmatmul.mubr.bf16.gmra.mxu0 %v4162_v26  ;;  %v3765_v28 = vld [vmem:[%s4905_s1 + $0x36c] ss:$16 sps:$4 sm:$0xff]  }
  0x5e   : > { %1744 = vmatmul.mubr.bf16.gmra.mxu1 %v4171_v29  ;;  %1532 = vmatprep.mubr.bf16.mxu0 %v4174_v30 }
  0x5f   : > { %1753 = vmatprep.mubr.bf16.mxu1 %v4177_v31  ;;  %1921 = vmatpush1.bf16.msra.mxu0 %v3652_v32  ;;  %v4350_v32 = vld [vmem:[%s4014_s17 + $0xe0] ss:$16 sps:$4 sm:$0xff]  }
  0x60   : > { %2142 = vmatpush1.bf16.msra.mxu1 %v3661_v33  ;;  %1922 = vmatprep.subr.bf16.mxu0 %v3672_v34  ;;  %v4353_v33 = vld [vmem:[%s4014_s17 + $0xe8] ss:$16 sps:$4 sm:$0xff]   ;;  %v4356_v34 = vld [vmem:[%s4014_s17 + $0x104] ss:$16 sps:$4 sm:$0xff]  }
  0x61   : > { %2143 = vmatprep.subr.bf16.mxu1 %v3675_v35  ;;  %v4359_v35 = vld [vmem:[%s4014_s17 + $0x10c] ss:$16 sps:$4 sm:$0xff]  }
  0x63   : > { %1923 = vmatpush1.bf16.msra.mxu0 %v3670_v36  ;;  %v3772_v36 = vld [vmem:[%s4905_s1 + $0x148] ss:$16 sps:$4 sm:$0xff]  }
  0x64   : > { %2144 = vmatpush1.bf16.msra.mxu1 %v3673_v39  ;;  %1924 = vmatprep.subr.bf16.mxu0 %v3684_v40  ;;  %v3774_v39 = vld [vmem:[%s4905_s1 + $0x14c] ss:$16 sps:$4 sm:$0xff]   ;;  %v3775_v40 = vld [vmem:[%s4905_s1 + $0x348] ss:$16 sps:$4 sm:$0xff]  }
  0x65   : > { %2145 = vmatprep.subr.bf16.mxu1 %v3687_v41  ;;  %1533 = vmatmul.mubr.bf16.gmra.mxu0 %v4199_v37  ;;  %v3777_v41 = vld [vmem:[%s4905_s1 + $0x34c] ss:$16 sps:$4 sm:$0xff]  }
  0x66   : > { %1754 = vmatmul.mubr.bf16.gmra.mxu1 %v4202_v38  ;;  %1542 = vmatprep.mubr.bf16.mxu0 %v4214_v42 }
  0x67   : > { %1763 = vmatprep.mubr.bf16.mxu1 %v4217_v43  ;;  %1925 = vmatpush1.bf16.msra.mxu0 %v3682_v44  ;;  %v4378_v44 = vld [vmem:[%s4014_s17 + $0x100] ss:$16 sps:$4 sm:$0xff]  }
  0x68   : > { %2146 = vmatpush1.bf16.msra.mxu1 %v3685_v45  ;;  %1926 = vmatprep.subr.bf16.mxu0 %v3696_v46  ;;  %v4381_v45 = vld [vmem:[%s4014_s17 + $0x108] ss:$16 sps:$4 sm:$0xff]  }
  0x69   : > { %2147 = vmatprep.subr.bf16.mxu1 %v3699_v47  ;;  %v3784_v46 = vld [vmem:[%s4905_s1 + $0x128] ss:$16 sps:$4 sm:$0xff]   ;;  %v3786_v47 = vld [vmem:[%s4905_s1 + $0x12c] ss:$16 sps:$4 sm:$0xff]  }
  0x6b   : > { %1927 = vmatpush1.bf16.msra.mxu0 %v3694_v48  ;;  %v4390_v48 = vld [vmem:[%s4014_s17 + $0x124] ss:$16 sps:$4 sm:$0xff]  }
  0x6c   : > { %2148 = vmatpush1.bf16.msra.mxu1 %v3697_v50  ;;  %1928 = vmatprep.subr.bf16.mxu0 %v3708_v53  ;;  %v4393_v50 = vld [vmem:[%s4014_s17 + $0x12c] ss:$16 sps:$4 sm:$0xff]  }
  0x6d   : > { %2149 = vmatprep.subr.bf16.mxu1 %v3711_v54  ;;  %1543 = vmatmul.mubr.bf16.gmra.mxu0 %v4242_v52  ;;  %v3793_v53 = vld [vmem:[%s4905_s1 + $0x32c] ss:$16 sps:$4 sm:$0xff]   ;;  %v3791_v54 = vld [vmem:[%s4905_s1 + $0x328] ss:$16 sps:$4 sm:$0xff]  }
  0x6e   : > { %1764 = vmatmul.mubr.bf16.gmra.mxu1 %v4251_v55  ;;  %1552 = vmatprep.mubr.bf16.mxu0 %v4254_v56 }
  0x6f   : > { %1773 = vmatprep.mubr.bf16.mxu1 %v4257_v57  ;;  %1929 = vmatpush2.bf16.msra.mxu0 %v3706_v58  ;;  %v3798_v58 = vld [vmem:[%s4905_s1 + $0x108] ss:$16 sps:$4 sm:$0xff]  }
  0x70   : > { %2150 = vmatpush2.bf16.msra.mxu1 %v3709_v59  ;;  %1930 = vmatprep.subr.bf16.mxu0 %v3720_v60  ;;  %v3800_v59 = vld [vmem:[%s4905_s1 + $0x10c] ss:$16 sps:$4 sm:$0xff]  }
  0x71   : > { %2151 = vmatprep.subr.bf16.mxu1 %v3729_v63  ;;  %v3805_v60 = vld [vmem:[%s4905_s1 + $0x30c] ss:$16 sps:$4 sm:$0xff]   ;;  %v4421_v63 = vld [vmem:[%s4014_s17 + $0x128] ss:$16 sps:$4 sm:$0xff]  }
  0x73   : > { %1931 = vmatpush2.bf16.msra.mxu0 %v3718_v61  ;;  %v3803_v61 = vld [vmem:[%s4905_s1 + $0x308] ss:$16 sps:$4 sm:$0xff]  }
  0x74   : > { %2152 = vmatpush2.bf16.msra.mxu1 %v3727_v62  ;;  %1932 = vmatprep.subr.bf16.mxu0 %v3736_v6  ;;  %v4418_v62 = vld [vmem:[%s4014_s17 + $0x120] ss:$16 sps:$4 sm:$0xff]   ;;  %v4424_v6 = vld [vmem:[%s4014_s17 + $0x144] ss:$16 sps:$4 sm:$0xff]  }
  0x75   : > { %1553 = vmatmul.mubr.bf16.gmra.mxu0 %v4282_v0  ;;  %2153 = vmatprep.subr.bf16.mxu1 %v3741_v11  ;;  %v4437_v11 = vld [vmem:[%s4014_s17 + $0x148] ss:$16 sps:$4 sm:$0xff]  }
  0x76   : > { %1774 = vmatmul.mubr.bf16.gmra.mxu1 %v4285_v1  ;;  %1562 = vmatprep.mubr.bf16.mxu0 %v4288_v2 }
  0x77   : > { %1783 = vmatprep.mubr.bf16.mxu1 %v4291_v3  ;;  %1933 = vmatpush2.bf16.msra.mxu0 %v3734_v7  ;;  %v4427_v7 = vld [vmem:[%s4014_s17 + $0x14c] ss:$16 sps:$4 sm:$0xff]  }
  0x78   : > { %2154 = vmatpush2.bf16.msra.mxu1 %v3739_v10  ;;  %1934 = vmatprep.subr.bf16.mxu0 %v3750_v20  ;;  %v4434_v10 = vld [vmem:[%s4014_s17 + $0x140] ss:$16 sps:$4 sm:$0xff]   ;;  %v4443_v20 = vld [vmem:[%s4014_s17 + $0x16c] ss:$16 sps:$4 sm:$0xff]  }
  0x79   : > { %2155 = vmatprep.subr.bf16.mxu1 %v3753_v22  ;;  %v4453_v22 = vld [vmem:[%s4014_s17 + $0x168] ss:$16 sps:$4 sm:$0xff]  }
  0x7b   : > { %1935 = vmatpush2.bf16.msra.mxu0 %v3748_v15  ;;  %v4440_v15 = vld [vmem:[%s4014_s17 + $0x164] ss:$16 sps:$4 sm:$0xff]  }
  0x7c   : > { %2156 = vmatpush2.bf16.msra.mxu1 %v3751_v21  ;;  %1936 = vmatprep.subr.bf16.mxu0 %v3762_v25  ;;  %v4450_v21 = vld [vmem:[%s4014_s17 + $0x160] ss:$16 sps:$4 sm:$0xff]   ;;  %v4459_v25 = vld [vmem:[%s4014_s17 + $0x18c] ss:$16 sps:$4 sm:$0xff]  }
  0x7d   : > { %1563 = vmatmul.mubr.bf16.gmra.mxu0 %v4310_v12  ;;  %2157 = vmatprep.subr.bf16.mxu1 %v3765_v28  ;;  %v4469_v28 = vld [vmem:[%s4014_s17 + $0x188] ss:$16 sps:$4 sm:$0xff]  }
  0x7e   : > { %1784 = vmatmul.mubr.bf16.gmra.mxu1 %v4313_v13  ;;  %1572 = vmatprep.mubr.bf16.mxu0 %v4316_v14 }
  0x7f   : > { %1793 = vmatprep.mubr.bf16.mxu1 %v4331_v23  ;;  %1937 = vmatpush2.bf16.msra.mxu0 %v3760_v24  ;;  %v4456_v24 = vld [vmem:[%s4014_s17 + $0x184] ss:$16 sps:$4 sm:$0xff]  }
  0x80   : > { %2158 = vmatpush2.bf16.msra.mxu1 %v3763_v27  ;;  %1938 = vmatprep.subr.bf16.mxu0 %v3774_v39  ;;  %v4466_v27 = vld [vmem:[%s4014_s17 + $0x180] ss:$16 sps:$4 sm:$0xff]   ;;  %v4475_v39 = vld [vmem:[%s4014_s17 + $0x1ac] ss:$16 sps:$4 sm:$0xff]  }
  0x81   : > { %2159 = vmatprep.subr.bf16.mxu1 %v3777_v41  ;;  %v4485_v41 = vld [vmem:[%s4014_s17 + $0x1a8] ss:$16 sps:$4 sm:$0xff]  }
  0x82   : > { %4923 = vst [vmem:[#allocation3_spill] sm:$0xff] %v4485_v41 }
  0x83   : > { %1939 = vmatpush2.bf16.msra.mxu0 %v3772_v36  ;;  %v4472_v36 = vld [vmem:[%s4014_s17 + $0x1a4] ss:$16 sps:$4 sm:$0xff]  }
  0x84   : > { %2160 = vmatpush2.bf16.msra.mxu1 %v3775_v40  ;;  %1940 = vmatprep.subr.bf16.mxu0 %v3786_v47  ;;  %v4482_v40 = vld [vmem:[%s4014_s17 + $0x1a0] ss:$16 sps:$4 sm:$0xff]   ;;  %v4491_v47 = vld [vmem:[%s4014_s17 + $0x1cc] ss:$16 sps:$4 sm:$0xff]  }
  0x85   : > { %1573 = vmatmul.mubr.bf16.gmra.mxu0 %v4350_v32  ;;  %2161 = vmatprep.subr.bf16.mxu1 %v3793_v53  ;;  %4922 = vst [vmem:[#allocation2_spill] sm:$0xff] %v4482_v40  ;;  %4925 = vst [vmem:[#allocation5_spill] sm:$0xff] %v4491_v47  ;;  %v4498_v53 = vld [vmem:[%s4014_s17 + $0x1c0] ss:$16 sps:$4 sm:$0xff]  }
  0x86   : > { %1794 = vmatmul.mubr.bf16.gmra.mxu1 %v4353_v33  ;;  %1582 = vmatprep.mubr.bf16.mxu0 %v4356_v34  ;;  %4926 = vst [vmem:[#allocation6_spill] sm:$0xff] %v4498_v53 }
  0x87   : > { %1803 = vmatprep.mubr.bf16.mxu1 %v4359_v35  ;;  %1941 = vmatpush2.bf16.msra.mxu0 %v3784_v46  ;;  %v4488_v46 = vld [vmem:[%s4014_s17 + $0x1c4] ss:$16 sps:$4 sm:$0xff]  }
  0x88   : > { %2162 = vmatpush2.bf16.msra.mxu1 %v3791_v54  ;;  %1942 = vmatprep.subr.bf16.mxu0 %v3800_v59  ;;  %4924 = vst [vmem:[#allocation4_spill] sm:$0xff] %v4488_v46  ;;  %v4501_v54 = vld [vmem:[%s4014_s17 + $0x1c8] ss:$16 sps:$4 sm:$0xff]   ;;  %v4507_v59 = vld [vmem:[%s4014_s17 + $0x1ec] ss:$16 sps:$4 sm:$0xff]  }
  0x89   : > { %2163 = vmatprep.subr.bf16.mxu1 %v3805_v60  ;;  %4927 = vst [vmem:[#allocation7_spill] sm:$0xff] %v4501_v54  ;;  %4929 = vst [vmem:[#allocation9_spill] sm:$0xff] %v4507_v59  ;;  %v4514_v60 = vld [vmem:[%s4014_s17 + $0x1e0] ss:$16 sps:$4 sm:$0xff]  }
  0x8a   : > { %4930 = vst [vmem:[#allocation10_spill] sm:$0xff] %v4514_v60 }
  0x8b   : > { %1943 = vmatpush2.bf16.msra.mxu0 %v3798_v58  ;;  %v4504_v58 = vld [vmem:[%s4014_s17 + $0x1e4] ss:$16 sps:$4 sm:$0xff]  }
  0x8c   : > { %2164 = vmatpush2.bf16.msra.mxu1 %v3803_v61  ;;  %4928 = vst [vmem:[#allocation8_spill] sm:$0xff] %v4504_v58  ;;  %v4517_v61 = vld [vmem:[%s4014_s17 + $0x1e8] ss:$16 sps:$4 sm:$0xff]  }
  0x8d   : > { %1583 = vmatmul.mubr.bf16.gmra.mxu0 %v4378_v44  ;;  %4931 = vst [vmem:[#allocation11_spill] sm:$0xff] %v4517_v61 }
  0x8e   : > { %1804 = vmatmul.mubr.bf16.gmra.mxu1 %v4381_v45  ;;  %1592 = vmatprep.mubr.bf16.mxu0 %v4390_v48 }
  0x8f   : > { %1813 = vmatprep.mubr.bf16.mxu1 %v4393_v50 }
  0x95   : > { %1593 = vmatmul.mubr.bf16.gmra.mxu0 %v4418_v62 }
  0x96   : > { %1814 = vmatmul.mubr.bf16.gmra.mxu1 %v4421_v63  ;;  %1602 = vmatprep.mubr.bf16.mxu0 %v4424_v6 }
  0x97   : > { %1823 = vmatprep.mubr.bf16.mxu1 %v4427_v7 }
  0x9d   : > { %1603 = vmatmul.mubr.bf16.gmra.mxu0 %v4434_v10 }
  0x9e   : > { %1824 = vmatmul.mubr.bf16.gmra.mxu1 %v4437_v11  ;;  %1612 = vmatprep.mubr.bf16.mxu0 %v4440_v15 }
  0x9f   : > { %1833 = vmatprep.mubr.bf16.mxu1 %v4443_v20 }
  0xa5   : > { %1613 = vmatmul.mubr.bf16.gmra.mxu0 %v4450_v21 }
  0xa6   : > { %1834 = vmatmul.mubr.bf16.gmra.mxu1 %v4453_v22  ;;  %1622 = vmatprep.mubr.bf16.mxu0 %v4456_v24 }
  0xa7   : > { %1843 = vmatprep.mubr.bf16.mxu1 %v4459_v25 }
  0xad   : > { %1623 = vmatmul.mubr.bf16.gmra.mxu0 %v4466_v27 }
  0xae   : > { %1844 = vmatmul.mubr.bf16.gmra.mxu1 %v4469_v28  ;;  %1632 = vmatprep.mubr.bf16.mxu0 %v4472_v36 }
  0xaf   : > { %1853 = vmatprep.mubr.bf16.mxu1 %v4475_v39 }
  0xb5   : > { %1633 = vmatmul.mubr.bf16.gmra.mxu0 %v4482_v40 }
  0xb6   : > { %1854 = vmatmul.mubr.bf16.gmra.mxu1 %v4485_v41  ;;  %1642 = vmatprep.mubr.bf16.mxu0 %v4488_v46  ;;  %v4523_v46 = vld [vmem:[%s4014_s17 + $0x20c] ss:$16 sps:$4 sm:$0xff]  }
  0xb7   : > { %1863 = vmatprep.mubr.bf16.mxu1 %v4491_v47  ;;  %v4520_v47 = vld [vmem:[%s4014_s17 + $0x204] ss:$16 sps:$4 sm:$0xff]   ;;  %4933 = vst [vmem:[#allocation13_spill] sm:$0xff] %v4523_v46 }
  0xb8   : > { %4932 = vst [vmem:[#allocation12_spill] sm:$0xff] %v4520_v47 }
  0xbd   : > { %1643 = vmatmul.mubr.bf16.gmra.mxu0 %v4498_v53  ;;  %v4539_v53 = vld [vmem:[%s4014_s17 + $0x22c] ss:$16 sps:$4 sm:$0xff]  }
  0xbe   : > { %1864 = vmatmul.mubr.bf16.gmra.mxu1 %v4501_v54  ;;  %1652 = vmatprep.mubr.bf16.mxu0 %v4504_v58  ;;  %v4533_v58 = vld [vmem:[%s4014_s17 + $0x208] ss:$16 sps:$4 sm:$0xff]   ;;  %v4536_v54 = vld [vmem:[%s4014_s17 + $0x224] ss:$16 sps:$4 sm:$0xff]   ;;  %4935 = vst [vmem:[#allocation15_spill] sm:$0xff] %v4539_v53 }
  0xbf   : > { %1873 = vmatprep.mubr.bf16.mxu1 %v4507_v59  ;;  %v4530_v59 = vld [vmem:[%s4014_s17 + $0x200] ss:$16 sps:$4 sm:$0xff]   ;;  %4934 = vst [vmem:[#allocation14_spill] sm:$0xff] %v4536_v54 }
  0xc5   : > { %1653 = vmatmul.mubr.bf16.gmra.mxu0 %v4514_v60  ;;  %v4548_v60 = vld [vmem:[%s4014_s17 + $0x220] ss:$16 sps:$4 sm:$0xff]  }
  0xc6   : > { %1874 = vmatmul.mubr.bf16.gmra.mxu1 %v4517_v61  ;;  %1662 = vmatprep.mubr.bf16.mxu0 %v4520_v47  ;;  %v304_v61 = vld [vmem:[%s4014_s17 + $0x240] sm:$0xff]  ;;  %v305_v47 = vld [vmem:[%s4014_s17 + $0x248] sm:$0xff] }
  0xc7   : > { %1883 = vmatprep.mubr.bf16.mxu1 %v4523_v46  ;;  %v4551_v46 = vld [vmem:[%s4014_s17 + $0x228] ss:$16 sps:$4 sm:$0xff]   ;;  %v4553_v41 = vcombine.high %v304_v61, %v304_v61  ;;  %v4555_v40 = vcombine.high %v305_v47, %v305_v47 }
  0xcd   : > { %1663 = vmatmul.mubr.bf16.gmra.mxu0 %v4530_v59 }
  0xce   : > { %1884 = vmatmul.mubr.bf16.gmra.mxu1 %v4533_v58  ;;  %1672 = vmatprep.mubr.bf16.mxu0 %v4536_v54  ;;  %v4561_v54 = vcombine.low %v304_v61, %v304_v61 }
  0xcf   : > { %1893 = vmatprep.mubr.bf16.mxu1 %v4539_v53  ;;  %v4563_v53 = vcombine.low %v305_v47, %v305_v47 }
  0xd5   : > { %1673 = vmatmul.mubr.bf16.gmra.mxu0 %v4548_v60 }
  0xd6   : > { %1894 = vmatmul.mubr.bf16.gmra.mxu1 %v4551_v46  ;;  %1682 = vmatprep.mubr.bf16.mxu0 %v4553_v41 }
  0xd7   : > { %1903 = vmatprep.mubr.bf16.mxu1 %v4555_v40 }
  0xdd   : > { %1683 = vmatmul.mubr.bf16.gmra.mxu0 %v4561_v54 }
  0xde   : > { %1904 = vmatmul.mubr.bf16.gmra.mxu1 %v4563_v53  ;;  %1944 = vmatprep.mubr.bf16.mxu0 %v4029_v49  ;;  %v436_v49 = vlaneseq }
  0xdf   : > { %2165 = vmatprep.mubr.bf16.mxu1 %v4035_v51 }
  0xe0   : > { %v4585_v51 = vshrl.u32 %v436_v49, 7 }
  0xe5   : > { %1945 = vmatmul.mubr.bf16.vlgmr.msra.gmra.mxu0 %v4088_v4  ;;  %v438_v4 = vsub.s32 0, %v4585_v51 }
  0xe6   : > { %2166 = vmatmul.mubr.bf16.vlgmr.msra.gmra.mxu1 %v4091_v5  ;;  %1954 = vmatprep.mubr.bf16.mxu0 %v4100_v8  ;;  %v4595_v5 = vld [vmem:[%s4906_s2] sm:$0xf]  ;;  %v442_v8 = vsub.s32 1, %v4585_v51 }
  0xe7   : > { %2175 = vmatprep.mubr.bf16.mxu1 %v4103_v9  ;;  %v4599_v9 = vrot.slane %v4595_v5, %v438_v4 }
  0xed   : > { %1955 = vmatmul.mubr.bf16.gmra.mxu0 %v4128_v16  ;;  %v4602_v16 = vrot.slane %v4595_v5, %v442_v8 }
  0xee   : > { %2176 = vmatmul.mubr.bf16.gmra.mxu1 %v4131_v17  ;;  %1964 = vmatprep.mubr.bf16.mxu0 %v4134_v18 }
  0xef   : > { %2185 = vmatprep.mubr.bf16.mxu1 %v4137_v19 }
  0xf5   : > { %1965 = vmatmul.mubr.bf16.gmra.mxu0 %v4162_v26 }
  0xf6   : > { %2186 = vmatmul.mubr.bf16.gmra.mxu1 %v4171_v29  ;;  %1974 = vmatprep.mubr.bf16.mxu0 %v4174_v30 }
  0xf7   : > { %2195 = vmatprep.mubr.bf16.mxu1 %v4177_v31 }
  0xfd   : > { %1975 = vmatmul.mubr.bf16.gmra.mxu0 %v4199_v37 }
  0xfe   : > { %2196 = vmatmul.mubr.bf16.gmra.mxu1 %v4202_v38  ;;  %1984 = vmatprep.mubr.bf16.mxu0 %v4214_v42 }
  0xff   : > { %2205 = vmatprep.mubr.bf16.mxu1 %v4217_v43 }
 0x105   : > { %1985 = vmatmul.mubr.bf16.gmra.mxu0 %v4242_v52 }
 0x106   : > { %2206 = vmatmul.mubr.bf16.gmra.mxu1 %v4251_v55  ;;  %1994 = vmatprep.mubr.bf16.mxu0 %v4254_v56 }
 0x107   : > { %2215 = vmatprep.mubr.bf16.mxu1 %v4257_v57 }
 0x10d   : > { %v1504_v17 = vpop.f32.mrf.mxu0  ;;  %1995 = vmatmul.mubr.bf16.gmra.mxu0 %v4282_v0 }
 0x10e   : > { %v1725_v18 = vpop.f32.mrf.mxu1  ;;  %2216 = vmatmul.mubr.bf16.gmra.mxu1 %v4285_v1  ;;  %v1505_v19 = vadd.f32 %v1504_v17, %v4599_v9  ;;  %2004 = vmatprep.mubr.bf16.mxu0 %v4288_v2 }
 0x10f   : > { %2225 = vmatprep.mubr.bf16.mxu1 %v4291_v3  ;;  %v1506_v26 = vpop.f32.mrf.mxu0 }
 0x110   : > { %v1727_v29 = vpop.f32.mrf.mxu1  ;;  %v1726_v30 = vadd.f32 %v1725_v18, %v1505_v19  ;;  %v1507_v31 = vadd.f32 %v1506_v26, %v4602_v16 }
 0x111   : > { %v1508_v37 = vpop.f32.mrf.mxu0 }
 0x112   : > { %v1729_v38 = vpop.f32.mrf.mxu1  ;;  %v1728_v42 = vadd.f32 %v1727_v29, %v1507_v31  ;;  %v1509_v43 = vadd.f32 %v1508_v37, %v4599_v9  ;;  %v2354_v56 = vmax.f32 %v1726_v30, 0.0 }
 0x113   : > { %v1510_v52 = vpop.f32.mrf.mxu0 }
 0x114   : > { %v1731_v55 = vpop.f32.mrf.mxu1  ;;  %v2355_v57 = vmax.f32 %v1728_v42, 0.0  ;;  %v1730_v0 = vadd.f32 %v1729_v38, %v1509_v43  ;;  %v1511_v1 = vadd.f32 %v1510_v52, %v4602_v16 }
 0x115   : > { %v1514_v2 = vpop.f32.mrf.mxu0  ;;  %2005 = vmatmul.mubr.bf16.gmra.mxu0 %v4310_v12 }
 0x116   : > { %v1735_v3 = vpop.f32.mrf.mxu1  ;;  %2226 = vmatmul.mubr.bf16.gmra.mxu1 %v4313_v13  ;;  %v3404_v47 = vpack.c.bf16 %v2355_v57, %v2354_v56  ;;  %v1732_v61 = vadd.f32 %v1731_v55, %v1511_v1  ;;  %v1515_v49 = vadd.f32 %v1514_v2, %v4599_v9  ;;  %2014 = vmatprep.mubr.bf16.mxu0 %v4316_v14  ;;  %v2358_v17 = vmax.f32 %v1730_v0, 0.0 }
 0x117   : > { %2235 = vmatprep.mubr.bf16.mxu1 %v4331_v23  ;;  %v1516_v4 = vpop.f32.mrf.mxu0 }
 0x118   : > { %v1737_v8 = vpop.f32.mrf.mxu1  ;;  %2950 = vst [vmem:[%s4617_s19] sm:$0xff] %v3404_v47  ;;  %v2359_v18 = vmax.f32 %v1732_v61, 0.0  ;;  %v1736_v19 = vadd.f32 %v1735_v3, %v1515_v49  ;;  %v1517_v26 = vadd.f32 %v1516_v4, %v4602_v16 }
 0x119   : > { %v1518_v12 = vpop.f32.mrf.mxu0 }
 0x11a   : > { %v1739_v29 = vpop.f32.mrf.mxu1  ;;  %v3406_v13 = vpack.c.bf16 %v2359_v18, %v2358_v17  ;;  %v1738_v30 = vadd.f32 %v1737_v8, %v1517_v26  ;;  %v1519_v31 = vadd.f32 %v1518_v12, %v4599_v9  ;;  %v2362_v14 = vmax.f32 %v1736_v19, 0.0 }
 0x11b   : > { %v1520_v37 = vpop.f32.mrf.mxu0 }
 0x11c   : > { %v1741_v38 = vpop.f32.mrf.mxu1  ;;  %2952 = vst [vmem:[%s4617_s19 + $0x10] sm:$0xff] %v3406_v13  ;;  %v2363_v23 = vmax.f32 %v1738_v30, 0.0  ;;  %v1740_v42 = vadd.f32 %v1739_v29, %v1519_v31  ;;  %v1521_v43 = vadd.f32 %v1520_v37, %v4602_v16 }
 0x11d   : > { %v1524_v52 = vpop.f32.mrf.mxu0  ;;  %2015 = vmatmul.mubr.bf16.gmra.mxu0 %v4350_v32 }
 0x11e   : > { %v1745_v55 = vpop.f32.mrf.mxu1  ;;  %2236 = vmatmul.mubr.bf16.gmra.mxu1 %v4353_v33  ;;  %v3408_v56 = vpack.c.bf16 %v2363_v23, %v2362_v14  ;;  %v1742_v57 = vadd.f32 %v1741_v38, %v1521_v43  ;;  %v1525_v0 = vadd.f32 %v1524_v52, %v4599_v9  ;;  %2024 = vmatprep.mubr.bf16.mxu0 %v4356_v34  ;;  %v2366_v3 = vmax.f32 %v1740_v42, 0.0 }
 0x11f   : > { %2245 = vmatprep.mubr.bf16.mxu1 %v4359_v35  ;;  %v1526_v1 = vpop.f32.mrf.mxu0 }
 0x120   : > { %v1747_v2 = vpop.f32.mrf.mxu1  ;;  %2954 = vst [vmem:[%s4617_s19 + $0x20] sm:$0xff] %v3408_v56  ;;  %v2367_v47 = vmax.f32 %v1742_v57, 0.0  ;;  %v1746_v61 = vadd.f32 %v1745_v55, %v1525_v0  ;;  %v1527_v49 = vadd.f32 %v1526_v1, %v4602_v16 }
 0x121   : > { %v1528_v32 = vpop.f32.mrf.mxu0 }
 0x122   : > { %v1749_v4 = vpop.f32.mrf.mxu1  ;;  %v3410_v33 = vpack.c.bf16 %v2367_v47, %v2366_v3  ;;  %v1748_v8 = vadd.f32 %v1747_v2, %v1527_v49  ;;  %v1529_v17 = vadd.f32 %v1528_v32, %v4599_v9  ;;  %v2370_v34 = vmax.f32 %v1746_v61, 0.0 }
 0x123   : > { %v1530_v18 = vpop.f32.mrf.mxu0 }
 0x124   : > { %v1751_v19 = vpop.f32.mrf.mxu1  ;;  %2956 = vst [vmem:[%s4617_s19 + $0x30] sm:$0xff] %v3410_v33  ;;  %v2371_v35 = vmax.f32 %v1748_v8, 0.0  ;;  %v1750_v26 = vadd.f32 %v1749_v4, %v1529_v17  ;;  %v1531_v12 = vadd.f32 %v1530_v18, %v4602_v16 }
 0x125   : > { %v1534_v29 = vpop.f32.mrf.mxu0  ;;  %2025 = vmatmul.mubr.bf16.gmra.mxu0 %v4378_v44 }
 0x126   : > { %v1755_v13 = vpop.f32.mrf.mxu1  ;;  %2246 = vmatmul.mubr.bf16.gmra.mxu1 %v4381_v45  ;;  %v3412_v30 = vpack.c.bf16 %v2371_v35, %v2370_v34  ;;  %v1752_v31 = vadd.f32 %v1751_v19, %v1531_v12  ;;  %v1535_v37 = vadd.f32 %v1534_v29, %v4599_v9  ;;  %2034 = vmatprep.mubr.bf16.mxu0 %v4390_v48  ;;  %v2374_v23 = vmax.f32 %v1750_v26, 0.0 }
 0x127   : > { %2255 = vmatprep.mubr.bf16.mxu1 %v4393_v50  ;;  %v1536_v38 = vpop.f32.mrf.mxu0 }
 0x128   : > { %v1757_v14 = vpop.f32.mrf.mxu1  ;;  %2958 = vst [vmem:[%s4617_s19 + $0x40] sm:$0xff] %v3412_v30  ;;  %v2375_v42 = vmax.f32 %v1752_v31, 0.0  ;;  %v1756_v43 = vadd.f32 %v1755_v13, %v1535_v37  ;;  %v1537_v52 = vadd.f32 %v1536_v38, %v4602_v16 }
 0x129   : > { %v1538_v44 = vpop.f32.mrf.mxu0 }
 0x12a   : > { %v1759_v55 = vpop.f32.mrf.mxu1  ;;  %v3414_v45 = vpack.c.bf16 %v2375_v42, %v2374_v23  ;;  %v1758_v56 = vadd.f32 %v1757_v14, %v1537_v52  ;;  %v1539_v57 = vadd.f32 %v1538_v44, %v4599_v9  ;;  %v2378_v48 = vmax.f32 %v1756_v43, 0.0 }
 0x12b   : > { %v1540_v0 = vpop.f32.mrf.mxu0 }
 0x12c   : > { %v1761_v1 = vpop.f32.mrf.mxu1  ;;  %2960 = vst [vmem:[%s4617_s19 + $0x50] sm:$0xff] %v3414_v45  ;;  %v2379_v50 = vmax.f32 %v1758_v56, 0.0  ;;  %v1760_v2 = vadd.f32 %v1759_v55, %v1539_v57  ;;  %v1541_v3 = vadd.f32 %v1540_v0, %v4602_v16 }
 0x12d   : > { %v1544_v47 = vpop.f32.mrf.mxu0  ;;  %2035 = vmatmul.mubr.bf16.gmra.mxu0 %v4418_v62 }
 0x12e   : > { %v1765_v61 = vpop.f32.mrf.mxu1  ;;  %2256 = vmatmul.mubr.bf16.gmra.mxu1 %v4421_v63  ;;  %v3416_v49 = vpack.c.bf16 %v2379_v50, %v2378_v48  ;;  %v1762_v32 = vadd.f32 %v1761_v1, %v1541_v3  ;;  %v1545_v4 = vadd.f32 %v1544_v47, %v4599_v9  ;;  %2044 = vmatprep.mubr.bf16.mxu0 %v4424_v6  ;;  %v2382_v17 = vmax.f32 %v1760_v2, 0.0 }
 0x12f   : > { %2265 = vmatprep.mubr.bf16.mxu1 %v4427_v7  ;;  %v1546_v33 = vpop.f32.mrf.mxu0 }
 0x130   : > { %v1767_v8 = vpop.f32.mrf.mxu1  ;;  %2962 = vst [vmem:[%s4617_s19 + $0x60] sm:$0xff] %v3416_v49  ;;  %v2383_v18 = vmax.f32 %v1762_v32, 0.0  ;;  %v1766_v19 = vadd.f32 %v1765_v61, %v1545_v4  ;;  %v1547_v34 = vadd.f32 %v1546_v33, %v4602_v16 }
 0x131   : > { %v1548_v62 = vpop.f32.mrf.mxu0 }
 0x132   : > { %v1769_v35 = vpop.f32.mrf.mxu1  ;;  %v3418_v63 = vpack.c.bf16 %v2383_v18, %v2382_v17  ;;  %v1768_v26 = vadd.f32 %v1767_v8, %v1547_v34  ;;  %v1549_v12 = vadd.f32 %v1548_v62, %v4599_v9  ;;  %v2386_v6 = vmax.f32 %v1766_v19, 0.0 }
 0x133   : > { %v1550_v29 = vpop.f32.mrf.mxu0 }
 0x134   : > { %v1771_v13 = vpop.f32.mrf.mxu1  ;;  %2964 = vst [vmem:[%s4617_s19 + $0x70] sm:$0xff] %v3418_v63  ;;  %v2387_v7 = vmax.f32 %v1768_v26, 0.0  ;;  %v1770_v30 = vadd.f32 %v1769_v35, %v1549_v12  ;;  %v1551_v31 = vadd.f32 %v1550_v29, %v4602_v16 }
 0x135   : > { %v1554_v37 = vpop.f32.mrf.mxu0  ;;  %2045 = vmatmul.mubr.bf16.gmra.mxu0 %v4434_v10 }
 0x136   : > { %v1775_v38 = vpop.f32.mrf.mxu1  ;;  %2266 = vmatmul.mubr.bf16.gmra.mxu1 %v4437_v11  ;;  %v3420_v14 = vpack.c.bf16 %v2387_v7, %v2386_v6  ;;  %v1772_v23 = vadd.f32 %v1771_v13, %v1551_v31  ;;  %v1555_v42 = vadd.f32 %v1554_v37, %v4599_v9  ;;  %2054 = vmatprep.mubr.bf16.mxu0 %v4440_v15  ;;  %v2390_v44 = vmax.f32 %v1770_v30, 0.0 }
 0x137   : > { %2275 = vmatprep.mubr.bf16.mxu1 %v4443_v20  ;;  %v1556_v43 = vpop.f32.mrf.mxu0 }
 0x138   : > { %v1777_v52 = vpop.f32.mrf.mxu1  ;;  %2966 = vst [vmem:[%s4617_s19 + $0x80] sm:$0xff] %v3420_v14  ;;  %v2391_v55 = vmax.f32 %v1772_v23, 0.0  ;;  %v1776_v45 = vadd.f32 %v1775_v38, %v1555_v42  ;;  %v1557_v56 = vadd.f32 %v1556_v43, %v4602_v16 }
 0x139   : > { %v1558_v10 = vpop.f32.mrf.mxu0 }
 0x13a   : > { %v1779_v57 = vpop.f32.mrf.mxu1  ;;  %v3422_v11 = vpack.c.bf16 %v2391_v55, %v2390_v44  ;;  %v1778_v0 = vadd.f32 %v1777_v52, %v1557_v56  ;;  %v1559_v1 = vadd.f32 %v1558_v10, %v4599_v9  ;;  %v2394_v15 = vmax.f32 %v1776_v45, 0.0 }
 0x13b   : > { %v1560_v48 = vpop.f32.mrf.mxu0 }
 0x13c   : > { %v1781_v50 = vpop.f32.mrf.mxu1  ;;  %2968 = vst [vmem:[%s4617_s19 + $0x90] sm:$0xff] %v3422_v11  ;;  %v2395_v20 = vmax.f32 %v1778_v0, 0.0  ;;  %v1780_v2 = vadd.f32 %v1779_v57, %v1559_v1  ;;  %v1561_v3 = vadd.f32 %v1560_v48, %v4602_v16  ;;  %v4936_v48 = vld [vmem:[#allocation2_spill] sm:$0xff] }
 0x13d   : > { %v1564_v47 = vpop.f32.mrf.mxu0  ;;  %2055 = vmatmul.mubr.bf16.gmra.mxu0 %v4450_v21 }
 0x13e   : > { %v1785_v61 = vpop.f32.mrf.mxu1  ;;  %2276 = vmatmul.mubr.bf16.gmra.mxu1 %v4453_v22  ;;  %v3424_v49 = vpack.c.bf16 %v2395_v20, %v2394_v15  ;;  %v1782_v32 = vadd.f32 %v1781_v50, %v1561_v3  ;;  %v1565_v4 = vadd.f32 %v1564_v47, %v4599_v9  ;;  %2064 = vmatprep.mubr.bf16.mxu0 %v4456_v24  ;;  %v2398_v17 = vmax.f32 %v1780_v2, 0.0  ;;  %v4937_v50 = vld [vmem:[#allocation3_spill] sm:$0xff]  ;;  %v4938_v3 = vld [vmem:[#allocation4_spill] sm:$0xff]  ;;  %v4939_v47 = vld [vmem:[#allocation5_spill] sm:$0xff] }
 0x13f   : > { %2285 = vmatprep.mubr.bf16.mxu1 %v4459_v25  ;;  %v1566_v33 = vpop.f32.mrf.mxu0 }
 0x140   : > { %v1787_v8 = vpop.f32.mrf.mxu1  ;;  %2970 = vst [vmem:[%s4617_s19 + $0xa0] sm:$0xff] %v3424_v49  ;;  %v2399_v18 = vmax.f32 %v1782_v32, 0.0  ;;  %v1786_v19 = vadd.f32 %v1785_v61, %v1565_v4  ;;  %v1567_v34 = vadd.f32 %v1566_v33, %v4602_v16 }
 0x141   : > { %v1568_v21 = vpop.f32.mrf.mxu0 }
 0x142   : > { %v1789_v62 = vpop.f32.mrf.mxu1  ;;  %v3426_v22 = vpack.c.bf16 %v2399_v18, %v2398_v17  ;;  %v1788_v35 = vadd.f32 %v1787_v8, %v1567_v34  ;;  %v1569_v63 = vadd.f32 %v1568_v21, %v4599_v9  ;;  %v2402_v24 = vmax.f32 %v1786_v19, 0.0 }
 0x143   : > { %v1570_v26 = vpop.f32.mrf.mxu0 }
 0x144   : > { %v1791_v12 = vpop.f32.mrf.mxu1  ;;  %2972 = vst [vmem:[%s4617_s19 + $0xb0] sm:$0xff] %v3426_v22  ;;  %v2403_v25 = vmax.f32 %v1788_v35, 0.0  ;;  %v1790_v29 = vadd.f32 %v1789_v62, %v1569_v63  ;;  %v1571_v13 = vadd.f32 %v1570_v26, %v4602_v16 }
 0x145   : > { %v1574_v6 = vpop.f32.mrf.mxu0  ;;  %2065 = vmatmul.mubr.bf16.gmra.mxu0 %v4466_v27 }
 0x146   : > { %v1795_v7 = vpop.f32.mrf.mxu1  ;;  %2286 = vmatmul.mubr.bf16.gmra.mxu1 %v4469_v28  ;;  %v3428_v30 = vpack.c.bf16 %v2403_v25, %v2402_v24  ;;  %v1792_v31 = vadd.f32 %v1791_v12, %v1571_v13  ;;  %v1575_v37 = vadd.f32 %v1574_v6, %v4599_v9  ;;  %2074 = vmatprep.mubr.bf16.mxu0 %v4472_v36  ;;  %v2406_v23 = vmax.f32 %v1790_v29, 0.0  ;;  %v4940_v29 = vld [vmem:[#allocation6_spill] sm:$0xff]  ;;  %v4941_v13 = vld [vmem:[#allocation7_spill] sm:$0xff] }
 0x147   : > { %2295 = vmatprep.mubr.bf16.mxu1 %v4475_v39  ;;  %v1576_v38 = vpop.f32.mrf.mxu0 }
 0x148   : > { %v1797_v14 = vpop.f32.mrf.mxu1  ;;  %2974 = vst [vmem:[%s4617_s19 + $0xc0] sm:$0xff] %v3428_v30  ;;  %v2407_v42 = vmax.f32 %v1792_v31, 0.0  ;;  %v1796_v43 = vadd.f32 %v1795_v7, %v1575_v37  ;;  %v1577_v52 = vadd.f32 %v1576_v38, %v4602_v16  ;;  %v4942_v31 = vld [vmem:[#allocation8_spill] sm:$0xff]  ;;  %v4943_v37 = vld [vmem:[#allocation9_spill] sm:$0xff] }
 0x149   : > { %v1578_v27 = vpop.f32.mrf.mxu0 }
 0x14a   : > { %v1799_v44 = vpop.f32.mrf.mxu1  ;;  %v3430_v28 = vpack.c.bf16 %v2407_v42, %v2406_v23  ;;  %v1798_v55 = vadd.f32 %v1797_v14, %v1577_v52  ;;  %v1579_v45 = vadd.f32 %v1578_v27, %v4599_v9  ;;  %v2410_v36 = vmax.f32 %v1796_v43, 0.0 }
 0x14b   : > { %v1580_v56 = vpop.f32.mrf.mxu0 }
 0x14c   : > { %v1801_v10 = vpop.f32.mrf.mxu1  ;;  %2976 = vst [vmem:[%s4617_s19 + $0xd0] sm:$0xff] %v3430_v28  ;;  %v2411_v39 = vmax.f32 %v1798_v55, 0.0  ;;  %v1800_v57 = vadd.f32 %v1799_v44, %v1579_v45  ;;  %v1581_v11 = vadd.f32 %v1580_v56, %v4602_v16 }
 0x14d   : > { %v1584_v0 = vpop.f32.mrf.mxu0  ;;  %2075 = vmatmul.mubr.bf16.gmra.mxu0 %v4936_v48  ;;  %v4944_v48 = vld [vmem:[#allocation10_spill] sm:$0xff] }
 0x14e   : > { %v1805_v1 = vpop.f32.mrf.mxu1  ;;  %2296 = vmatmul.mubr.bf16.gmra.mxu1 %v4937_v50  ;;  %v3432_v15 = vpack.c.bf16 %v2411_v39, %v2410_v36  ;;  %v1802_v20 = vadd.f32 %v1801_v10, %v1581_v11  ;;  %v1585_v2 = vadd.f32 %v1584_v0, %v4599_v9  ;;  %2084 = vmatprep.mubr.bf16.mxu0 %v4938_v3  ;;  %v2414_v32 = vmax.f32 %v1800_v57, 0.0  ;;  %v4945_v50 = vld [vmem:[#allocation11_spill] sm:$0xff]  ;;  %v4946_v3 = vld [vmem:[#allocation12_spill] sm:$0xff] }
 0x14f   : > { %2305 = vmatprep.mubr.bf16.mxu1 %v4939_v47  ;;  %v1586_v61 = vpop.f32.mrf.mxu0  ;;  %v4947_v47 = vld [vmem:[#allocation13_spill] sm:$0xff] }
 0x150   : > { %v1807_v49 = vpop.f32.mrf.mxu1  ;;  %2978 = vst [vmem:[%s4617_s19 + $0xe0] sm:$0xff] %v3432_v15  ;;  %v2415_v4 = vmax.f32 %v1802_v20, 0.0  ;;  %v1806_v33 = vadd.f32 %v1805_v1, %v1585_v2  ;;  %v1587_v8 = vadd.f32 %v1586_v61, %v4602_v16 }
 0x151   : > { %v1588_v17 = vpop.f32.mrf.mxu0 }
 0x152   : > { %v1809_v18 = vpop.f32.mrf.mxu1  ;;  %v3434_v19 = vpack.c.bf16 %v2415_v4, %v2414_v32  ;;  %v1808_v34 = vadd.f32 %v1807_v49, %v1587_v8  ;;  %v1589_v21 = vadd.f32 %v1588_v17, %v4599_v9  ;;  %v2418_v35 = vmax.f32 %v1806_v33, 0.0 }
 0x153   : > { %v1590_v62 = vpop.f32.mrf.mxu0 }
 0x154   : > { %v1811_v22 = vpop.f32.mrf.mxu1  ;;  %2980 = vst [vmem:[%s4617_s19 + $0xf0] sm:$0xff] %v3434_v19  ;;  %v2419_v63 = vmax.f32 %v1808_v34, 0.0  ;;  %v1810_v26 = vadd.f32 %v1809_v18, %v1589_v21  ;;  %v1591_v12 = vadd.f32 %v1590_v62, %v4602_v16 }
 0x155   : > { %v1594_v24 = vpop.f32.mrf.mxu0  ;;  %2085 = vmatmul.mubr.bf16.gmra.mxu0 %v4940_v29 }
 0x156   : > { %v1815_v25 = vpop.f32.mrf.mxu1  ;;  %2306 = vmatmul.mubr.bf16.gmra.mxu1 %v4941_v13  ;;  %v3436_v6 = vpack.c.bf16 %v2419_v63, %v2418_v35  ;;  %v1812_v7 = vadd.f32 %v1811_v22, %v1591_v12  ;;  %v1595_v30 = vadd.f32 %v1594_v24, %v4599_v9  ;;  %2094 = vmatprep.mubr.bf16.mxu0 %v4942_v31  ;;  %v2422_v23 = vmax.f32 %v1810_v26, 0.0 }
 0x157   : > { %2315 = vmatprep.mubr.bf16.mxu1 %v4943_v37  ;;  %v1596_v38 = vpop.f32.mrf.mxu0 }
 0x158   : > { %v1817_v14 = vpop.f32.mrf.mxu1  ;;  %2982 = vst [vmem:[%s4617_s19 + $0x100] sm:$0xff] %v3436_v6  ;;  %v2423_v42 = vmax.f32 %v1812_v7, 0.0  ;;  %v1816_v43 = vadd.f32 %v1815_v25, %v1595_v30  ;;  %v1597_v52 = vadd.f32 %v1596_v38, %v4602_v16  ;;  %v4948_v7 = vld [vmem:[#allocation14_spill] sm:$0xff]  ;;  %v4949_v30 = vld [vmem:[#allocation15_spill] sm:$0xff] }
 0x159   : > { %v1598_v27 = vpop.f32.mrf.mxu0 }
 0x15a   : > { %v1819_v44 = vpop.f32.mrf.mxu1  ;;  %v3438_v28 = vpack.c.bf16 %v2423_v42, %v2422_v23  ;;  %v1818_v55 = vadd.f32 %v1817_v14, %v1597_v52  ;;  %v1599_v45 = vadd.f32 %v1598_v27, %v4599_v9  ;;  %v2426_v36 = vmax.f32 %v1816_v43, 0.0 }
 0x15b   : > { %v1600_v56 = vpop.f32.mrf.mxu0 }
 0x15c   : > { %v1821_v10 = vpop.f32.mrf.mxu1  ;;  %2984 = vst [vmem:[%s4617_s19 + $0x110] sm:$0xff] %v3438_v28  ;;  %v2427_v39 = vmax.f32 %v1818_v55, 0.0  ;;  %v1820_v57 = vadd.f32 %v1819_v44, %v1599_v45  ;;  %v1601_v11 = vadd.f32 %v1600_v56, %v4602_v16 }
 0x15d   : > { %v1604_v0 = vpop.f32.mrf.mxu0  ;;  %2095 = vmatmul.mubr.bf16.gmra.mxu0 %v4944_v48 }
 0x15e   : > { %v1825_v1 = vpop.f32.mrf.mxu1  ;;  %2316 = vmatmul.mubr.bf16.gmra.mxu1 %v4945_v50  ;;  %v3440_v15 = vpack.c.bf16 %v2427_v39, %v2426_v36  ;;  %v1822_v20 = vadd.f32 %v1821_v10, %v1601_v11  ;;  %v1605_v2 = vadd.f32 %v1604_v0, %v4599_v9  ;;  %2104 = vmatprep.mubr.bf16.mxu0 %v4946_v3  ;;  %v2430_v32 = vmax.f32 %v1820_v57, 0.0 }
 0x15f   : > { %2325 = vmatprep.mubr.bf16.mxu1 %v4947_v47  ;;  %v1606_v61 = vpop.f32.mrf.mxu0 }
 0x160   : > { %v1827_v49 = vpop.f32.mrf.mxu1  ;;  %2986 = vst [vmem:[%s4617_s19 + $0x120] sm:$0xff] %v3440_v15  ;;  %v2431_v4 = vmax.f32 %v1822_v20, 0.0  ;;  %v1826_v33 = vadd.f32 %v1825_v1, %v1605_v2  ;;  %v1607_v8 = vadd.f32 %v1606_v61, %v4602_v16 }
 0x161   : > { %v1608_v17 = vpop.f32.mrf.mxu0 }
 0x162   : > { %v1829_v18 = vpop.f32.mrf.mxu1  ;;  %v3442_v19 = vpack.c.bf16 %v2431_v4, %v2430_v32  ;;  %v1828_v34 = vadd.f32 %v1827_v49, %v1607_v8  ;;  %v1609_v21 = vadd.f32 %v1608_v17, %v4599_v9  ;;  %v2434_v35 = vmax.f32 %v1826_v33, 0.0 }
 0x163   : > { %v1610_v62 = vpop.f32.mrf.mxu0 }
 0x164   : > { %v1831_v22 = vpop.f32.mrf.mxu1  ;;  %2988 = vst [vmem:[%s4617_s19 + $0x130] sm:$0xff] %v3442_v19  ;;  %v2435_v63 = vmax.f32 %v1828_v34, 0.0  ;;  %v1830_v26 = vadd.f32 %v1829_v18, %v1609_v21  ;;  %v1611_v12 = vadd.f32 %v1610_v62, %v4602_v16 }
 0x165   : > { %v1614_v24 = vpop.f32.mrf.mxu0  ;;  %2105 = vmatmul.mubr.bf16.gmra.mxu0 %v4530_v59 }
 0x166   : > { %v1835_v25 = vpop.f32.mrf.mxu1  ;;  %2326 = vmatmul.mubr.bf16.gmra.mxu1 %v4533_v58  ;;  %v3444_v29 = vpack.c.bf16 %v2435_v63, %v2434_v35  ;;  %v1832_v13 = vadd.f32 %v1831_v22, %v1611_v12  ;;  %v1615_v6 = vadd.f32 %v1614_v24, %v4599_v9  ;;  %2114 = vmatprep.mubr.bf16.mxu0 %v4948_v7  ;;  %v2438_v38 = vmax.f32 %v1830_v26, 0.0 }
 0x167   : > { %2335 = vmatprep.mubr.bf16.mxu1 %v4949_v30  ;;  %v1616_v31 = vpop.f32.mrf.mxu0 }
 0x168   : > { %v1837_v37 = vpop.f32.mrf.mxu1  ;;  %2990 = vst [vmem:[%s4617_s19 + $0x140] sm:$0xff] %v3444_v29  ;;  %v2439_v14 = vmax.f32 %v1832_v13, 0.0  ;;  %v1836_v23 = vadd.f32 %v1835_v25, %v1615_v6  ;;  %v1617_v42 = vadd.f32 %v1616_v31, %v4602_v16 }
 0x169   : > { %v1618_v59 = vpop.f32.mrf.mxu0 }
 0x16a   : > { %v1839_v43 = vpop.f32.mrf.mxu1  ;;  %v3446_v58 = vpack.c.bf16 %v2439_v14, %v2438_v38  ;;  %v1838_v52 = vadd.f32 %v1837_v37, %v1617_v42  ;;  %v1619_v27 = vadd.f32 %v1618_v59, %v4599_v9  ;;  %v2442_v55 = vmax.f32 %v1836_v23, 0.0 }
 0x16b   : > { %v1620_v44 = vpop.f32.mrf.mxu0 }
 0x16c   : > { %v1841_v28 = vpop.f32.mrf.mxu1  ;;  %2992 = vst [vmem:[%s4617_s19 + $0x150] sm:$0xff] %v3446_v58  ;;  %v2443_v45 = vmax.f32 %v1838_v52, 0.0  ;;  %v1840_v56 = vadd.f32 %v1839_v43, %v1619_v27  ;;  %v1621_v10 = vadd.f32 %v1620_v44, %v4602_v16 }
 0x16d   : > { %v1624_v36 = vpop.f32.mrf.mxu0  ;;  %2115 = vmatmul.mubr.bf16.gmra.mxu0 %v4548_v60 }
 0x16e   : > { %v1845_v39 = vpop.f32.mrf.mxu1  ;;  %2336 = vmatmul.mubr.bf16.gmra.mxu1 %v4551_v46  ;;  %v3448_v57 = vpack.c.bf16 %v2443_v45, %v2442_v55  ;;  %v1842_v11 = vadd.f32 %v1841_v28, %v1621_v10  ;;  %v1625_v0 = vadd.f32 %v1624_v36, %v4599_v9  ;;  %2124 = vmatprep.mubr.bf16.mxu0 %v4553_v41  ;;  %v2446_v50 = vmax.f32 %v1840_v56, 0.0 }
 0x16f   : > { %2345 = vmatprep.mubr.bf16.mxu1 %v4555_v40  ;;  %v1626_v1 = vpop.f32.mrf.mxu0 }
 0x170   : > { %v1847_v48 = vpop.f32.mrf.mxu1  ;;  %2994 = vst [vmem:[%s4617_s19 + $0x160] sm:$0xff] %v3448_v57  ;;  %v2447_v15 = vmax.f32 %v1842_v11, 0.0  ;;  %v1846_v20 = vadd.f32 %v1845_v39, %v1625_v0  ;;  %v1627_v2 = vadd.f32 %v1626_v1, %v4602_v16 }
 0x171   : > { %v1628_v60 = vpop.f32.mrf.mxu0 }
 0x172   : > { %v1849_v3 = vpop.f32.mrf.mxu1  ;;  %v3450_v46 = vpack.c.bf16 %v2447_v15, %v2446_v50  ;;  %v1848_v47 = vadd.f32 %v1847_v48, %v1627_v2  ;;  %v1629_v61 = vadd.f32 %v1628_v60, %v4599_v9  ;;  %v2450_v32 = vmax.f32 %v1846_v20, 0.0 }
 0x173   : > { %v1630_v49 = vpop.f32.mrf.mxu0 }
 0x174   : > { %v1851_v41 = vpop.f32.mrf.mxu1  ;;  %2996 = vst [vmem:[%s4617_s19 + $0x170] sm:$0xff] %v3450_v46  ;;  %v2451_v40 = vmax.f32 %v1848_v47, 0.0  ;;  %v1850_v4 = vadd.f32 %v1849_v3, %v1629_v61  ;;  %v1631_v33 = vadd.f32 %v1630_v49, %v4602_v16 }
 0x175   : > { %v1634_v8 = vpop.f32.mrf.mxu0  ;;  %2125 = vmatmul.mubr.bf16.gmra.mxu0 %v4561_v54 }
 0x176   : > { %v1855_v17 = vpop.f32.mrf.mxu1  ;;  %2346 = vmatmul.mubr.bf16.gmra.mxu1 %v4563_v53  ;;  %v3452_v18 = vpack.c.bf16 %v2451_v40, %v2450_v32  ;;  %v1852_v19 = vadd.f32 %v1851_v41, %v1631_v33  ;;  %v1635_v34 = vadd.f32 %v1634_v8, %v4599_v9  ;;  %v2454_v22 = vmax.f32 %v1850_v4, 0.0 }
 0x177   : > { %v1636_v21 = vpop.f32.mrf.mxu0 }
 0x178   : > { %v1857_v62 = vpop.f32.mrf.mxu1  ;;  %2998 = vst [vmem:[%s4617_s19 + $0x180] sm:$0xff] %v3452_v18  ;;  %v2455_v35 = vmax.f32 %v1852_v19, 0.0  ;;  %v1856_v63 = vadd.f32 %v1855_v17, %v1635_v34  ;;  %v1637_v26 = vadd.f32 %v1636_v21, %v4602_v16 }
 0x179   : > { %v1638_v12 = vpop.f32.mrf.mxu0 }
 0x17a   : > { %v1859_v24 = vpop.f32.mrf.mxu1  ;;  %v3454_v25 = vpack.c.bf16 %v2455_v35, %v2454_v22  ;;  %v1858_v29 = vadd.f32 %v1857_v62, %v1637_v26  ;;  %v1639_v53 = vadd.f32 %v1638_v12, %v4599_v9  ;;  %v2458_v6 = vmax.f32 %v1856_v63, 0.0 }
 0x17b   : > { %v1640_v54 = vpop.f32.mrf.mxu0 }
 0x17c   : > { %v1861_v13 = vpop.f32.mrf.mxu1  ;;  %3000 = vst [vmem:[%s4617_s19 + $0x190] sm:$0xff] %v3454_v25  ;;  %v2459_v7 = vmax.f32 %v1858_v29, 0.0  ;;  %v1860_v30 = vadd.f32 %v1859_v24, %v1639_v53  ;;  %v1641_v31 = vadd.f32 %v1640_v54, %v4602_v16 }
 0x17d   : > { %v1644_v37 = vpop.f32.mrf.mxu0 }
 0x17e   : > { %v1865_v38 = vpop.f32.mrf.mxu1  ;;  %v3456_v14 = vpack.c.bf16 %v2459_v7, %v2458_v6  ;;  %v1862_v23 = vadd.f32 %v1861_v13, %v1641_v31  ;;  %v1645_v42 = vadd.f32 %v1644_v37, %v4599_v9  ;;  %v2462_v58 = vmax.f32 %v1860_v30, 0.0 }
 0x17f   : > { %v1646_v59 = vpop.f32.mrf.mxu0 }
 0x180   : > { %v1867_v43 = vpop.f32.mrf.mxu1  ;;  %3002 = vst [vmem:[%s4617_s19 + $0x1a0] sm:$0xff] %v3456_v14  ;;  %v2463_v52 = vmax.f32 %v1862_v23, 0.0  ;;  %v1866_v27 = vadd.f32 %v1865_v38, %v1645_v42  ;;  %v1647_v44 = vadd.f32 %v1646_v59, %v4602_v16 }
 0x181   : > { %v1648_v28 = vpop.f32.mrf.mxu0 }
 0x182   : > { %v1869_v55 = vpop.f32.mrf.mxu1  ;;  %v3458_v45 = vpack.c.bf16 %v2463_v52, %v2462_v58  ;;  %v1868_v56 = vadd.f32 %v1867_v43, %v1647_v44  ;;  %v1649_v10 = vadd.f32 %v1648_v28, %v4599_v9  ;;  %v2466_v57 = vmax.f32 %v1866_v27, 0.0 }
 0x183   : > { %v1650_v36 = vpop.f32.mrf.mxu0 }
 0x184   : > { %v1871_v39 = vpop.f32.mrf.mxu1  ;;  %3004 = vst [vmem:[%s4617_s19 + $0x1b0] sm:$0xff] %v3458_v45  ;;  %v2467_v11 = vmax.f32 %v1868_v56, 0.0  ;;  %v1870_v0 = vadd.f32 %v1869_v55, %v1649_v10  ;;  %v1651_v1 = vadd.f32 %v1650_v36, %v4602_v16 }
 0x185   : > { %v1654_v48 = vpop.f32.mrf.mxu0 }
 0x186   : > { %v1875_v50 = vpop.f32.mrf.mxu1  ;;  %v3460_v15 = vpack.c.bf16 %v2467_v11, %v2466_v57  ;;  %v1872_v20 = vadd.f32 %v1871_v39, %v1651_v1  ;;  %v1655_v2 = vadd.f32 %v1654_v48, %v4599_v9  ;;  %v2470_v46 = vmax.f32 %v1870_v0, 0.0 }
 0x187   : > { %v1656_v60 = vpop.f32.mrf.mxu0 }
 0x188   : > { %v1877_v3 = vpop.f32.mrf.mxu1  ;;  %3006 = vst [vmem:[%s4617_s19 + $0x1c0] sm:$0xff] %v3460_v15  ;;  %v2471_v47 = vmax.f32 %v1872_v20, 0.0  ;;  %v1876_v61 = vadd.f32 %v1875_v50, %v1655_v2  ;;  %v1657_v49 = vadd.f32 %v1656_v60, %v4602_v16 }
 0x189   : > { %v1658_v41 = vpop.f32.mrf.mxu0 }
 0x18a   : > { %v1879_v32 = vpop.f32.mrf.mxu1  ;;  %v3462_v40 = vpack.c.bf16 %v2471_v47, %v2470_v46  ;;  %v1878_v4 = vadd.f32 %v1877_v3, %v1657_v49  ;;  %v1659_v33 = vadd.f32 %v1658_v41, %v4599_v9  ;;  %v2474_v18 = vmax.f32 %v1876_v61, 0.0 }
 0x18b   : > { %v1660_v8 = vpop.f32.mrf.mxu0  ;;  %v446_v41 = vsub.s32 2, %v4585_v51 }
 0x18c   : > { %v1881_v17 = vpop.f32.mrf.mxu1  ;;  %3008 = vst [vmem:[%s4617_s19 + $0x1d0] sm:$0xff] %v3462_v40  ;;  %v2475_v19 = vmax.f32 %v1878_v4, 0.0  ;;  %v1880_v34 = vadd.f32 %v1879_v32, %v1659_v33  ;;  %v1661_v21 = vadd.f32 %v1660_v8, %v4602_v16  ;;  %v450_v4 = vsub.s32 3, %v4585_v51 }
 0x18d   : > { %v1664_v62 = vpop.f32.mrf.mxu0 }
 0x18e   : > { %v1885_v22 = vpop.f32.mrf.mxu1  ;;  %v3464_v35 = vpack.c.bf16 %v2475_v19, %v2474_v18  ;;  %v1882_v63 = vadd.f32 %v1881_v17, %v1661_v21  ;;  %v1665_v26 = vadd.f32 %v1664_v62, %v4599_v9  ;;  %v2478_v25 = vmax.f32 %v1880_v34, 0.0 }
 0x18f   : > { %v1666_v12 = vpop.f32.mrf.mxu0  ;;  %v4781_v51 = vrot.slane %v4595_v5, %v450_v4 }
 0x190   : > { %v1887_v24 = vpop.f32.mrf.mxu1  ;;  %3010 = vst [vmem:[%s4617_s19 + $0x1e0] sm:$0xff] %v3464_v35  ;;  %v2479_v29 = vmax.f32 %v1882_v63, 0.0  ;;  %v1886_v53 = vadd.f32 %v1885_v22, %v1665_v26  ;;  %v1667_v54 = vadd.f32 %v1666_v12, %v4602_v16 }
 0x191   : > { %v1668_v13 = vpop.f32.mrf.mxu0 }
 0x192   : > { %v1889_v6 = vpop.f32.mrf.mxu1  ;;  %v3466_v7 = vpack.c.bf16 %v2479_v29, %v2478_v25  ;;  %v1888_v30 = vadd.f32 %v1887_v24, %v1667_v54  ;;  %v1669_v31 = vadd.f32 %v1668_v13, %v4599_v9  ;;  %v2482_v14 = vmax.f32 %v1886_v53, 0.0 }
 0x193   : > { %v1670_v37 = vpop.f32.mrf.mxu0 }
 0x194   : > { %v1891_v38 = vpop.f32.mrf.mxu1  ;;  %3012 = vst [vmem:[%s4617_s19 + $0x1f0] sm:$0xff] %v3466_v7  ;;  %v2483_v23 = vmax.f32 %v1888_v30, 0.0  ;;  %v1890_v42 = vadd.f32 %v1889_v6, %v1669_v31  ;;  %v1671_v59 = vadd.f32 %v1670_v37, %v4602_v16 }
 0x195   : > { %v1674_v43 = vpop.f32.mrf.mxu0 }
 0x196   : > { %v1895_v58 = vpop.f32.mrf.mxu1  ;;  %v3468_v52 = vpack.c.bf16 %v2483_v23, %v2482_v14  ;;  %v1892_v27 = vadd.f32 %v1891_v38, %v1671_v59  ;;  %v1675_v44 = vadd.f32 %v1674_v43, %v4599_v9  ;;  %v2486_v45 = vmax.f32 %v1890_v42, 0.0 }
 0x197   : > { %v1676_v28 = vpop.f32.mrf.mxu0 }
 0x198   : > { %v1897_v55 = vpop.f32.mrf.mxu1  ;;  %3014 = vst [vmem:[%s4617_s19 + $0x200] sm:$0xff] %v3468_v52  ;;  %v2487_v56 = vmax.f32 %v1892_v27, 0.0  ;;  %v1896_v10 = vadd.f32 %v1895_v58, %v1675_v44  ;;  %v1677_v36 = vadd.f32 %v1676_v28, %v4602_v16 }
 0x199   : > { %v1678_v39 = vpop.f32.mrf.mxu0 }
 0x19a   : > { %v1899_v57 = vpop.f32.mrf.mxu1  ;;  %v3470_v11 = vpack.c.bf16 %v2487_v56, %v2486_v45  ;;  %v1898_v0 = vadd.f32 %v1897_v55, %v1677_v36  ;;  %v1679_v1 = vadd.f32 %v1678_v39, %v4599_v9  ;;  %v2490_v15 = vmax.f32 %v1896_v10, 0.0 }
 0x19b   : > { %v1680_v48 = vpop.f32.mrf.mxu0 }
 0x19c   : > { %v1901_v50 = vpop.f32.mrf.mxu1  ;;  %3016 = vst [vmem:[%s4617_s19 + $0x210] sm:$0xff] %v3470_v11  ;;  %v2491_v20 = vmax.f32 %v1898_v0, 0.0  ;;  %v1900_v2 = vadd.f32 %v1899_v57, %v1679_v1  ;;  %v1681_v60 = vadd.f32 %v1680_v48, %v4602_v16 }
 0x19d   : > { %v1684_v3 = vpop.f32.mrf.mxu0 }
 0x19e   : > { %v1905_v46 = vpop.f32.mrf.mxu1  ;;  %v3472_v47 = vpack.c.bf16 %v2491_v20, %v2490_v15  ;;  %v1902_v61 = vadd.f32 %v1901_v50, %v1681_v60  ;;  %v1685_v49 = vadd.f32 %v1684_v3, %v4599_v9  ;;  %v2494_v33 = vmax.f32 %v1900_v2, 0.0 }
 0x19f   : > { %v1686_v32 = vpop.f32.mrf.mxu0  ;;  %v4777_v9 = vrot.slane %v4595_v5, %v446_v41 }
 0x1a0   : > { %v1907_v40 = vpop.f32.mrf.mxu1  ;;  %3018 = vst [vmem:[%s4617_s19 + $0x220] sm:$0xff] %v3472_v47  ;;  %v2495_v8 = vmax.f32 %v1902_v61, 0.0  ;;  %v1906_v17 = vadd.f32 %v1905_v46, %v1685_v49  ;;  %v1687_v18 = vadd.f32 %v1686_v32, %v4602_v16 }
 0x1a1   : > { %v1688_v19 = vpop.f32.mrf.mxu0 }
 0x1a2   : > { %v1909_v34 = vpop.f32.mrf.mxu1  ;;  %v3474_v21 = vpack.c.bf16 %v2495_v8, %v2494_v33  ;;  %v1908_v62 = vadd.f32 %v1907_v40, %v1687_v18  ;;  %v2498_v63 = vmax.f32 %v1906_v17, 0.0 }
 0x1a3   : > { %v1689_v22 = vpop.f32.mrf.mxu0 }
 0x1a4   : > { %v1910_v35 = vpop.f32.mrf.mxu1  ;;  %3020 = vst [vmem:[%s4617_s19 + $0x230] sm:$0xff] %v3474_v21  ;;  %v2499_v26 = vmax.f32 %v1908_v62, 0.0 }
 0x1a5   : > { %v1946_v12 = vpop.f32.mrf.mxu0 }
 0x1a6   : > { %v2167_v24 = vpop.f32.mrf.mxu1  ;;  %v3476_v25 = vpack.c.bf16 %v2499_v26, %v2498_v63  ;;  %v1947_v16 = vadd.f32 %v1946_v12, %v4777_v9 }
 0x1a7   : > { %v1948_v29 = vpop.f32.mrf.mxu0 }
 0x1a8   : > { %v2169_v53 = vpop.f32.mrf.mxu1  ;;  %3022 = vst [vmem:[%s4617_s19 + $0x240] sm:$0xff] %v3476_v25  ;;  %v2168_v54 = vadd.f32 %v2167_v24, %v1947_v16  ;;  %v1949_v13 = vadd.f32 %v1948_v29, %v4781_v51 }
 0x1a9   : > { %v1950_v6 = vpop.f32.mrf.mxu0 }
 0x1aa   : > { %v2171_v7 = vpop.f32.mrf.mxu1  ;;  %v2170_v30 = vadd.f32 %v2169_v53, %v1949_v13  ;;  %v1951_v31 = vadd.f32 %v1950_v6, %v4777_v9  ;;  %v2356_v38 = vmax.f32 %v2168_v54, 0.0 }
 0x1ab   : > { %v1952_v37 = vpop.f32.mrf.mxu0 }
 0x1ac   : > { %v2173_v5 = vpop.f32.mrf.mxu1  ;;  %v2357_v14 = vmax.f32 %v2170_v30, 0.0  ;;  %v2172_v23 = vadd.f32 %v2171_v7, %v1951_v31  ;;  %v1953_v42 = vadd.f32 %v1952_v37, %v4781_v51 }
 0x1ad   : > { %v1956_v59 = vpop.f32.mrf.mxu0 }
 0x1ae   : > { %v2177_v43 = vpop.f32.mrf.mxu1  ;;  %v3405_v58 = vpack.c.bf16 %v2357_v14, %v2356_v38  ;;  %v2174_v52 = vadd.f32 %v2173_v5, %v1953_v42  ;;  %v1957_v27 = vadd.f32 %v1956_v59, %v4777_v9  ;;  %v2360_v55 = vmax.f32 %v2172_v23, 0.0 }
 0x1af   : > { %v1958_v44 = vpop.f32.mrf.mxu0 }
 0x1b0   : > { %v2179_v28 = vpop.f32.mrf.mxu1  ;;  %2951 = vst [vmem:[%s4617_s19 + $0x8] sm:$0xff] %v3405_v58  ;;  %v2361_v45 = vmax.f32 %v2174_v52, 0.0  ;;  %v2178_v56 = vadd.f32 %v2177_v43, %v1957_v27  ;;  %v1959_v10 = vadd.f32 %v1958_v44, %v4781_v51 }
 0x1b1   : > { %v1960_v36 = vpop.f32.mrf.mxu0 }
 0x1b2   : > { %v2181_v39 = vpop.f32.mrf.mxu1  ;;  %v3407_v57 = vpack.c.bf16 %v2361_v45, %v2360_v55  ;;  %v2180_v11 = vadd.f32 %v2179_v28, %v1959_v10  ;;  %v1961_v0 = vadd.f32 %v1960_v36, %v4777_v9  ;;  %v2364_v50 = vmax.f32 %v2178_v56, 0.0 }
 0x1b3   : > { %v1962_v1 = vpop.f32.mrf.mxu0 }
 0x1b4   : > { %v2183_v48 = vpop.f32.mrf.mxu1  ;;  %2953 = vst [vmem:[%s4617_s19 + $0x18] sm:$0xff] %v3407_v57  ;;  %v2365_v15 = vmax.f32 %v2180_v11, 0.0  ;;  %v2182_v20 = vadd.f32 %v2181_v39, %v1961_v0  ;;  %v1963_v2 = vadd.f32 %v1962_v1, %v4781_v51 }
 0x1b5   : > { %v1966_v60 = vpop.f32.mrf.mxu0 }
 0x1b6   : > { %v2187_v3 = vpop.f32.mrf.mxu1  ;;  %v3409_v46 = vpack.c.bf16 %v2365_v15, %v2364_v50  ;;  %v2184_v47 = vadd.f32 %v2183_v48, %v1963_v2  ;;  %v1967_v61 = vadd.f32 %v1966_v60, %v4777_v9  ;;  %v2368_v32 = vmax.f32 %v2182_v20, 0.0 }
 0x1b7   : > { %v1968_v49 = vpop.f32.mrf.mxu0 }
 0x1b8   : > { %v2189_v41 = vpop.f32.mrf.mxu1  ;;  %2955 = vst [vmem:[%s4617_s19 + $0x28] sm:$0xff] %v3409_v46  ;;  %v2369_v40 = vmax.f32 %v2184_v47, 0.0  ;;  %v2188_v4 = vadd.f32 %v2187_v3, %v1967_v61  ;;  %v1969_v33 = vadd.f32 %v1968_v49, %v4781_v51 }
 0x1b9   : > { %v1970_v8 = vpop.f32.mrf.mxu0 }
 0x1ba   : > { %v2191_v17 = vpop.f32.mrf.mxu1  ;;  %v3411_v18 = vpack.c.bf16 %v2369_v40, %v2368_v32  ;;  %v2190_v19 = vadd.f32 %v2189_v41, %v1969_v33  ;;  %v1971_v34 = vadd.f32 %v1970_v8, %v4777_v9  ;;  %v2372_v22 = vmax.f32 %v2188_v4, 0.0 }
 0x1bb   : > { %v1972_v21 = vpop.f32.mrf.mxu0 }
 0x1bc   : > { %v2193_v62 = vpop.f32.mrf.mxu1  ;;  %2957 = vst [vmem:[%s4617_s19 + $0x38] sm:$0xff] %v3411_v18  ;;  %v2373_v35 = vmax.f32 %v2190_v19, 0.0  ;;  %v2192_v63 = vadd.f32 %v2191_v17, %v1971_v34  ;;  %v1973_v26 = vadd.f32 %v1972_v21, %v4781_v51 }
 0x1bd   : > { %v1976_v12 = vpop.f32.mrf.mxu0 }
 0x1be   : > { %v2197_v24 = vpop.f32.mrf.mxu1  ;;  %v3413_v25 = vpack.c.bf16 %v2373_v35, %v2372_v22  ;;  %v2194_v16 = vadd.f32 %v2193_v62, %v1973_v26  ;;  %v1977_v29 = vadd.f32 %v1976_v12, %v4777_v9  ;;  %v2376_v13 = vmax.f32 %v2192_v63, 0.0 }
 0x1bf   : > { %v1978_v53 = vpop.f32.mrf.mxu0 }
 0x1c0   : > { %v2199_v54 = vpop.f32.mrf.mxu1  ;;  %2959 = vst [vmem:[%s4617_s19 + $0x48] sm:$0xff] %v3413_v25  ;;  %v2377_v6 = vmax.f32 %v2194_v16, 0.0  ;;  %v2198_v7 = vadd.f32 %v2197_v24, %v1977_v29  ;;  %v1979_v30 = vadd.f32 %v1978_v53, %v4781_v51 }
 0x1c1   : > { %v1980_v31 = vpop.f32.mrf.mxu0 }
 0x1c2   : > { %v2201_v37 = vpop.f32.mrf.mxu1  ;;  %v3415_v5 = vpack.c.bf16 %v2377_v6, %v2376_v13  ;;  %v2200_v38 = vadd.f32 %v2199_v54, %v1979_v30  ;;  %v1981_v14 = vadd.f32 %v1980_v31, %v4777_v9  ;;  %v2380_v59 = vmax.f32 %v2198_v7, 0.0 }
 0x1c3   : > { %v1982_v23 = vpop.f32.mrf.mxu0 }
 0x1c4   : > { %v2203_v42 = vpop.f32.mrf.mxu1  ;;  %2961 = vst [vmem:[%s4617_s19 + $0x58] sm:$0xff] %v3415_v5  ;;  %v2381_v43 = vmax.f32 %v2200_v38, 0.0  ;;  %v2202_v58 = vadd.f32 %v2201_v37, %v1981_v14  ;;  %v1983_v52 = vadd.f32 %v1982_v23, %v4781_v51 }
 0x1c5   : > { %v1986_v27 = vpop.f32.mrf.mxu0 }
 0x1c6   : > { %v2207_v44 = vpop.f32.mrf.mxu1  ;;  %v3417_v28 = vpack.c.bf16 %v2381_v43, %v2380_v59  ;;  %v2204_v55 = vadd.f32 %v2203_v42, %v1983_v52  ;;  %v1987_v45 = vadd.f32 %v1986_v27, %v4777_v9  ;;  %v2384_v36 = vmax.f32 %v2202_v58, 0.0 }
 0x1c7   : > { %v1988_v56 = vpop.f32.mrf.mxu0 }
 0x1c8   : > { %v2209_v10 = vpop.f32.mrf.mxu1  ;;  %2963 = vst [vmem:[%s4617_s19 + $0x68] sm:$0xff] %v3417_v28  ;;  %v2385_v39 = vmax.f32 %v2204_v55, 0.0  ;;  %v2208_v57 = vadd.f32 %v2207_v44, %v1987_v45  ;;  %v1989_v11 = vadd.f32 %v1988_v56, %v4781_v51 }
 0x1c9   : > { %v1990_v0 = vpop.f32.mrf.mxu0 }
 0x1ca   : > { %v2211_v1 = vpop.f32.mrf.mxu1  ;;  %v3419_v48 = vpack.c.bf16 %v2385_v39, %v2384_v36  ;;  %v2210_v50 = vadd.f32 %v2209_v10, %v1989_v11  ;;  %v1991_v15 = vadd.f32 %v1990_v0, %v4777_v9  ;;  %v2388_v60 = vmax.f32 %v2208_v57, 0.0 }
 0x1cb   : > { %v1992_v20 = vpop.f32.mrf.mxu0 }
 0x1cc   : > { %v2213_v2 = vpop.f32.mrf.mxu1  ;;  %2965 = vst [vmem:[%s4617_s19 + $0x78] sm:$0xff] %v3419_v48  ;;  %v2389_v3 = vmax.f32 %v2210_v50, 0.0  ;;  %v2212_v46 = vadd.f32 %v2211_v1, %v1991_v15  ;;  %v1993_v47 = vadd.f32 %v1992_v20, %v4781_v51 }
 0x1cd   : > { %v1996_v61 = vpop.f32.mrf.mxu0 }
 0x1ce   : > { %v2217_v49 = vpop.f32.mrf.mxu1  ;;  %v3421_v41 = vpack.c.bf16 %v2389_v3, %v2388_v60  ;;  %v2214_v32 = vadd.f32 %v2213_v2, %v1993_v47  ;;  %v1997_v40 = vadd.f32 %v1996_v61, %v4777_v9  ;;  %v2392_v8 = vmax.f32 %v2212_v46, 0.0 }
 0x1cf   : > { %v1998_v4 = vpop.f32.mrf.mxu0 }
 0x1d0   : > { %v2219_v33 = vpop.f32.mrf.mxu1  ;;  %2967 = vst [vmem:[%s4617_s19 + $0x88] sm:$0xff] %v3421_v41  ;;  %v2393_v17 = vmax.f32 %v2214_v32, 0.0  ;;  %v2218_v18 = vadd.f32 %v2217_v49, %v1997_v40  ;;  %v1999_v19 = vadd.f32 %v1998_v4, %v4781_v51 }
 0x1d1   : > { %v2000_v34 = vpop.f32.mrf.mxu0 }
 0x1d2   : > { %v2221_v21 = vpop.f32.mrf.mxu1  ;;  %v3423_v62 = vpack.c.bf16 %v2393_v17, %v2392_v8  ;;  %v2220_v22 = vadd.f32 %v2219_v33, %v1999_v19  ;;  %v2001_v35 = vadd.f32 %v2000_v34, %v4777_v9  ;;  %v2396_v12 = vmax.f32 %v2218_v18, 0.0 }
 0x1d3   : > { %v2002_v63 = vpop.f32.mrf.mxu0 }
 0x1d4   : > { %v2223_v26 = vpop.f32.mrf.mxu1  ;;  %2969 = vst [vmem:[%s4617_s19 + $0x98] sm:$0xff] %v3423_v62  ;;  %v2397_v24 = vmax.f32 %v2220_v22, 0.0  ;;  %v2222_v25 = vadd.f32 %v2221_v21, %v2001_v35  ;;  %v2003_v16 = vadd.f32 %v2002_v63, %v4781_v51 }
 0x1d5   : > { %v2006_v29 = vpop.f32.mrf.mxu0 }
 0x1d6   : > { %v2227_v53 = vpop.f32.mrf.mxu1  ;;  %v3425_v54 = vpack.c.bf16 %v2397_v24, %v2396_v12  ;;  %v2224_v13 = vadd.f32 %v2223_v26, %v2003_v16  ;;  %v2007_v6 = vadd.f32 %v2006_v29, %v4777_v9  ;;  %v2400_v31 = vmax.f32 %v2222_v25, 0.0 }
 0x1d7   : > { %v2008_v7 = vpop.f32.mrf.mxu0 }
 0x1d8   : > { %v2229_v30 = vpop.f32.mrf.mxu1  ;;  %2971 = vst [vmem:[%s4617_s19 + $0xa8] sm:$0xff] %v3425_v54  ;;  %v2401_v37 = vmax.f32 %v2224_v13, 0.0  ;;  %v2228_v5 = vadd.f32 %v2227_v53, %v2007_v6  ;;  %v2009_v38 = vadd.f32 %v2008_v7, %v4781_v51 }
 0x1d9   : > { %v2010_v14 = vpop.f32.mrf.mxu0 }
 0x1da   : > { %v2231_v23 = vpop.f32.mrf.mxu1  ;;  %v3427_v42 = vpack.c.bf16 %v2401_v37, %v2400_v31  ;;  %v2230_v59 = vadd.f32 %v2229_v30, %v2009_v38  ;;  %v2011_v43 = vadd.f32 %v2010_v14, %v4777_v9  ;;  %v2404_v27 = vmax.f32 %v2228_v5, 0.0 }
 0x1db   : > { %v2012_v58 = vpop.f32.mrf.mxu0 }
 0x1dc   : > { %v2233_v52 = vpop.f32.mrf.mxu1  ;;  %2973 = vst [vmem:[%s4617_s19 + $0xb8] sm:$0xff] %v3427_v42  ;;  %v2405_v44 = vmax.f32 %v2230_v59, 0.0  ;;  %v2232_v28 = vadd.f32 %v2231_v23, %v2011_v43  ;;  %v2013_v55 = vadd.f32 %v2012_v58, %v4781_v51 }
 0x1dd   : > { %v2016_v45 = vpop.f32.mrf.mxu0 }
 0x1de   : > { %v2237_v56 = vpop.f32.mrf.mxu1  ;;  %v3429_v10 = vpack.c.bf16 %v2405_v44, %v2404_v27  ;;  %v2234_v36 = vadd.f32 %v2233_v52, %v2013_v55  ;;  %v2017_v39 = vadd.f32 %v2016_v45, %v4777_v9  ;;  %v2408_v0 = vmax.f32 %v2232_v28, 0.0 }
 0x1df   : > { %v2018_v57 = vpop.f32.mrf.mxu0 }
 0x1e0   : > { %v2239_v11 = vpop.f32.mrf.mxu1  ;;  %2975 = vst [vmem:[%s4617_s19 + $0xc8] sm:$0xff] %v3429_v10  ;;  %v2409_v1 = vmax.f32 %v2234_v36, 0.0  ;;  %v2238_v48 = vadd.f32 %v2237_v56, %v2017_v39  ;;  %v2019_v50 = vadd.f32 %v2018_v57, %v4781_v51 }
 0x1e1   : > { %v2020_v15 = vpop.f32.mrf.mxu0 }
 0x1e2   : > { %v2241_v20 = vpop.f32.mrf.mxu1  ;;  %v3431_v2 = vpack.c.bf16 %v2409_v1, %v2408_v0  ;;  %v2240_v60 = vadd.f32 %v2239_v11, %v2019_v50  ;;  %v2021_v3 = vadd.f32 %v2020_v15, %v4777_v9  ;;  %v2412_v61 = vmax.f32 %v2238_v48, 0.0 }
 0x1e3   : > { %v2022_v46 = vpop.f32.mrf.mxu0 }
 0x1e4   : > { %v2243_v47 = vpop.f32.mrf.mxu1  ;;  %2977 = vst [vmem:[%s4617_s19 + $0xd8] sm:$0xff] %v3431_v2  ;;  %v2413_v49 = vmax.f32 %v2240_v60, 0.0  ;;  %v2242_v41 = vadd.f32 %v2241_v20, %v2021_v3  ;;  %v2023_v32 = vadd.f32 %v2022_v46, %v4781_v51 }
 0x1e5   : > { %v2026_v40 = vpop.f32.mrf.mxu0 }
 0x1e6   : > { %v2247_v4 = vpop.f32.mrf.mxu1  ;;  %v3433_v33 = vpack.c.bf16 %v2413_v49, %v2412_v61  ;;  %v2244_v8 = vadd.f32 %v2243_v47, %v2023_v32  ;;  %v2027_v17 = vadd.f32 %v2026_v40, %v4777_v9  ;;  %v2416_v34 = vmax.f32 %v2242_v41, 0.0 }
 0x1e7   : > { %v2028_v18 = vpop.f32.mrf.mxu0 }
 0x1e8   : > { %v2249_v19 = vpop.f32.mrf.mxu1  ;;  %2979 = vst [vmem:[%s4617_s19 + $0xe8] sm:$0xff] %v3433_v33  ;;  %v2417_v21 = vmax.f32 %v2244_v8, 0.0  ;;  %v2248_v62 = vadd.f32 %v2247_v4, %v2027_v17  ;;  %v2029_v22 = vadd.f32 %v2028_v18, %v4781_v51 }
 0x1e9   : > { %v2030_v35 = vpop.f32.mrf.mxu0 }
 0x1ea   : > { %v2251_v63 = vpop.f32.mrf.mxu1  ;;  %v3435_v26 = vpack.c.bf16 %v2417_v21, %v2416_v34  ;;  %v2250_v12 = vadd.f32 %v2249_v19, %v2029_v22  ;;  %v2031_v24 = vadd.f32 %v2030_v35, %v4777_v9  ;;  %v2420_v29 = vmax.f32 %v2248_v62, 0.0 }
 0x1eb   : > { %v2032_v25 = vpop.f32.mrf.mxu0 }
 0x1ec   : > { %v2253_v16 = vpop.f32.mrf.mxu1  ;;  %2981 = vst [vmem:[%s4617_s19 + $0xf8] sm:$0xff] %v3435_v26  ;;  %v2421_v53 = vmax.f32 %v2250_v12, 0.0  ;;  %v2252_v54 = vadd.f32 %v2251_v63, %v2031_v24  ;;  %v2033_v13 = vadd.f32 %v2032_v25, %v4781_v51 }
 0x1ed   : > { %v2036_v6 = vpop.f32.mrf.mxu0 }
 0x1ee   : > { %v2257_v7 = vpop.f32.mrf.mxu1  ;;  %v3437_v30 = vpack.c.bf16 %v2421_v53, %v2420_v29  ;;  %v2254_v31 = vadd.f32 %v2253_v16, %v2033_v13  ;;  %v2037_v37 = vadd.f32 %v2036_v6, %v4777_v9  ;;  %v2424_v14 = vmax.f32 %v2252_v54, 0.0 }
 0x1ef   : > { %v2038_v5 = vpop.f32.mrf.mxu0 }
 0x1f0   : > { %v2259_v38 = vpop.f32.mrf.mxu1  ;;  %2983 = vst [vmem:[%s4617_s19 + $0x108] sm:$0xff] %v3437_v30  ;;  %v2425_v23 = vmax.f32 %v2254_v31, 0.0  ;;  %v2258_v42 = vadd.f32 %v2257_v7, %v2037_v37  ;;  %v2039_v59 = vadd.f32 %v2038_v5, %v4781_v51 }
 0x1f1   : > { %v2040_v43 = vpop.f32.mrf.mxu0 }
 0x1f2   : > { %v2261_v58 = vpop.f32.mrf.mxu1  ;;  %v3439_v52 = vpack.c.bf16 %v2425_v23, %v2424_v14  ;;  %v2260_v27 = vadd.f32 %v2259_v38, %v2039_v59  ;;  %v2041_v44 = vadd.f32 %v2040_v43, %v4777_v9  ;;  %v2428_v45 = vmax.f32 %v2258_v42, 0.0 }
 0x1f3   : > { %v2042_v28 = vpop.f32.mrf.mxu0 }
 0x1f4   : > { %v2263_v55 = vpop.f32.mrf.mxu1  ;;  %2985 = vst [vmem:[%s4617_s19 + $0x118] sm:$0xff] %v3439_v52  ;;  %v2429_v56 = vmax.f32 %v2260_v27, 0.0  ;;  %v2262_v10 = vadd.f32 %v2261_v58, %v2041_v44  ;;  %v2043_v36 = vadd.f32 %v2042_v28, %v4781_v51 }
 0x1f5   : > { %v2046_v39 = vpop.f32.mrf.mxu0 }
 0x1f6   : > { %v2267_v57 = vpop.f32.mrf.mxu1  ;;  %v3441_v11 = vpack.c.bf16 %v2429_v56, %v2428_v45  ;;  %v2264_v0 = vadd.f32 %v2263_v55, %v2043_v36  ;;  %v2047_v1 = vadd.f32 %v2046_v39, %v4777_v9  ;;  %v2432_v15 = vmax.f32 %v2262_v10, 0.0 }
 0x1f7   : > { %v2048_v48 = vpop.f32.mrf.mxu0 }
 0x1f8   : > { %v2269_v50 = vpop.f32.mrf.mxu1  ;;  %2987 = vst [vmem:[%s4617_s19 + $0x128] sm:$0xff] %v3441_v11  ;;  %v2433_v20 = vmax.f32 %v2264_v0, 0.0  ;;  %v2268_v2 = vadd.f32 %v2267_v57, %v2047_v1  ;;  %v2049_v60 = vadd.f32 %v2048_v48, %v4781_v51 }
 0x1f9   : > { %v2050_v3 = vpop.f32.mrf.mxu0 }
 0x1fa   : > { %v2271_v46 = vpop.f32.mrf.mxu1  ;;  %v3443_v47 = vpack.c.bf16 %v2433_v20, %v2432_v15  ;;  %v2270_v61 = vadd.f32 %v2269_v50, %v2049_v60  ;;  %v2051_v49 = vadd.f32 %v2050_v3, %v4777_v9  ;;  %v2436_v40 = vmax.f32 %v2268_v2, 0.0 }
 0x1fb   : > { %v2052_v41 = vpop.f32.mrf.mxu0 }
 0x1fc   : > { %v2273_v32 = vpop.f32.mrf.mxu1  ;;  %2989 = vst [vmem:[%s4617_s19 + $0x138] sm:$0xff] %v3443_v47  ;;  %v2437_v4 = vmax.f32 %v2270_v61, 0.0  ;;  %v2272_v33 = vadd.f32 %v2271_v46, %v2051_v49  ;;  %v2053_v8 = vadd.f32 %v2052_v41, %v4781_v51 }
 0x1fd   : > { %v2056_v17 = vpop.f32.mrf.mxu0 }
 0x1fe   : > { %v2277_v18 = vpop.f32.mrf.mxu1  ;;  %v3445_v19 = vpack.c.bf16 %v2437_v4, %v2436_v40  ;;  %v2274_v34 = vadd.f32 %v2273_v32, %v2053_v8  ;;  %v2057_v21 = vadd.f32 %v2056_v17, %v4777_v9  ;;  %v2440_v35 = vmax.f32 %v2272_v33, 0.0 }
 0x1ff   : > { %v2058_v62 = vpop.f32.mrf.mxu0 }
 0x200   : > { %v2279_v22 = vpop.f32.mrf.mxu1  ;;  %2991 = vst [vmem:[%s4617_s19 + $0x148] sm:$0xff] %v3445_v19  ;;  %v2441_v63 = vmax.f32 %v2274_v34, 0.0  ;;  %v2278_v26 = vadd.f32 %v2277_v18, %v2057_v21  ;;  %v2059_v12 = vadd.f32 %v2058_v62, %v4781_v51 }
 0x201   : > { %v2060_v24 = vpop.f32.mrf.mxu0 }
 0x202   : > { %v2281_v25 = vpop.f32.mrf.mxu1  ;;  %v3447_v16 = vpack.c.bf16 %v2441_v63, %v2440_v35  ;;  %v2280_v29 = vadd.f32 %v2279_v22, %v2059_v12  ;;  %v2061_v53 = vadd.f32 %v2060_v24, %v4777_v9  ;;  %v2444_v6 = vmax.f32 %v2278_v26, 0.0 }
 0x203   : > { %v2062_v54 = vpop.f32.mrf.mxu0 }
 0x204   : > { %v2283_v13 = vpop.f32.mrf.mxu1  ;;  %2993 = vst [vmem:[%s4617_s19 + $0x158] sm:$0xff] %v3447_v16  ;;  %v2445_v7 = vmax.f32 %v2280_v29, 0.0  ;;  %v2282_v30 = vadd.f32 %v2281_v25, %v2061_v53  ;;  %v2063_v31 = vadd.f32 %v2062_v54, %v4781_v51 }
 0x205   : > { %v2066_v37 = vpop.f32.mrf.mxu0 }
 0x206   : > { %v2287_v5 = vpop.f32.mrf.mxu1  ;;  %v3449_v38 = vpack.c.bf16 %v2445_v7, %v2444_v6  ;;  %v2284_v14 = vadd.f32 %v2283_v13, %v2063_v31  ;;  %v2067_v23 = vadd.f32 %v2066_v37, %v4777_v9  ;;  %v2448_v43 = vmax.f32 %v2282_v30, 0.0 }
 0x207   : > { %v2068_v42 = vpop.f32.mrf.mxu0 }
 0x208   : > { %v2289_v59 = vpop.f32.mrf.mxu1  ;;  %2995 = vst [vmem:[%s4617_s19 + $0x168] sm:$0xff] %v3449_v38  ;;  %v2449_v58 = vmax.f32 %v2284_v14, 0.0  ;;  %v2288_v52 = vadd.f32 %v2287_v5, %v2067_v23  ;;  %v2069_v27 = vadd.f32 %v2068_v42, %v4781_v51 }
 0x209   : > { %v2070_v44 = vpop.f32.mrf.mxu0 }
 0x20a   : > { %v2291_v28 = vpop.f32.mrf.mxu1  ;;  %v3451_v55 = vpack.c.bf16 %v2449_v58, %v2448_v43  ;;  %v2290_v45 = vadd.f32 %v2289_v59, %v2069_v27  ;;  %v2071_v56 = vadd.f32 %v2070_v44, %v4777_v9  ;;  %v2452_v39 = vmax.f32 %v2288_v52, 0.0 }
 0x20b   : > { %v2072_v10 = vpop.f32.mrf.mxu0 }
 0x20c   : > { %v2293_v36 = vpop.f32.mrf.mxu1  ;;  %2997 = vst [vmem:[%s4617_s19 + $0x178] sm:$0xff] %v3451_v55  ;;  %v2453_v57 = vmax.f32 %v2290_v45, 0.0  ;;  %v2292_v11 = vadd.f32 %v2291_v28, %v2071_v56  ;;  %v2073_v0 = vadd.f32 %v2072_v10, %v4781_v51 }
 0x20d   : > { %v2076_v1 = vpop.f32.mrf.mxu0 }
 0x20e   : > { %v2297_v48 = vpop.f32.mrf.mxu1  ;;  %v3453_v50 = vpack.c.bf16 %v2453_v57, %v2452_v39  ;;  %v2294_v15 = vadd.f32 %v2293_v36, %v2073_v0  ;;  %v2077_v20 = vadd.f32 %v2076_v1, %v4777_v9  ;;  %v2456_v3 = vmax.f32 %v2292_v11, 0.0 }
 0x20f   : > { %v2078_v2 = vpop.f32.mrf.mxu0 }
 0x210   : > { %v2299_v60 = vpop.f32.mrf.mxu1  ;;  %2999 = vst [vmem:[%s4617_s19 + $0x188] sm:$0xff] %v3453_v50  ;;  %v2457_v46 = vmax.f32 %v2294_v15, 0.0  ;;  %v2298_v47 = vadd.f32 %v2297_v48, %v2077_v20  ;;  %v2079_v61 = vadd.f32 %v2078_v2, %v4781_v51 }
 0x211   : > { %v2080_v49 = vpop.f32.mrf.mxu0 }
 0x212   : > { %v2301_v41 = vpop.f32.mrf.mxu1  ;;  %v3455_v32 = vpack.c.bf16 %v2457_v46, %v2456_v3  ;;  %v2300_v40 = vadd.f32 %v2299_v60, %v2079_v61  ;;  %v2081_v4 = vadd.f32 %v2080_v49, %v4777_v9  ;;  %v2460_v17 = vmax.f32 %v2298_v47, 0.0 }
 0x213   : > { %v2082_v33 = vpop.f32.mrf.mxu0 }
 0x214   : > { %v2303_v8 = vpop.f32.mrf.mxu1  ;;  %3001 = vst [vmem:[%s4617_s19 + $0x198] sm:$0xff] %v3455_v32  ;;  %v2461_v18 = vmax.f32 %v2300_v40, 0.0  ;;  %v2302_v19 = vadd.f32 %v2301_v41, %v2081_v4  ;;  %v2083_v34 = vadd.f32 %v2082_v33, %v4781_v51 }
 0x215   : > { %v2086_v21 = vpop.f32.mrf.mxu0 }
 0x216   : > { %v2307_v62 = vpop.f32.mrf.mxu1  ;;  %v3457_v22 = vpack.c.bf16 %v2461_v18, %v2460_v17  ;;  %v2304_v35 = vadd.f32 %v2303_v8, %v2083_v34  ;;  %v2087_v63 = vadd.f32 %v2086_v21, %v4777_v9  ;;  %v2464_v24 = vmax.f32 %v2302_v19, 0.0 }
 0x217   : > { %v2088_v26 = vpop.f32.mrf.mxu0 }
 0x218   : > { %v2309_v12 = vpop.f32.mrf.mxu1  ;;  %3003 = vst [vmem:[%s4617_s19 + $0x1a8] sm:$0xff] %v3457_v22  ;;  %v2465_v25 = vmax.f32 %v2304_v35, 0.0  ;;  %v2308_v16 = vadd.f32 %v2307_v62, %v2087_v63  ;;  %v2089_v29 = vadd.f32 %v2088_v26, %v4781_v51 }
 0x219   : > { %v2090_v53 = vpop.f32.mrf.mxu0 }
 0x21a   : > { %v2311_v54 = vpop.f32.mrf.mxu1  ;;  %v3459_v13 = vpack.c.bf16 %v2465_v25, %v2464_v24  ;;  %v2310_v6 = vadd.f32 %v2309_v12, %v2089_v29  ;;  %v2091_v7 = vadd.f32 %v2090_v53, %v4777_v9  ;;  %v2468_v37 = vmax.f32 %v2308_v16, 0.0 }
 0x21b   : > { %v2092_v30 = vpop.f32.mrf.mxu0 }
 0x21c   : > { %v2313_v31 = vpop.f32.mrf.mxu1  ;;  %3005 = vst [vmem:[%s4617_s19 + $0x1b8] sm:$0xff] %v3459_v13  ;;  %v2469_v5 = vmax.f32 %v2310_v6, 0.0  ;;  %v2312_v38 = vadd.f32 %v2311_v54, %v2091_v7  ;;  %v2093_v14 = vadd.f32 %v2092_v30, %v4781_v51 }
 0x21d   : > { %v2096_v23 = vpop.f32.mrf.mxu0 }
 0x21e   : > { %v2317_v42 = vpop.f32.mrf.mxu1  ;;  %v3461_v59 = vpack.c.bf16 %v2469_v5, %v2468_v37  ;;  %v2314_v43 = vadd.f32 %v2313_v31, %v2093_v14  ;;  %v2097_v58 = vadd.f32 %v2096_v23, %v4777_v9  ;;  %v2472_v44 = vmax.f32 %v2312_v38, 0.0 }
 0x21f   : > { %v2098_v52 = vpop.f32.mrf.mxu0 }
 0x220   : > { %v2319_v27 = vpop.f32.mrf.mxu1  ;;  %3007 = vst [vmem:[%s4617_s19 + $0x1c8] sm:$0xff] %v3461_v59  ;;  %v2473_v28 = vmax.f32 %v2314_v43, 0.0  ;;  %v2318_v55 = vadd.f32 %v2317_v42, %v2097_v58  ;;  %v2099_v45 = vadd.f32 %v2098_v52, %v4781_v51 }
 0x221   : > { %v2100_v56 = vpop.f32.mrf.mxu0 }
 0x222   : > { %v2321_v10 = vpop.f32.mrf.mxu1  ;;  %v3463_v36 = vpack.c.bf16 %v2473_v28, %v2472_v44  ;;  %v2320_v39 = vadd.f32 %v2319_v27, %v2099_v45  ;;  %v2101_v57 = vadd.f32 %v2100_v56, %v4777_v9  ;;  %v2476_v1 = vmax.f32 %v2318_v55, 0.0 }
 0x223   : > { %v2102_v11 = vpop.f32.mrf.mxu0 }
 0x224   : > { %v2323_v0 = vpop.f32.mrf.mxu1  ;;  %3009 = vst [vmem:[%s4617_s19 + $0x1d8] sm:$0xff] %v3463_v36  ;;  %v2477_v48 = vmax.f32 %v2320_v39, 0.0  ;;  %v2322_v50 = vadd.f32 %v2321_v10, %v2101_v57  ;;  %v2103_v15 = vadd.f32 %v2102_v11, %v4781_v51 }
 0x225   : > { %v2106_v20 = vpop.f32.mrf.mxu0 }
 0x226   : > { %v2327_v2 = vpop.f32.mrf.mxu1  ;;  %v3465_v60 = vpack.c.bf16 %v2477_v48, %v2476_v1  ;;  %v2324_v3 = vadd.f32 %v2323_v0, %v2103_v15  ;;  %v2107_v46 = vadd.f32 %v2106_v20, %v4777_v9  ;;  %v2480_v49 = vmax.f32 %v2322_v50, 0.0 }
 0x227   : > { %v2108_v47 = vpop.f32.mrf.mxu0 }
 0x228   : > { %v2329_v61 = vpop.f32.mrf.mxu1  ;;  %3011 = vst [vmem:[%s4617_s19 + $0x1e8] sm:$0xff] %v3465_v60  ;;  %v2481_v41 = vmax.f32 %v2324_v3, 0.0  ;;  %v2328_v32 = vadd.f32 %v2327_v2, %v2107_v46  ;;  %v2109_v40 = vadd.f32 %v2108_v47, %v4781_v51 }
 0x229   : > { %v2110_v4 = vpop.f32.mrf.mxu0 }
 0x22a   : > { %v2331_v33 = vpop.f32.mrf.mxu1  ;;  %v3467_v8 = vpack.c.bf16 %v2481_v41, %v2480_v49  ;;  %v2330_v17 = vadd.f32 %v2329_v61, %v2109_v40  ;;  %v2111_v18 = vadd.f32 %v2110_v4, %v4777_v9  ;;  %v2484_v21 = vmax.f32 %v2328_v32, 0.0 }
 0x22b   : > { %v2112_v19 = vpop.f32.mrf.mxu0 }
 0x22c   : > { %v2333_v34 = vpop.f32.mrf.mxu1  ;;  %3013 = vst [vmem:[%s4617_s19 + $0x1f8] sm:$0xff] %v3467_v8  ;;  %v2485_v62 = vmax.f32 %v2330_v17, 0.0  ;;  %v2332_v22 = vadd.f32 %v2331_v33, %v2111_v18  ;;  %v2113_v35 = vadd.f32 %v2112_v19, %v4781_v51 }
 0x22d   : > { %v2116_v63 = vpop.f32.mrf.mxu0 }
 0x22e   : > { %v2337_v26 = vpop.f32.mrf.mxu1  ;;  %v3469_v12 = vpack.c.bf16 %v2485_v62, %v2484_v21  ;;  %v2334_v24 = vadd.f32 %v2333_v34, %v2113_v35  ;;  %v2117_v25 = vadd.f32 %v2116_v63, %v4777_v9  ;;  %v2488_v53 = vmax.f32 %v2332_v22, 0.0 }
 0x22f   : > { %v2118_v16 = vpop.f32.mrf.mxu0 }
 0x230   : > { %v2339_v29 = vpop.f32.mrf.mxu1  ;;  %3015 = vst [vmem:[%s4617_s19 + $0x208] sm:$0xff] %v3469_v12  ;;  %v2489_v54 = vmax.f32 %v2334_v24, 0.0  ;;  %v2338_v13 = vadd.f32 %v2337_v26, %v2117_v25  ;;  %v2119_v6 = vadd.f32 %v2118_v16, %v4781_v51 }
 0x231   : > { %v2120_v7 = vpop.f32.mrf.mxu0 }
 0x232   : > { %v2341_v30 = vpop.f32.mrf.mxu1  ;;  %v3471_v31 = vpack.c.bf16 %v2489_v54, %v2488_v53  ;;  %v2340_v37 = vadd.f32 %v2339_v29, %v2119_v6  ;;  %v2121_v5 = vadd.f32 %v2120_v7, %v4777_v9  ;;  %v2492_v23 = vmax.f32 %v2338_v13, 0.0 }
 0x233   : > { %v2122_v38 = vpop.f32.mrf.mxu0 }
 0x234   : > { %v2343_v14 = vpop.f32.mrf.mxu1  ;;  %3017 = vst [vmem:[%s4617_s19 + $0x218] sm:$0xff] %v3471_v31  ;;  %v2493_v42 = vmax.f32 %v2340_v37, 0.0  ;;  %v2342_v59 = vadd.f32 %v2341_v30, %v2121_v5  ;;  %v2123_v43 = vadd.f32 %v2122_v38, %v4781_v51 }
 0x235   : > { %v2126_v58 = vpop.f32.mrf.mxu0 }
 0x236   : > { %v2347_v52 = vpop.f32.mrf.mxu1  ;;  %v3473_v27 = vpack.c.bf16 %v2493_v42, %v2492_v23  ;;  %v2344_v44 = vadd.f32 %v2343_v14, %v2123_v43  ;;  %v2127_v28 = vadd.f32 %v2126_v58, %v4777_v9  ;;  %v2496_v56 = vmax.f32 %v2342_v59, 0.0 }
 0x237   : > { %v2128_v55 = vpop.f32.mrf.mxu0 }
 0x238   : > { %v2349_v45 = vpop.f32.mrf.mxu1  ;;  %3019 = vst [vmem:[%s4617_s19 + $0x228] sm:$0xff] %v3473_v27  ;;  %v2497_v10 = vmax.f32 %v2344_v44, 0.0  ;;  %v2348_v36 = vadd.f32 %v2347_v52, %v2127_v28  ;;  %v2129_v39 = vadd.f32 %v2128_v55, %v4781_v51 }
 0x239   : > { %v2130_v57 = vpop.f32.mrf.mxu0 }
 0x23a   : > { %v2351_v11 = vpop.f32.mrf.mxu1  ;;  %v3475_v0 = vpack.c.bf16 %v2497_v10, %v2496_v56  ;;  %v2350_v1 = vadd.f32 %v2349_v45, %v2129_v39  ;;  %v2500_v15 = vmax.f32 %v2348_v36, 0.0 }
 0x23b   : > { %v2131_v48 = vpop.f32.mrf.mxu0 }
 0x23c   : > { %v2352_v50 = vpop.f32.mrf.mxu1  ;;  %3021 = vst [vmem:[%s4617_s19 + $0x238] sm:$0xff] %v3475_v0  ;;  %v2501_v20 = vmax.f32 %v2350_v1, 0.0 }
 0x23e   : > { %v3477_v2 = vpack.c.bf16 %v2501_v20, %v2500_v15 }
 0x240   : > { %3023 = vst [vmem:[%s4617_s19 + $0x248] sm:$0xff] %v3477_v2 }
 0x241 PF: > { %s13_s14 = sadd.s32 1, %s3828_s14   ;;  %s4950_s12 = smov %s3824_s13 }
 0x242   : > { %p10_p5 = scmp.ge.s32.totalorder %s13_s14, 4   ;;  %s4951_s13 = smov %s4953_s15 }
 0x244   :  { %12 = sbr.rel (!%p10_p5) target bundleno = 2 (0x2), region = 65 }

// kernel: fc_decoder_forward.15
= control target key start
LH: loop header
LB: loop body
LE: loop exit
PB: predicated region body
PF: predicated region fallthrough
CT: control target
= control target key end

     0   :  { %s1280_s12 = smov 0   ;;  %s1282_s13 = smov 0   ;;  %s1510_s0 = inlined_call_operand.vmem [shape: bf16[2048,128], index: 0, kind: input, shape index: {}]   ;;  %s1511_s1 = inlined_call_operand.vmem [shape: bf16[128,128], index: 1, kind: input, shape index: {}]   ;;  %s1512_s2 = inlined_call_operand.vmem [shape: f32[1,128], index: 2, kind: input, shape index: {}]   ;;  %s1513_s3 = inlined_call_operand.vmem [shape: f32[2048,128], index: 3, kind: output, shape index: {}]  }
   0x1   :  { %s1284_s14 = smov 0  }
   0x2 LB: > { %s25_s15 = sadd.s32 1, %s1254_s13  ;;  %p988_p0 = scmp.ge.s32.totalorder %s1258_s14, 1  ;;  %s1258_s14 = sphi %s1284_s14, %s13_s14   ;;  %s1254_s13 = sphi %s1282_s13, %s1515_s13   ;;  %s1250_s12 = sphi %s1280_s12, %s1514_s12  }
   0x3   : > { %p27_p1 = scmp.ge.s32.totalorder %s25_s15, 4  ;;  %p166_p2 = scmp.lt.s32.totalorder %s1258_s14, 5 }
   0x5   : > { %s1517_s15 = smov (%p27_p1, %s25_s15), 0  ;;  %p167_p3 = pnand %p988_p0, %p166_p2 }
   0x6   : > { %s989_s18 = sshll.u32 (!%p167_p3), %s1250_s12, 6 }
   0x7   : > { %170 = sbr.rel (%p167_p3) target bundleno = 303 (0x12f), region = 32  ;;  %p199_p4 = scmp.lt.s32.totalorder (!%p167_p3), %s989_s18, 255 }
   0xc   : > { %v1196_v0 = vld [vmem:[%s1511_s1 + $0x38] sm:$0xff]   ;;  %v1197_v1 = vld [vmem:[%s1511_s1 + $0x30] sm:$0xff]   ;;  %s1519_s18 = smov (!%p199_p4, %s989_s18), 255  ;;  %v1198_v2 = vld [vmem:[%s1511_s1 + $0x28] sm:$0xff]  }
   0xd   : > { %1076 = vmatprep.subr.bf16.mxu0 %v1196_v0  ;;  %1156 = vmatprep.subr.bf16.mxu1 %v1196_v0  ;;  %s990_s23 = sshll.u32 %s1519_s18, 2  ;;  %v1199_v3 = vld [vmem:[%s1511_s1 + $0x20] sm:$0xff]   ;;  %v1200_v6 = vld [vmem:[%s1511_s1 + $0x18] sm:$0xff]   ;;  %v1201_v7 = vld [vmem:[%s1511_s1 + $0x10] sm:$0xff]   ;;  %s992_s10 = sshll.u32 %s1519_s18, 3 }
   0xe   : > { %1077 = vmatpush3.bf16.msra.mxu0 %v1196_v0  ;;  %1164 = vmatpush3.bf16.msra.mxu1 %v1196_v0  ;;  %s1313_s26 = scalar_lea.vmem %s1510_s0, %s990_s23  ;;  %v1202_v8 = vld [vmem:[%s1511_s1 + $0x8] sm:$0xff]   ;;  %v1203_v9 = vld [vmem:[%s1511_s1] sm:$0xff]   ;;  %s1371_s19 = scalar_lea.vmem %s1513_s3, %s992_s10 }
   0xf   : > { %1078 = vmatprep.subr.bf16.mxu0 %v1197_v1  ;;  %1157 = vmatprep.subr.bf16.mxu1 %v1197_v1  ;;  %v1204_v4 = vld [vmem:[%s1313_s26] sm:$0xff]   ;;  %v1206_v10 = vld [vmem:[%s1313_s26 + $0x8] sm:$0xff]   ;;  %v1208_v12 = vld [vmem:[%s1313_s26 + $0x10] sm:$0xff]  }
  0x10   : > { %v1205_v5 = vld [vmem:[%s1313_s26 + $0x80] sm:$0xff]   ;;  %1092 = vmatprep.mubr.bf16.mxu0 %v1204_v4  ;;  %v1207_v11 = vld [vmem:[%s1313_s26 + $0x88] sm:$0xff]   ;;  %v1209_v13 = vld [vmem:[%s1313_s26 + $0x90] sm:$0xff]  }
  0x11   : > { %1124 = vmatprep.mubr.bf16.mxu1 %v1205_v5  ;;  %v1210_v14 = vld [vmem:[%s1313_s26 + $0x18] sm:$0xff]   ;;  %v1212_v16 = vld [vmem:[%s1313_s26 + $0x20] sm:$0xff]   ;;  %v1214_v18 = vld [vmem:[%s1313_s26 + $0x28] sm:$0xff]  }
  0x12   : > { %1079 = vmatpush3.bf16.msra.mxu0 %v1197_v1  ;;  %1165 = vmatpush3.bf16.msra.mxu1 %v1197_v1  ;;  %v1211_v15 = vld [vmem:[%s1313_s26 + $0x98] sm:$0xff]   ;;  %v1213_v17 = vld [vmem:[%s1313_s26 + $0xa0] sm:$0xff]   ;;  %v1215_v19 = vld [vmem:[%s1313_s26 + $0xa8] sm:$0xff]  }
  0x13   : > { %1080 = vmatprep.subr.bf16.mxu0 %v1198_v2  ;;  %1158 = vmatprep.subr.bf16.mxu1 %v1198_v2  ;;  %v1216_v20 = vld [vmem:[%s1313_s26 + $0x30] sm:$0xff]   ;;  %v1218_v22 = vld [vmem:[%s1313_s26 + $0x38] sm:$0xff]   ;;  %v1220_v24 = vld [vmem:[%s1313_s26 + $0x40] sm:$0xff]  }
  0x14   : > { %v1217_v21 = vld [vmem:[%s1313_s26 + $0xb0] sm:$0xff]   ;;  %v1219_v23 = vld [vmem:[%s1313_s26 + $0xb8] sm:$0xff]   ;;  %v1221_v25 = vld [vmem:[%s1313_s26 + $0xc0] sm:$0xff]  }
  0x15   : > { %v1222_v26 = vld [vmem:[%s1313_s26 + $0x48] sm:$0xff]   ;;  %v1224_v28 = vld [vmem:[%s1313_s26 + $0x50] sm:$0xff]   ;;  %v1226_v30 = vld [vmem:[%s1313_s26 + $0x58] sm:$0xff]  }
  0x16   : > { %1081 = vmatpush3.bf16.msra.mxu0 %v1198_v2  ;;  %1166 = vmatpush3.bf16.msra.mxu1 %v1198_v2  ;;  %v1223_v27 = vld [vmem:[%s1313_s26 + $0xc8] sm:$0xff]   ;;  %v1225_v29 = vld [vmem:[%s1313_s26 + $0xd0] sm:$0xff]   ;;  %v1227_v31 = vld [vmem:[%s1313_s26 + $0xd8] sm:$0xff]  }
  0x17   : > { %1082 = vmatprep.subr.bf16.mxu0 %v1199_v3  ;;  %1159 = vmatprep.subr.bf16.mxu1 %v1199_v3  ;;  %v1228_v32 = vld [vmem:[%s1313_s26 + $0x60] sm:$0xff]   ;;  %v1230_v34 = vld [vmem:[%s1313_s26 + $0x68] sm:$0xff]   ;;  %v1232_v36 = vld [vmem:[%s1313_s26 + $0x70] sm:$0xff]  }
  0x18   : > { %v1229_v33 = vld [vmem:[%s1313_s26 + $0xe0] sm:$0xff]   ;;  %v1231_v35 = vld [vmem:[%s1313_s26 + $0xe8] sm:$0xff]   ;;  %v1233_v37 = vld [vmem:[%s1313_s26 + $0xf0] sm:$0xff]  }
  0x19   : > { %v1234_v38 = vld [vmem:[%s1313_s26 + $0x78] sm:$0xff]   ;;  %v1366_v40 = vld [vmem:[%s1512_s2] ss:$0 sm:$0xff] }
  0x1a   : > { %1083 = vmatpush3.bf16.msra.mxu0 %v1199_v3  ;;  %1167 = vmatpush3.bf16.msra.mxu1 %v1199_v3  ;;  %v1235_v39 = vld [vmem:[%s1313_s26 + $0xf8] sm:$0xff]  }
  0x1b   : > { %1084 = vmatprep.subr.bf16.mxu0 %v1200_v6  ;;  %1160 = vmatprep.subr.bf16.mxu1 %v1200_v6 }
  0x1e   : > { %1085 = vmatpush3.bf16.msra.mxu0 %v1200_v6  ;;  %1168 = vmatpush3.bf16.msra.mxu1 %v1200_v6 }
  0x1f   : > { %1086 = vmatprep.subr.bf16.mxu0 %v1201_v7  ;;  %1161 = vmatprep.subr.bf16.mxu1 %v1201_v7 }
  0x22   : > { %1087 = vmatpush3.bf16.msra.mxu0 %v1201_v7  ;;  %1169 = vmatpush3.bf16.msra.mxu1 %v1201_v7 }
  0x23   : > { %1088 = vmatprep.subr.bf16.mxu0 %v1202_v8  ;;  %1162 = vmatprep.subr.bf16.mxu1 %v1202_v8 }
  0x26   : > { %1089 = vmatpush3.bf16.msra.mxu0 %v1202_v8  ;;  %1170 = vmatpush3.bf16.msra.mxu1 %v1202_v8 }
  0x27   : > { %1090 = vmatprep.subr.bf16.mxu0 %v1203_v9  ;;  %1163 = vmatprep.subr.bf16.mxu1 %v1203_v9 }
  0x2a   : > { %1091 = vmatpush3.bf16.msra.mxu0 %v1203_v9  ;;  %1171 = vmatpush3.bf16.msra.mxu1 %v1203_v9 }
  0x2d   : > { %1093 = vmatmul.mubr.bf16.vlgmr.msra.gmra.mxu0 %v1206_v10  ;;  %1125 = vmatmul.mubr.bf16.vlgmr.msra.gmra.mxu1 %v1207_v11 }
  0x2e   : > { %1096 = vmatprep.mubr.bf16.mxu0 %v1208_v12  ;;  %1128 = vmatprep.mubr.bf16.mxu1 %v1209_v13 }
  0x35   : > { %1097 = vmatmul.mubr.bf16.gmra.mxu0 %v1210_v14  ;;  %1129 = vmatmul.mubr.bf16.gmra.mxu1 %v1211_v15 }
  0x36   : > { %1100 = vmatprep.mubr.bf16.mxu0 %v1212_v16  ;;  %1132 = vmatprep.mubr.bf16.mxu1 %v1213_v17 }
  0x3d   : > { %1101 = vmatmul.mubr.bf16.gmra.mxu0 %v1214_v18  ;;  %1133 = vmatmul.mubr.bf16.gmra.mxu1 %v1215_v19 }
  0x3e   : > { %1104 = vmatprep.mubr.bf16.mxu0 %v1216_v20  ;;  %1136 = vmatprep.mubr.bf16.mxu1 %v1217_v21 }
  0x45   : > { %1105 = vmatmul.mubr.bf16.gmra.mxu0 %v1218_v22  ;;  %1137 = vmatmul.mubr.bf16.gmra.mxu1 %v1219_v23 }
  0x46   : > { %1108 = vmatprep.mubr.bf16.mxu0 %v1220_v24  ;;  %1140 = vmatprep.mubr.bf16.mxu1 %v1221_v25 }
  0x4d   : > { %1109 = vmatmul.mubr.bf16.gmra.mxu0 %v1222_v26  ;;  %1141 = vmatmul.mubr.bf16.gmra.mxu1 %v1223_v27 }
  0x4e   : > { %1112 = vmatprep.mubr.bf16.mxu0 %v1224_v28  ;;  %1144 = vmatprep.mubr.bf16.mxu1 %v1225_v29 }
  0x55   : > { %1113 = vmatmul.mubr.bf16.gmra.mxu0 %v1226_v30  ;;  %1145 = vmatmul.mubr.bf16.gmra.mxu1 %v1227_v31 }
  0x56   : > { %1116 = vmatprep.mubr.bf16.mxu0 %v1228_v32  ;;  %1148 = vmatprep.mubr.bf16.mxu1 %v1229_v33 }
  0x5d   : > { %1117 = vmatmul.mubr.bf16.gmra.mxu0 %v1230_v34  ;;  %1149 = vmatmul.mubr.bf16.gmra.mxu1 %v1231_v35 }
  0x5e   : > { %1120 = vmatprep.mubr.bf16.mxu0 %v1232_v36  ;;  %1152 = vmatprep.mubr.bf16.mxu1 %v1233_v37 }
  0x65   : > { %1121 = vmatmul.mubr.bf16.gmra.mxu0 %v1234_v38  ;;  %1153 = vmatmul.mubr.bf16.gmra.mxu1 %v1235_v39 }
  0xed   : > { %v1094_v41 = vpop.f32.mrf.mxu0  ;;  %v1126_v42 = vpop.f32.mrf.mxu1 }
  0xee   : > { %v590_v43 = vadd.f32 %v1094_v41, %v1366_v40  ;;  %v718_v44 = vadd.f32 %v1126_v42, %v1366_v40 }
  0xef   : > { %v581_v45 = vpop.f32.mrf.mxu0  ;;  %v709_v46 = vpop.f32.mrf.mxu1 }
  0xf0   : > { %838 = vst [vmem:[%s1371_s19 + $0x10] sm:$0xff] %v590_v43  ;;  %870 = vst [vmem:[%s1371_s19 + $0x110] sm:$0xff] %v718_v44  ;;  %v582_v47 = vadd.f32 %v1366_v40, %v581_v45  ;;  %v710_v48 = vadd.f32 %v1366_v40, %v709_v46 }
  0xf1   : > { %v1095_v49 = vpop.f32.mrf.mxu0  ;;  %v1127_v50 = vpop.f32.mrf.mxu1 }
  0xf2   : > { %836 = vst [vmem:[%s1371_s19] sm:$0xff] %v582_v47  ;;  %868 = vst [vmem:[%s1371_s19 + $0x100] sm:$0xff] %v710_v48  ;;  %v593_v51 = vadd.f32 %v1095_v49, %v1366_v40  ;;  %v721_v52 = vadd.f32 %v1127_v50, %v1366_v40 }
  0xf3   : > { %v584_v53 = vpop.f32.mrf.mxu0  ;;  %v712_v54 = vpop.f32.mrf.mxu1 }
  0xf4   : > { %839 = vst [vmem:[%s1371_s19 + $0x18] sm:$0xff] %v593_v51  ;;  %871 = vst [vmem:[%s1371_s19 + $0x118] sm:$0xff] %v721_v52  ;;  %v585_v55 = vadd.f32 %v1366_v40, %v584_v53  ;;  %v713_v56 = vadd.f32 %v1366_v40, %v712_v54 }
  0xf5   : > { %v1098_v57 = vpop.f32.mrf.mxu0  ;;  %v1130_v58 = vpop.f32.mrf.mxu1 }
  0xf6   : > { %837 = vst [vmem:[%s1371_s19 + $0x8] sm:$0xff] %v585_v55  ;;  %869 = vst [vmem:[%s1371_s19 + $0x108] sm:$0xff] %v713_v56  ;;  %v606_v59 = vadd.f32 %v1098_v57, %v1366_v40  ;;  %v734_v60 = vadd.f32 %v1130_v58, %v1366_v40 }
  0xf7   : > { %v597_v61 = vpop.f32.mrf.mxu0  ;;  %v725_v62 = vpop.f32.mrf.mxu1 }
  0xf8   : > { %842 = vst [vmem:[%s1371_s19 + $0x30] sm:$0xff] %v606_v59  ;;  %874 = vst [vmem:[%s1371_s19 + $0x130] sm:$0xff] %v734_v60  ;;  %v598_v63 = vadd.f32 %v1366_v40, %v597_v61  ;;  %v726_v0 = vadd.f32 %v1366_v40, %v725_v62 }
  0xf9   : > { %v1099_v1 = vpop.f32.mrf.mxu0  ;;  %v1131_v2 = vpop.f32.mrf.mxu1 }
  0xfa   : > { %840 = vst [vmem:[%s1371_s19 + $0x20] sm:$0xff] %v598_v63  ;;  %872 = vst [vmem:[%s1371_s19 + $0x120] sm:$0xff] %v726_v0  ;;  %v609_v3 = vadd.f32 %v1099_v1, %v1366_v40  ;;  %v737_v4 = vadd.f32 %v1131_v2, %v1366_v40 }
  0xfb   : > { %v600_v5 = vpop.f32.mrf.mxu0  ;;  %v728_v6 = vpop.f32.mrf.mxu1 }
  0xfc   : > { %843 = vst [vmem:[%s1371_s19 + $0x38] sm:$0xff] %v609_v3  ;;  %875 = vst [vmem:[%s1371_s19 + $0x138] sm:$0xff] %v737_v4  ;;  %v601_v7 = vadd.f32 %v1366_v40, %v600_v5  ;;  %v729_v8 = vadd.f32 %v1366_v40, %v728_v6 }
  0xfd   : > { %v1102_v9 = vpop.f32.mrf.mxu0  ;;  %v1134_v10 = vpop.f32.mrf.mxu1 }
  0xfe   : > { %841 = vst [vmem:[%s1371_s19 + $0x28] sm:$0xff] %v601_v7  ;;  %873 = vst [vmem:[%s1371_s19 + $0x128] sm:$0xff] %v729_v8  ;;  %v622_v11 = vadd.f32 %v1102_v9, %v1366_v40  ;;  %v750_v12 = vadd.f32 %v1134_v10, %v1366_v40 }
  0xff   : > { %v613_v13 = vpop.f32.mrf.mxu0  ;;  %v741_v14 = vpop.f32.mrf.mxu1 }
 0x100   : > { %846 = vst [vmem:[%s1371_s19 + $0x50] sm:$0xff] %v622_v11  ;;  %878 = vst [vmem:[%s1371_s19 + $0x150] sm:$0xff] %v750_v12  ;;  %v614_v15 = vadd.f32 %v1366_v40, %v613_v13  ;;  %v742_v16 = vadd.f32 %v1366_v40, %v741_v14 }
 0x101   : > { %v1103_v17 = vpop.f32.mrf.mxu0  ;;  %v1135_v18 = vpop.f32.mrf.mxu1 }
 0x102   : > { %844 = vst [vmem:[%s1371_s19 + $0x40] sm:$0xff] %v614_v15  ;;  %876 = vst [vmem:[%s1371_s19 + $0x140] sm:$0xff] %v742_v16  ;;  %v625_v19 = vadd.f32 %v1103_v17, %v1366_v40  ;;  %v753_v20 = vadd.f32 %v1135_v18, %v1366_v40 }
 0x103   : > { %v616_v21 = vpop.f32.mrf.mxu0  ;;  %v744_v22 = vpop.f32.mrf.mxu1 }
 0x104   : > { %847 = vst [vmem:[%s1371_s19 + $0x58] sm:$0xff] %v625_v19  ;;  %879 = vst [vmem:[%s1371_s19 + $0x158] sm:$0xff] %v753_v20  ;;  %v617_v23 = vadd.f32 %v1366_v40, %v616_v21  ;;  %v745_v24 = vadd.f32 %v1366_v40, %v744_v22 }
 0x105   : > { %v1106_v25 = vpop.f32.mrf.mxu0  ;;  %v1138_v26 = vpop.f32.mrf.mxu1 }
 0x106   : > { %845 = vst [vmem:[%s1371_s19 + $0x48] sm:$0xff] %v617_v23  ;;  %877 = vst [vmem:[%s1371_s19 + $0x148] sm:$0xff] %v745_v24  ;;  %v638_v27 = vadd.f32 %v1106_v25, %v1366_v40  ;;  %v766_v28 = vadd.f32 %v1138_v26, %v1366_v40 }
 0x107   : > { %v629_v29 = vpop.f32.mrf.mxu0  ;;  %v757_v30 = vpop.f32.mrf.mxu1 }
 0x108   : > { %850 = vst [vmem:[%s1371_s19 + $0x70] sm:$0xff] %v638_v27  ;;  %882 = vst [vmem:[%s1371_s19 + $0x170] sm:$0xff] %v766_v28  ;;  %v630_v31 = vadd.f32 %v1366_v40, %v629_v29  ;;  %v758_v32 = vadd.f32 %v1366_v40, %v757_v30 }
 0x109   : > { %v1107_v33 = vpop.f32.mrf.mxu0  ;;  %v1139_v34 = vpop.f32.mrf.mxu1 }
 0x10a   : > { %848 = vst [vmem:[%s1371_s19 + $0x60] sm:$0xff] %v630_v31  ;;  %880 = vst [vmem:[%s1371_s19 + $0x160] sm:$0xff] %v758_v32  ;;  %v641_v35 = vadd.f32 %v1107_v33, %v1366_v40  ;;  %v769_v36 = vadd.f32 %v1139_v34, %v1366_v40 }
 0x10b   : > { %v632_v37 = vpop.f32.mrf.mxu0  ;;  %v760_v38 = vpop.f32.mrf.mxu1 }
 0x10c   : > { %851 = vst [vmem:[%s1371_s19 + $0x78] sm:$0xff] %v641_v35  ;;  %883 = vst [vmem:[%s1371_s19 + $0x178] sm:$0xff] %v769_v36  ;;  %v633_v39 = vadd.f32 %v1366_v40, %v632_v37  ;;  %v761_v41 = vadd.f32 %v1366_v40, %v760_v38 }
 0x10d   : > { %v1110_v42 = vpop.f32.mrf.mxu0  ;;  %v1142_v43 = vpop.f32.mrf.mxu1 }
 0x10e   : > { %849 = vst [vmem:[%s1371_s19 + $0x68] sm:$0xff] %v633_v39  ;;  %881 = vst [vmem:[%s1371_s19 + $0x168] sm:$0xff] %v761_v41  ;;  %v654_v44 = vadd.f32 %v1110_v42, %v1366_v40  ;;  %v782_v45 = vadd.f32 %v1142_v43, %v1366_v40 }
 0x10f   : > { %v645_v46 = vpop.f32.mrf.mxu0  ;;  %v773_v47 = vpop.f32.mrf.mxu1 }
 0x110   : > { %854 = vst [vmem:[%s1371_s19 + $0x90] sm:$0xff] %v654_v44  ;;  %886 = vst [vmem:[%s1371_s19 + $0x190] sm:$0xff] %v782_v45  ;;  %v646_v48 = vadd.f32 %v1366_v40, %v645_v46  ;;  %v774_v49 = vadd.f32 %v1366_v40, %v773_v47 }
 0x111   : > { %v1111_v50 = vpop.f32.mrf.mxu0  ;;  %v1143_v51 = vpop.f32.mrf.mxu1 }
 0x112   : > { %852 = vst [vmem:[%s1371_s19 + $0x80] sm:$0xff] %v646_v48  ;;  %884 = vst [vmem:[%s1371_s19 + $0x180] sm:$0xff] %v774_v49  ;;  %v657_v52 = vadd.f32 %v1111_v50, %v1366_v40  ;;  %v785_v53 = vadd.f32 %v1143_v51, %v1366_v40 }
 0x113   : > { %v648_v54 = vpop.f32.mrf.mxu0  ;;  %v776_v55 = vpop.f32.mrf.mxu1 }
 0x114   : > { %855 = vst [vmem:[%s1371_s19 + $0x98] sm:$0xff] %v657_v52  ;;  %887 = vst [vmem:[%s1371_s19 + $0x198] sm:$0xff] %v785_v53  ;;  %v649_v56 = vadd.f32 %v1366_v40, %v648_v54  ;;  %v777_v57 = vadd.f32 %v1366_v40, %v776_v55 }
 0x115   : > { %v1114_v58 = vpop.f32.mrf.mxu0  ;;  %v1146_v59 = vpop.f32.mrf.mxu1 }
 0x116   : > { %853 = vst [vmem:[%s1371_s19 + $0x88] sm:$0xff] %v649_v56  ;;  %885 = vst [vmem:[%s1371_s19 + $0x188] sm:$0xff] %v777_v57  ;;  %v670_v60 = vadd.f32 %v1114_v58, %v1366_v40  ;;  %v798_v61 = vadd.f32 %v1146_v59, %v1366_v40 }
 0x117   : > { %v661_v62 = vpop.f32.mrf.mxu0  ;;  %v789_v63 = vpop.f32.mrf.mxu1 }
 0x118   : > { %858 = vst [vmem:[%s1371_s19 + $0xb0] sm:$0xff] %v670_v60  ;;  %890 = vst [vmem:[%s1371_s19 + $0x1b0] sm:$0xff] %v798_v61  ;;  %v662_v0 = vadd.f32 %v1366_v40, %v661_v62  ;;  %v790_v1 = vadd.f32 %v1366_v40, %v789_v63 }
 0x119   : > { %v1115_v2 = vpop.f32.mrf.mxu0  ;;  %v1147_v3 = vpop.f32.mrf.mxu1 }
 0x11a   : > { %856 = vst [vmem:[%s1371_s19 + $0xa0] sm:$0xff] %v662_v0  ;;  %888 = vst [vmem:[%s1371_s19 + $0x1a0] sm:$0xff] %v790_v1  ;;  %v673_v4 = vadd.f32 %v1115_v2, %v1366_v40  ;;  %v801_v5 = vadd.f32 %v1147_v3, %v1366_v40 }
 0x11b   : > { %v664_v6 = vpop.f32.mrf.mxu0  ;;  %v792_v7 = vpop.f32.mrf.mxu1 }
 0x11c   : > { %859 = vst [vmem:[%s1371_s19 + $0xb8] sm:$0xff] %v673_v4  ;;  %891 = vst [vmem:[%s1371_s19 + $0x1b8] sm:$0xff] %v801_v5  ;;  %v665_v8 = vadd.f32 %v1366_v40, %v664_v6  ;;  %v793_v9 = vadd.f32 %v1366_v40, %v792_v7 }
 0x11d   : > { %v1118_v10 = vpop.f32.mrf.mxu0  ;;  %v1150_v11 = vpop.f32.mrf.mxu1 }
 0x11e   : > { %857 = vst [vmem:[%s1371_s19 + $0xa8] sm:$0xff] %v665_v8  ;;  %889 = vst [vmem:[%s1371_s19 + $0x1a8] sm:$0xff] %v793_v9  ;;  %v686_v12 = vadd.f32 %v1118_v10, %v1366_v40  ;;  %v814_v13 = vadd.f32 %v1150_v11, %v1366_v40 }
 0x11f   : > { %v677_v14 = vpop.f32.mrf.mxu0  ;;  %v805_v15 = vpop.f32.mrf.mxu1 }
 0x120   : > { %862 = vst [vmem:[%s1371_s19 + $0xd0] sm:$0xff] %v686_v12  ;;  %894 = vst [vmem:[%s1371_s19 + $0x1d0] sm:$0xff] %v814_v13  ;;  %v678_v16 = vadd.f32 %v1366_v40, %v677_v14  ;;  %v806_v17 = vadd.f32 %v1366_v40, %v805_v15 }
 0x121   : > { %v1119_v18 = vpop.f32.mrf.mxu0  ;;  %v1151_v19 = vpop.f32.mrf.mxu1 }
 0x122   : > { %860 = vst [vmem:[%s1371_s19 + $0xc0] sm:$0xff] %v678_v16  ;;  %892 = vst [vmem:[%s1371_s19 + $0x1c0] sm:$0xff] %v806_v17  ;;  %v689_v20 = vadd.f32 %v1119_v18, %v1366_v40  ;;  %v817_v21 = vadd.f32 %v1151_v19, %v1366_v40 }
 0x123   : > { %v680_v22 = vpop.f32.mrf.mxu0  ;;  %v808_v23 = vpop.f32.mrf.mxu1 }
 0x124   : > { %863 = vst [vmem:[%s1371_s19 + $0xd8] sm:$0xff] %v689_v20  ;;  %895 = vst [vmem:[%s1371_s19 + $0x1d8] sm:$0xff] %v817_v21  ;;  %v681_v24 = vadd.f32 %v1366_v40, %v680_v22  ;;  %v809_v25 = vadd.f32 %v1366_v40, %v808_v23 }
 0x125   : > { %v1122_v26 = vpop.f32.mrf.mxu0  ;;  %v1154_v27 = vpop.f32.mrf.mxu1 }
 0x126   : > { %861 = vst [vmem:[%s1371_s19 + $0xc8] sm:$0xff] %v681_v24  ;;  %893 = vst [vmem:[%s1371_s19 + $0x1c8] sm:$0xff] %v809_v25  ;;  %v702_v28 = vadd.f32 %v1122_v26, %v1366_v40  ;;  %v830_v29 = vadd.f32 %v1154_v27, %v1366_v40 }
 0x127   : > { %v693_v30 = vpop.f32.mrf.mxu0  ;;  %v821_v31 = vpop.f32.mrf.mxu1 }
 0x128   : > { %866 = vst [vmem:[%s1371_s19 + $0xf0] sm:$0xff] %v702_v28  ;;  %898 = vst [vmem:[%s1371_s19 + $0x1f0] sm:$0xff] %v830_v29  ;;  %v694_v32 = vadd.f32 %v1366_v40, %v693_v30  ;;  %v822_v33 = vadd.f32 %v1366_v40, %v821_v31 }
 0x129   : > { %v1123_v34 = vpop.f32.mrf.mxu0  ;;  %v1155_v35 = vpop.f32.mrf.mxu1 }
 0x12a   : > { %864 = vst [vmem:[%s1371_s19 + $0xe0] sm:$0xff] %v694_v32  ;;  %896 = vst [vmem:[%s1371_s19 + $0x1e0] sm:$0xff] %v822_v33  ;;  %v705_v36 = vadd.f32 %v1123_v34, %v1366_v40  ;;  %v833_v37 = vadd.f32 %v1155_v35, %v1366_v40 }
 0x12b   : > { %v696_v38 = vpop.f32.mrf.mxu0  ;;  %v824_v39 = vpop.f32.mrf.mxu1 }
 0x12c   : > { %867 = vst [vmem:[%s1371_s19 + $0xf8] sm:$0xff] %v705_v36  ;;  %899 = vst [vmem:[%s1371_s19 + $0x1f8] sm:$0xff] %v833_v37  ;;  %v697_v41 = vadd.f32 %v1366_v40, %v696_v38  ;;  %v825_v42 = vadd.f32 %v1366_v40, %v824_v39 }
 0x12e   : > { %865 = vst [vmem:[%s1371_s19 + $0xe8] sm:$0xff] %v697_v41  ;;  %897 = vst [vmem:[%s1371_s19 + $0x1e8] sm:$0xff] %v825_v42 }
 0x12f PF: > { %s13_s14 = sadd.s32 1, %s1258_s14   ;;  %s1514_s12 = smov %s1254_s13 }
 0x130   : > { %p10_p5 = scmp.ge.s32.totalorder %s13_s14, 6   ;;  %s1515_s13 = smov %s1517_s15 }
 0x132   :  { %12 = sbr.rel (!%p10_p5) target bundleno = 2 (0x2), region = 65 }

</bundles_post_ra>
